<compile_context>
chip_gen: v7x
topology: tpu7x:2x2x1
jax: 0.10.0
libtpu: 0.0.40
codegen_flags: <defaults>
</compile_context>

<pallas_src>
import math

import numpy as np

import jax
import jax.numpy as jnp
from jax.experimental import pallas as pl
from jax.experimental.pallas import tpu as pltpu

INPUT_SIZE = 50     # hard-coded in the PyTorch module (nn.LSTM(50, 25, ...))
HIDDEN_SIZE = 25    # hard-coded in the PyTorch module
NUM_LAYERS = 2
DROPOUT = 0.0
# TODO(synk): nn.LSTM applies inter-layer dropout only in training mode with
# dropout > 0; with dropout=0.0 (inference) the forward here matches exactly.

GATE_PAD = 128      # per-gate lane padding (one full lane tile)


# ----------------------------- host-side prep (runs ONCE) -----------------------------
def prepare_params(params):
    """Pad / transpose / pre-scale the LSTM weights and build the fused
    wavefront RHS block matrix.  Pure numpy, done once at parameter load."""
    L = len(params)
    H = int(np.asarray(params[0][1]).shape[1])      # w_hh: (4H, H)
    HP = GATE_PAD

    def to_np(a):
        return np.asarray(jax.device_get(a), np.float32)

    def pad_scale(mat, rows):
        # mat: (R, 4H), gate order i,f,g,o along columns ->
        # (rows, 4*HP) with gate g's values at cols [g*HP, g*HP+H);
        # i/f/o columns are pre-scaled by 0.5 (tanh-form sigmoid).
        R = mat.shape[0]
        out = np.zeros((rows, 4 * HP), np.float32)
        for g in range(4):
            s = np.float32(1.0 if g == 2 else 0.5)
            out[:R, g * HP:g * HP + H] = s * mat[:, g * H:(g + 1) * H]
        return out

    # Layer 0 input projection (hoisted out of the recurrence in-kernel).
    w_ih0, w_hh0, b_ih0, b_hh0 = params[0]
    w_ih0 = to_np(w_ih0)
    din0 = w_ih0.shape[1]
    wih0_p = pad_scale(w_ih0.T, din0)                                   # (Din, 4*HP)
    b0_p = pad_scale((to_np(b_ih0) + to_np(b_hh0)).reshape(1, 4 * H), 1)  # (1, 4*HP)

    # Fused wavefront RHS: row-block l = layer-l hidden state lanes,
    # column-block l = layer-l gates.  Block (l,l) = Whh_l^T, block (l-1,l) = Wih_l^T.
    rhs = np.zeros((L * HP, L * 4 * HP), np.float32)
    brest = np.zeros((max(L - 1, 1), 4 * HP), np.float32)               # biases for layers >= 1
    for l in range(L):
        w_ih, w_hh, b_ih, b_hh = params[l]
        rhs[l * HP:(l + 1) * HP, l * 4 * HP:(l + 1) * 4 * HP] = pad_scale(to_np(w_hh).T, HP)
        if l >= 1:
            rhs[(l - 1) * HP:l * HP, l * 4 * HP:(l + 1) * 4 * HP] = pad_scale(to_np(w_ih).T, HP)
            brest[l - 1] = pad_scale(
                (to_np(b_ih) + to_np(b_hh)).reshape(1, 4 * H), 1)[0]

    prepared = (jnp.asarray(wih0_p), jnp.asarray(b0_p),
                jnp.asarray(rhs), jnp.asarray(brest))
    return prepared, H, L


# ----------------------------- fused kernel + jitted wrapper -----------------------------
def make_extractor(params):
    """Returns a jitted forward(x) closure.  Weight prep happens once, here."""
    (wih0_p, b0_p, rhs, brest), hidden, num_layers = prepare_params(params)
    HP = GATE_PAD

    @jax.jit
    def forward(x):
        T, B, Din = x.shape
        L = num_layers
        x_flat = x.astype(jnp.float32).reshape(T * B, Din)   # wrapper-side reshape

        def kernel(x_ref, wih0_ref, b0_ref, rhs_ref, brest_ref, out_ref):
            # Hoisted layer-0 input->gates contribution for all timesteps.
            xg = jnp.dot(x_ref[...], wih0_ref[...],
                         preferred_element_type=jnp.float32) + b0_ref[...]
            # Pre-split per timestep once, up front (off the serial path).
            xg_t = [xg[t * B:(t + 1) * B, :] for t in range(T)]

            rhs_m = rhs_ref[...]
            brest_m = brest_ref[...]

            def cell(gz, c_prev):
                # One tanh pass over the whole (B, 4*HP) gate block.
                # i/f/o pre-activations were pre-scaled by 0.5 on the host:
                #   sigmoid(z) = 0.5 * (1 + tanh(z/2)).
                y = jnp.tanh(gz)
                i = 0.5 * y[:, 0 * HP:1 * HP] + 0.5
                f = 0.5 * y[:, 1 * HP:2 * HP] + 0.5
                g = y[:, 2 * HP:3 * HP]
                o = 0.5 * y[:, 3 * HP:4 * HP] + 0.5
                c_new = f * c_prev + i * g
                h_new = o * jnp.tanh(c_new)
                return h_new, c_new

            h = [jnp.zeros((B, HP), jnp.float32) for _ in range(L)]
            c = [jnp.zeros((B, HP), jnp.float32) for _ in range(L)]

            # Wavefront over diagonals: at step s, layer l advances to t = s - l.
            for s in range(T + L - 1):
                if s == 0:
                    fused = None            # all states are zero: no matmul needed
                else:
                    lhs = jnp.concatenate(h, axis=1) if L > 1 else h[0]
                    fused = jnp.dot(lhs, rhs_m,
                                    preferred_element_type=jnp.float32)  # (B, L*4*HP)
                new_h = list(h)
                new_c = list(c)
                for l in range(L):
                    t = s - l
                    if 0 <= t < T:
                        if l == 0:
                            gz = xg_t[t] if fused is None else xg_t[t] + fused[:, :4 * HP]
                        else:
                            gz = brest_m[l - 1:l, :] + \
                                fused[:, l * 4 * HP:(l + 1) * 4 * HP]
                        new_h[l], new_c[l] = cell(gz, c[l])
                        if l == L - 1:
                            # Lane/sublane-dense per-step store of the top layer.
                            out_ref[t * B:(t + 1) * B, :] = new_h[l]
                h, c = new_h, new_c

        vmem = pl.BlockSpec(memory_space=pltpu.MemorySpace.VMEM)
        out = pl.pallas_call(
            kernel,
            out_shape=jax.ShapeDtypeStruct((T * B, HP), jnp.float32),
            in_specs=[vmem, vmem, vmem, vmem, vmem],
            out_specs=vmem,
        )(x_flat, wih0_p, b0_p, rhs, brest)
        return out.reshape(T, B, HP)[:, :, :hidden]

    return forward


def extractor_forward(x, params):
    """One-shot convenience wrapper (preps weights then calls the jitted forward)."""
    return make_extractor(params)(x)


# ----------------------------- reference (pure JAX) -----------------------------
def _lstm_layer_ref(x, w_ih, w_hh, b_ih, b_hh):
    T, B, _ = x.shape
    H = w_hh.shape[1]
    prec = jax.lax.Precision.HIGHEST

    def step(carry, x_t):
        h, c = carry
        gates = (jnp.dot(x_t, w_ih.T, precision=prec)
                 + jnp.dot(h, w_hh.T, precision=prec) + b_ih + b_hh)
        i = jax.nn.sigmoid(gates[:, 0 * H:1 * H])
        f = jax.nn.sigmoid(gates[:, 1 * H:2 * H])
        g = jnp.tanh(gates[:, 2 * H:3 * H])
        o = jax.nn.sigmoid(gates[:, 3 * H:4 * H])
        c = f * c + i * g
        h = o * jnp.tanh(c)
        return (h, c), h

    init = (jnp.zeros((B, H), jnp.float32), jnp.zeros((B, H), jnp.float32))
    _, ys = jax.lax.scan(step, init, x)
    return ys


def extractor_forward_ref(x, params):
    out = x
    for layer_params in params:
        out = _lstm_layer_ref(out, *layer_params)
    return out


# ----------------------------- parameter init -----------------------------
def init_lstm_params(key, input_size, hidden_size, num_layers):
    """Deterministic init matching nn.LSTM shapes: U(-1/sqrt(H), 1/sqrt(H))."""
    k = 1.0 / math.sqrt(hidden_size)
    params = []
    for layer in range(num_layers):
        din = input_size if layer == 0 else hidden_size
        key, k1, k2, k3, k4 = jax.random.split(key, 5)
        w_ih = jax.random.uniform(k1, (4 * hidden_size, din), jnp.float32, -k, k)
        w_hh = jax.random.uniform(k2, (4 * hidden_size, hidden_size), jnp.float32, -k, k)
        b_ih = jax.random.uniform(k3, (4 * hidden_size,), jnp.float32, -k, k)
        b_hh = jax.random.uniform(k4, (4 * hidden_size,), jnp.float32, -k, k)
        params.append((w_ih, w_hh, b_ih, b_hh))
    return params


if __name__ == "__main__":
    key = jax.random.PRNGKey(0)
    k_x, k_p = jax.random.split(key)

    T, B = 8, 2                                   # seq_len=8, batch=2
    x = jax.random.normal(k_x, (T, B, INPUT_SIZE), jnp.float32)

    params = init_lstm_params(k_p, INPUT_SIZE, HIDDEN_SIZE, NUM_LAYERS)

    forward = make_extractor(params)              # weight prep happens once, here
    out = jax.block_until_ready(forward(x))

    ref = jax.block_until_ready(extractor_forward_ref(x, params))
    assert out.shape == (T, B, HIDDEN_SIZE), out.shape
    assert jnp.allclose(out, ref, atol=1e-5, rtol=1e-5), "mismatch vs JAX reference"

    print("KERNEL_OK")
</pallas_src>

<mosaic_0001>
module attributes {stable_mosaic.version = 11 : i64} {
  func.func @kernel(%arg0: memref<16x50xf32, #tpu.memory_space<vmem>>, %arg1: memref<50x512xf32, #tpu.memory_space<vmem>>, %arg2: memref<1x512xf32, #tpu.memory_space<vmem>>, %arg3: memref<256x1024xf32, #tpu.memory_space<vmem>>, %arg4: memref<1x512xf32, #tpu.memory_space<vmem>>, %arg5: memref<16x128xf32, #tpu.memory_space<vmem>>) attributes {dimension_semantics = [], scalar_prefetch = 0 : i64, scratch_operands = 0 : i64, tpu.core_type = #tpu.core_type<tc>} {
    %c0 = arith.constant 0 : index
    %c0_0 = arith.constant 0 : index
    %0 = vector.load %arg0[%c0, %c0_0] : memref<16x50xf32, #tpu.memory_space<vmem>>, vector<16x50xf32>
    %c0_1 = arith.constant 0 : index
    %c0_2 = arith.constant 0 : index
    %1 = vector.load %arg1[%c0_1, %c0_2] : memref<50x512xf32, #tpu.memory_space<vmem>>, vector<50x512xf32>
    %cst = arith.constant dense<0.000000e+00> : vector<16x512xf32>
    %2 = tpu.matmul %0, %1, %cst {dimension_numbers = #tpu.dot_dimension_numbers<[1], [0], [0], [1], [0, 0, 1, 1], [], []>} : vector<16x50xf32>, vector<50x512xf32>, vector<16x512xf32> -> vector<16x512xf32>
    %c0_3 = arith.constant 0 : index
    %c0_4 = arith.constant 0 : index
    %3 = vector.load %arg2[%c0_3, %c0_4] : memref<1x512xf32, #tpu.memory_space<vmem>>, vector<1x512xf32>
    %4 = vector.broadcast %3 : vector<1x512xf32> to vector<16x512xf32>
    %5 = arith.addf %2, %4 : vector<16x512xf32>
    %6 = vector.extract_strided_slice %5 {offsets = [0, 0], sizes = [2, 512], strides = [1, 1]} : vector<16x512xf32> to vector<2x512xf32>
    %7 = vector.extract_strided_slice %5 {offsets = [2, 0], sizes = [2, 512], strides = [1, 1]} : vector<16x512xf32> to vector<2x512xf32>
    %8 = vector.extract_strided_slice %5 {offsets = [4, 0], sizes = [2, 512], strides = [1, 1]} : vector<16x512xf32> to vector<2x512xf32>
    %9 = vector.extract_strided_slice %5 {offsets = [6, 0], sizes = [2, 512], strides = [1, 1]} : vector<16x512xf32> to vector<2x512xf32>
    %10 = vector.extract_strided_slice %5 {offsets = [8, 0], sizes = [2, 512], strides = [1, 1]} : vector<16x512xf32> to vector<2x512xf32>
    %11 = vector.extract_strided_slice %5 {offsets = [10, 0], sizes = [2, 512], strides = [1, 1]} : vector<16x512xf32> to vector<2x512xf32>
    %12 = vector.extract_strided_slice %5 {offsets = [12, 0], sizes = [2, 512], strides = [1, 1]} : vector<16x512xf32> to vector<2x512xf32>
    %13 = vector.extract_strided_slice %5 {offsets = [14, 0], sizes = [2, 512], strides = [1, 1]} : vector<16x512xf32> to vector<2x512xf32>
    %c0_5 = arith.constant 0 : index
    %c0_6 = arith.constant 0 : index
    %14 = vector.load %arg3[%c0_5, %c0_6] : memref<256x1024xf32, #tpu.memory_space<vmem>>, vector<256x1024xf32>
    %c0_7 = arith.constant 0 : index
    %c0_8 = arith.constant 0 : index
    %15 = vector.load %arg4[%c0_7, %c0_8] : memref<1x512xf32, #tpu.memory_space<vmem>>, vector<1x512xf32>
    %cst_9 = arith.constant 0.000000e+00 : f32
    %16 = vector.broadcast %cst_9 : f32 to vector<2x128xf32>
    %cst_10 = arith.constant 0.000000e+00 : f32
    %17 = vector.broadcast %cst_10 : f32 to vector<2x128xf32>
    %cst_11 = arith.constant 0.000000e+00 : f32
    %18 = vector.broadcast %cst_11 : f32 to vector<2x128xf32>
    %19 = math.tanh %6 : vector<2x512xf32>
    %20 = vector.extract_strided_slice %19 {offsets = [0, 0], sizes = [2, 128], strides = [1, 1]} : vector<2x512xf32> to vector<2x128xf32>
    %cst_12 = arith.constant 5.000000e-01 : f32
    %21 = vector.broadcast %cst_12 : f32 to vector<2x128xf32>
    %22 = arith.mulf %21, %20 : vector<2x128xf32>
    %cst_13 = arith.constant 5.000000e-01 : f32
    %23 = vector.broadcast %cst_13 : f32 to vector<2x128xf32>
    %24 = arith.addf %22, %23 : vector<2x128xf32>
    %25 = vector.extract_strided_slice %19 {offsets = [0, 128], sizes = [2, 128], strides = [1, 1]} : vector<2x512xf32> to vector<2x128xf32>
    %cst_14 = arith.constant 5.000000e-01 : f32
    %26 = vector.broadcast %cst_14 : f32 to vector<2x128xf32>
    %27 = arith.mulf %26, %25 : vector<2x128xf32>
    %cst_15 = arith.constant 5.000000e-01 : f32
    %28 = vector.broadcast %cst_15 : f32 to vector<2x128xf32>
    %29 = arith.addf %27, %28 : vector<2x128xf32>
    %30 = vector.extract_strided_slice %19 {offsets = [0, 256], sizes = [2, 128], strides = [1, 1]} : vector<2x512xf32> to vector<2x128xf32>
    %31 = vector.extract_strided_slice %19 {offsets = [0, 384], sizes = [2, 128], strides = [1, 1]} : vector<2x512xf32> to vector<2x128xf32>
    %cst_16 = arith.constant 5.000000e-01 : f32
    %32 = vector.broadcast %cst_16 : f32 to vector<2x128xf32>
    %33 = arith.mulf %32, %31 : vector<2x128xf32>
    %cst_17 = arith.constant 5.000000e-01 : f32
    %34 = vector.broadcast %cst_17 : f32 to vector<2x128xf32>
    %35 = arith.addf %33, %34 : vector<2x128xf32>
    %36 = arith.mulf %29, %17 : vector<2x128xf32>
    %37 = arith.mulf %24, %30 : vector<2x128xf32>
    %38 = arith.addf %36, %37 : vector<2x128xf32>
    %39 = math.tanh %38 : vector<2x128xf32>
    %40 = arith.mulf %35, %39 : vector<2x128xf32>
    %41 = tpu.concatenate %40, %16 in 1 : vector<2x128xf32>, vector<2x128xf32> -> vector<2x256xf32>
    %cst_18 = arith.constant dense<0.000000e+00> : vector<2x1024xf32>
    %42 = tpu.matmul %41, %14, %cst_18 {dimension_numbers = #tpu.dot_dimension_numbers<[1], [0], [0], [1], [0, 0, 1, 1], [], []>} : vector<2x256xf32>, vector<256x1024xf32>, vector<2x1024xf32> -> vector<2x1024xf32>
    %43 = vector.extract_strided_slice %42 {offsets = [0, 0], sizes = [2, 512], strides = [1, 1]} : vector<2x1024xf32> to vector<2x512xf32>
    %44 = arith.addf %7, %43 : vector<2x512xf32>
    %45 = math.tanh %44 : vector<2x512xf32>
    %46 = vector.extract_strided_slice %45 {offsets = [0, 0], sizes = [2, 128], strides = [1, 1]} : vector<2x512xf32> to vector<2x128xf32>
    %cst_19 = arith.constant 5.000000e-01 : f32
    %47 = vector.broadcast %cst_19 : f32 to vector<2x128xf32>
    %48 = arith.mulf %47, %46 : vector<2x128xf32>
    %cst_20 = arith.constant 5.000000e-01 : f32
    %49 = vector.broadcast %cst_20 : f32 to vector<2x128xf32>
    %50 = arith.addf %48, %49 : vector<2x128xf32>
    %51 = vector.extract_strided_slice %45 {offsets = [0, 128], sizes = [2, 128], strides = [1, 1]} : vector<2x512xf32> to vector<2x128xf32>
    %cst_21 = arith.constant 5.000000e-01 : f32
    %52 = vector.broadcast %cst_21 : f32 to vector<2x128xf32>
    %53 = arith.mulf %52, %51 : vector<2x128xf32>
    %cst_22 = arith.constant 5.000000e-01 : f32
    %54 = vector.broadcast %cst_22 : f32 to vector<2x128xf32>
    %55 = arith.addf %53, %54 : vector<2x128xf32>
    %56 = vector.extract_strided_slice %45 {offsets = [0, 256], sizes = [2, 128], strides = [1, 1]} : vector<2x512xf32> to vector<2x128xf32>
    %57 = vector.extract_strided_slice %45 {offsets = [0, 384], sizes = [2, 128], strides = [1, 1]} : vector<2x512xf32> to vector<2x128xf32>
    %cst_23 = arith.constant 5.000000e-01 : f32
    %58 = vector.broadcast %cst_23 : f32 to vector<2x128xf32>
    %59 = arith.mulf %58, %57 : vector<2x128xf32>
    %cst_24 = arith.constant 5.000000e-01 : f32
    %60 = vector.broadcast %cst_24 : f32 to vector<2x128xf32>
    %61 = arith.addf %59, %60 : vector<2x128xf32>
    %62 = arith.mulf %55, %38 : vector<2x128xf32>
    %63 = arith.mulf %50, %56 : vector<2x128xf32>
    %64 = arith.addf %62, %63 : vector<2x128xf32>
    %65 = math.tanh %64 : vector<2x128xf32>
    %66 = arith.mulf %61, %65 : vector<2x128xf32>
    %67 = vector.extract_strided_slice %42 {offsets = [0, 512], sizes = [2, 512], strides = [1, 1]} : vector<2x1024xf32> to vector<2x512xf32>
    %68 = vector.broadcast %15 : vector<1x512xf32> to vector<2x512xf32>
    %69 = arith.addf %68, %67 : vector<2x512xf32>
    %70 = math.tanh %69 : vector<2x512xf32>
    %71 = vector.extract_strided_slice %70 {offsets = [0, 0], sizes = [2, 128], strides = [1, 1]} : vector<2x512xf32> to vector<2x128xf32>
    %cst_25 = arith.constant 5.000000e-01 : f32
    %72 = vector.broadcast %cst_25 : f32 to vector<2x128xf32>
    %73 = arith.mulf %72, %71 : vector<2x128xf32>
    %cst_26 = arith.constant 5.000000e-01 : f32
    %74 = vector.broadcast %cst_26 : f32 to vector<2x128xf32>
    %75 = arith.addf %73, %74 : vector<2x128xf32>
    %76 = vector.extract_strided_slice %70 {offsets = [0, 128], sizes = [2, 128], strides = [1, 1]} : vector<2x512xf32> to vector<2x128xf32>
    %cst_27 = arith.constant 5.000000e-01 : f32
    %77 = vector.broadcast %cst_27 : f32 to vector<2x128xf32>
    %78 = arith.mulf %77, %76 : vector<2x128xf32>
    %cst_28 = arith.constant 5.000000e-01 : f32
    %79 = vector.broadcast %cst_28 : f32 to vector<2x128xf32>
    %80 = arith.addf %78, %79 : vector<2x128xf32>
    %81 = vector.extract_strided_slice %70 {offsets = [0, 256], sizes = [2, 128], strides = [1, 1]} : vector<2x512xf32> to vector<2x128xf32>
    %82 = vector.extract_strided_slice %70 {offsets = [0, 384], sizes = [2, 128], strides = [1, 1]} : vector<2x512xf32> to vector<2x128xf32>
    %cst_29 = arith.constant 5.000000e-01 : f32
    %83 = vector.broadcast %cst_29 : f32 to vector<2x128xf32>
    %84 = arith.mulf %83, %82 : vector<2x128xf32>
    %cst_30 = arith.constant 5.000000e-01 : f32
    %85 = vector.broadcast %cst_30 : f32 to vector<2x128xf32>
    %86 = arith.addf %84, %85 : vector<2x128xf32>
    %87 = arith.mulf %80, %18 : vector<2x128xf32>
    %88 = arith.mulf %75, %81 : vector<2x128xf32>
    %89 = arith.addf %87, %88 : vector<2x128xf32>
    %90 = math.tanh %89 : vector<2x128xf32>
    %91 = arith.mulf %86, %90 : vector<2x128xf32>
    %c0_31 = arith.constant 0 : index
    %c0_32 = arith.constant 0 : index
    %92 = vector.load %arg5[%c0_31, %c0_32] : memref<16x128xf32, #tpu.memory_space<vmem>>, vector<2x128xf32>
    tpu.vector_store %arg5[%c0_31, %c0_32], %91 {strides = array<i32>} : memref<16x128xf32, #tpu.memory_space<vmem>>, vector<2x128xf32>,
    %93 = tpu.concatenate %66, %91 in 1 : vector<2x128xf32>, vector<2x128xf32> -> vector<2x256xf32>
    %cst_33 = arith.constant dense<0.000000e+00> : vector<2x1024xf32>
    %94 = tpu.matmul %93, %14, %cst_33 {dimension_numbers = #tpu.dot_dimension_numbers<[1], [0], [0], [1], [0, 0, 1, 1], [], []>} : vector<2x256xf32>, vector<256x1024xf32>, vector<2x1024xf32> -> vector<2x1024xf32>
    %95 = vector.extract_strided_slice %94 {offsets = [0, 0], sizes = [2, 512], strides = [1, 1]} : vector<2x1024xf32> to vector<2x512xf32>
    %96 = arith.addf %8, %95 : vector<2x512xf32>
    %97 = math.tanh %96 : vector<2x512xf32>
    %98 = vector.extract_strided_slice %97 {offsets = [0, 0], sizes = [2, 128], strides = [1, 1]} : vector<2x512xf32> to vector<2x128xf32>
    %cst_34 = arith.constant 5.000000e-01 : f32
    %99 = vector.broadcast %cst_34 : f32 to vector<2x128xf32>
    %100 = arith.mulf %99, %98 : vector<2x128xf32>
    %cst_35 = arith.constant 5.000000e-01 : f32
    %101 = vector.broadcast %cst_35 : f32 to vector<2x128xf32>
    %102 = arith.addf %100, %101 : vector<2x128xf32>
    %103 = vector.extract_strided_slice %97 {offsets = [0, 128], sizes = [2, 128], strides = [1, 1]} : vector<2x512xf32> to vector<2x128xf32>
    %cst_36 = arith.constant 5.000000e-01 : f32
    %104 = vector.broadcast %cst_36 : f32 to vector<2x128xf32>
    %105 = arith.mulf %104, %103 : vector<2x128xf32>
    %cst_37 = arith.constant 5.000000e-01 : f32
    %106 = vector.broadcast %cst_37 : f32 to vector<2x128xf32>
    %107 = arith.addf %105, %106 : vector<2x128xf32>
    %108 = vector.extract_strided_slice %97 {offsets = [0, 256], sizes = [2, 128], strides = [1, 1]} : vector<2x512xf32> to vector<2x128xf32>
    %109 = vector.extract_strided_slice %97 {offsets = [0, 384], sizes = [2, 128], strides = [1, 1]} : vector<2x512xf32> to vector<2x128xf32>
    %cst_38 = arith.constant 5.000000e-01 : f32
    %110 = vector.broadcast %cst_38 : f32 to vector<2x128xf32>
    %111 = arith.mulf %110, %109 : vector<2x128xf32>
    %cst_39 = arith.constant 5.000000e-01 : f32
    %112 = vector.broadcast %cst_39 : f32 to vector<2x128xf32>
    %113 = arith.addf %111, %112 : vector<2x128xf32>
    %114 = arith.mulf %107, %64 : vector<2x128xf32>
    %115 = arith.mulf %102, %108 : vector<2x128xf32>
    %116 = arith.addf %114, %115 : vector<2x128xf32>
    %117 = math.tanh %116 : vector<2x128xf32>
    %118 = arith.mulf %113, %117 : vector<2x128xf32>
    %119 = vector.extract_strided_slice %94 {offsets = [0, 512], sizes = [2, 512], strides = [1, 1]} : vector<2x1024xf32> to vector<2x512xf32>
    %120 = vector.broadcast %15 : vector<1x512xf32> to vector<2x512xf32>
    %121 = arith.addf %120, %119 : vector<2x512xf32>
    %122 = math.tanh %121 : vector<2x512xf32>
    %123 = vector.extract_strided_slice %122 {offsets = [0, 0], sizes = [2, 128], strides = [1, 1]} : vector<2x512xf32> to vector<2x128xf32>
    %cst_40 = arith.constant 5.000000e-01 : f32
    %124 = vector.broadcast %cst_40 : f32 to vector<2x128xf32>
    %125 = arith.mulf %124, %123 : vector<2x128xf32>
    %cst_41 = arith.constant 5.000000e-01 : f32
    %126 = vector.broadcast %cst_41 : f32 to vector<2x128xf32>
    %127 = arith.addf %125, %126 : vector<2x128xf32>
    %128 = vector.extract_strided_slice %122 {offsets = [0, 128], sizes = [2, 128], strides = [1, 1]} : vector<2x512xf32> to vector<2x128xf32>
    %cst_42 = arith.constant 5.000000e-01 : f32
    %129 = vector.broadcast %cst_42 : f32 to vector<2x128xf32>
    %130 = arith.mulf %129, %128 : vector<2x128xf32>
    %cst_43 = arith.constant 5.000000e-01 : f32
    %131 = vector.broadcast %cst_43 : f32 to vector<2x128xf32>
    %132 = arith.addf %130, %131 : vector<2x128xf32>
    %133 = vector.extract_strided_slice %122 {offsets = [0, 256], sizes = [2, 128], strides = [1, 1]} : vector<2x512xf32> to vector<2x128xf32>
    %134 = vector.extract_strided_slice %122 {offsets = [0, 384], sizes = [2, 128], strides = [1, 1]} : vector<2x512xf32> to vector<2x128xf32>
    %cst_44 = arith.constant 5.000000e-01 : f32
    %135 = vector.broadcast %cst_44 : f32 to vector<2x128xf32>
    %136 = arith.mulf %135, %134 : vector<2x128xf32>
    %cst_45 = arith.constant 5.000000e-01 : f32
    %137 = vector.broadcast %cst_45 : f32 to vector<2x128xf32>
    %138 = arith.addf %136, %137 : vector<2x128xf32>
    %139 = arith.mulf %132, %89 : vector<2x128xf32>
    %140 = arith.mulf %127, %133 : vector<2x128xf32>
    %141 = arith.addf %139, %140 : vector<2x128xf32>
    %142 = math.tanh %141 : vector<2x128xf32>
    %143 = arith.mulf %138, %142 : vector<2x128xf32>
    %c2 = arith.constant 2 : index
    %c0_46 = arith.constant 0 : index
    %144 = vector.load %arg5[%c2, %c0_46] : memref<16x128xf32, #tpu.memory_space<vmem>>, vector<2x128xf32>
    tpu.vector_store %arg5[%c2, %c0_46], %143 {strides = array<i32>} : memref<16x128xf32, #tpu.memory_space<vmem>>, vector<2x128xf32>,
    %145 = tpu.concatenate %118, %143 in 1 : vector<2x128xf32>, vector<2x128xf32> -> vector<2x256xf32>
    %cst_47 = arith.constant dense<0.000000e+00> : vector<2x1024xf32>
    %146 = tpu.matmul %145, %14, %cst_47 {dimension_numbers = #tpu.dot_dimension_numbers<[1], [0], [0], [1], [0, 0, 1, 1], [], []>} : vector<2x256xf32>, vector<256x1024xf32>, vector<2x1024xf32> -> vector<2x1024xf32>
    %147 = vector.extract_strided_slice %146 {offsets = [0, 0], sizes = [2, 512], strides = [1, 1]} : vector<2x1024xf32> to vector<2x512xf32>
    %148 = arith.addf %9, %147 : vector<2x512xf32>
    %149 = math.tanh %148 : vector<2x512xf32>
    %150 = vector.extract_strided_slice %149 {offsets = [0, 0], sizes = [2, 128], strides = [1, 1]} : vector<2x512xf32> to vector<2x128xf32>
    %cst_48 = arith.constant 5.000000e-01 : f32
    %151 = vector.broadcast %cst_48 : f32 to vector<2x128xf32>
    %152 = arith.mulf %151, %150 : vector<2x128xf32>
    %cst_49 = arith.constant 5.000000e-01 : f32
    %153 = vector.broadcast %cst_49 : f32 to vector<2x128xf32>
    %154 = arith.addf %152, %153 : vector<2x128xf32>
    %155 = vector.extract_strided_slice %149 {offsets = [0, 128], sizes = [2, 128], strides = [1, 1]} : vector<2x512xf32> to vector<2x128xf32>
    %cst_50 = arith.constant 5.000000e-01 : f32
    %156 = vector.broadcast %cst_50 : f32 to vector<2x128xf32>
    %157 = arith.mulf %156, %155 : vector<2x128xf32>
    %cst_51 = arith.constant 5.000000e-01 : f32
    %158 = vector.broadcast %cst_51 : f32 to vector<2x128xf32>
    %159 = arith.addf %157, %158 : vector<2x128xf32>
    %160 = vector.extract_strided_slice %149 {offsets = [0, 256], sizes = [2, 128], strides = [1, 1]} : vector<2x512xf32> to vector<2x128xf32>
    %161 = vector.extract_strided_slice %149 {offsets = [0, 384], sizes = [2, 128], strides = [1, 1]} : vector<2x512xf32> to vector<2x128xf32>
    %cst_52 = arith.constant 5.000000e-01 : f32
    %162 = vector.broadcast %cst_52 : f32 to vector<2x128xf32>
    %163 = arith.mulf %162, %161 : vector<2x128xf32>
    %cst_53 = arith.constant 5.000000e-01 : f32
    %164 = vector.broadcast %cst_53 : f32 to vector<2x128xf32>
    %165 = arith.addf %163, %164 : vector<2x128xf32>
    %166 = arith.mulf %159, %116 : vector<2x128xf32>
    %167 = arith.mulf %154, %160 : vector<2x128xf32>
    %168 = arith.addf %166, %167 : vector<2x128xf32>
    %169 = math.tanh %168 : vector<2x128xf32>
    %170 = arith.mulf %165, %169 : vector<2x128xf32>
    %171 = vector.extract_strided_slice %146 {offsets = [0, 512], sizes = [2, 512], strides = [1, 1]} : vector<2x1024xf32> to vector<2x512xf32>
    %172 = vector.broadcast %15 : vector<1x512xf32> to vector<2x512xf32>
    %173 = arith.addf %172, %171 : vector<2x512xf32>
    %174 = math.tanh %173 : vector<2x512xf32>
    %175 = vector.extract_strided_slice %174 {offsets = [0, 0], sizes = [2, 128], strides = [1, 1]} : vector<2x512xf32> to vector<2x128xf32>
    %cst_54 = arith.constant 5.000000e-01 : f32
    %176 = vector.broadcast %cst_54 : f32 to vector<2x128xf32>
    %177 = arith.mulf %176, %175 : vector<2x128xf32>
    %cst_55 = arith.constant 5.000000e-01 : f32
    %178 = vector.broadcast %cst_55 : f32 to vector<2x128xf32>
    %179 = arith.addf %177, %178 : vector<2x128xf32>
    %180 = vector.extract_strided_slice %174 {offsets = [0, 128], sizes = [2, 128], strides = [1, 1]} : vector<2x512xf32> to vector<2x128xf32>
    %cst_56 = arith.constant 5.000000e-01 : f32
    %181 = vector.broadcast %cst_56 : f32 to vector<2x128xf32>
    %182 = arith.mulf %181, %180 : vector<2x128xf32>
    %cst_57 = arith.constant 5.000000e-01 : f32
    %183 = vector.broadcast %cst_57 : f32 to vector<2x128xf32>
    %184 = arith.addf %182, %183 : vector<2x128xf32>
    %185 = vector.extract_strided_slice %174 {offsets = [0, 256], sizes = [2, 128], strides = [1, 1]} : vector<2x512xf32> to vector<2x128xf32>
    %186 = vector.extract_strided_slice %174 {offsets = [0, 384], sizes = [2, 128], strides = [1, 1]} : vector<2x512xf32> to vector<2x128xf32>
    %cst_58 = arith.constant 5.000000e-01 : f32
    %187 = vector.broadcast %cst_58 : f32 to vector<2x128xf32>
    %188 = arith.mulf %187, %186 : vector<2x128xf32>
    %cst_59 = arith.constant 5.000000e-01 : f32
    %189 = vector.broadcast %cst_59 : f32 to vector<2x128xf32>
    %190 = arith.addf %188, %189 : vector<2x128xf32>
    %191 = arith.mulf %184, %141 : vector<2x128xf32>
    %192 = arith.mulf %179, %185 : vector<2x128xf32>
    %193 = arith.addf %191, %192 : vector<2x128xf32>
    %194 = math.tanh %193 : vector<2x128xf32>
    %195 = arith.mulf %190, %194 : vector<2x128xf32>
    %c4 = arith.constant 4 : index
    %c0_60 = arith.constant 0 : index
    %196 = vector.load %arg5[%c4, %c0_60] : memref<16x128xf32, #tpu.memory_space<vmem>>, vector<2x128xf32>
    tpu.vector_store %arg5[%c4, %c0_60], %195 {strides = array<i32>} : memref<16x128xf32, #tpu.memory_space<vmem>>, vector<2x128xf32>,
    %197 = tpu.concatenate %170, %195 in 1 : vector<2x128xf32>, vector<2x128xf32> -> vector<2x256xf32>
    %cst_61 = arith.constant dense<0.000000e+00> : vector<2x1024xf32>
    %198 = tpu.matmul %197, %14, %cst_61 {dimension_numbers = #tpu.dot_dimension_numbers<[1], [0], [0], [1], [0, 0, 1, 1], [], []>} : vector<2x256xf32>, vector<256x1024xf32>, vector<2x1024xf32> -> vector<2x1024xf32>
    %199 = vector.extract_strided_slice %198 {offsets = [0, 0], sizes = [2, 512], strides = [1, 1]} : vector<2x1024xf32> to vector<2x512xf32>
    %200 = arith.addf %10, %199 : vector<2x512xf32>
    %201 = math.tanh %200 : vector<2x512xf32>
    %202 = vector.extract_strided_slice %201 {offsets = [0, 0], sizes = [2, 128], strides = [1, 1]} : vector<2x512xf32> to vector<2x128xf32>
    %cst_62 = arith.constant 5.000000e-01 : f32
    %203 = vector.broadcast %cst_62 : f32 to vector<2x128xf32>
    %204 = arith.mulf %203, %202 : vector<2x128xf32>
    %cst_63 = arith.constant 5.000000e-01 : f32
    %205 = vector.broadcast %cst_63 : f32 to vector<2x128xf32>
    %206 = arith.addf %204, %205 : vector<2x128xf32>
    %207 = vector.extract_strided_slice %201 {offsets = [0, 128], sizes = [2, 128], strides = [1, 1]} : vector<2x512xf32> to vector<2x128xf32>
    %cst_64 = arith.constant 5.000000e-01 : f32
    %208 = vector.broadcast %cst_64 : f32 to vector<2x128xf32>
    %209 = arith.mulf %208, %207 : vector<2x128xf32>
    %cst_65 = arith.constant 5.000000e-01 : f32
    %210 = vector.broadcast %cst_65 : f32 to vector<2x128xf32>
    %211 = arith.addf %209, %210 : vector<2x128xf32>
    %212 = vector.extract_strided_slice %201 {offsets = [0, 256], sizes = [2, 128], strides = [1, 1]} : vector<2x512xf32> to vector<2x128xf32>
    %213 = vector.extract_strided_slice %201 {offsets = [0, 384], sizes = [2, 128], strides = [1, 1]} : vector<2x512xf32> to vector<2x128xf32>
    %cst_66 = arith.constant 5.000000e-01 : f32
    %214 = vector.broadcast %cst_66 : f32 to vector<2x128xf32>
    %215 = arith.mulf %214, %213 : vector<2x128xf32>
    %cst_67 = arith.constant 5.000000e-01 : f32
    %216 = vector.broadcast %cst_67 : f32 to vector<2x128xf32>
    %217 = arith.addf %215, %216 : vector<2x128xf32>
    %218 = arith.mulf %211, %168 : vector<2x128xf32>
    %219 = arith.mulf %206, %212 : vector<2x128xf32>
    %220 = arith.addf %218, %219 : vector<2x128xf32>
    %221 = math.tanh %220 : vector<2x128xf32>
    %222 = arith.mulf %217, %221 : vector<2x128xf32>
    %223 = vector.extract_strided_slice %198 {offsets = [0, 512], sizes = [2, 512], strides = [1, 1]} : vector<2x1024xf32> to vector<2x512xf32>
    %224 = vector.broadcast %15 : vector<1x512xf32> to vector<2x512xf32>
    %225 = arith.addf %224, %223 : vector<2x512xf32>
    %226 = math.tanh %225 : vector<2x512xf32>
    %227 = vector.extract_strided_slice %226 {offsets = [0, 0], sizes = [2, 128], strides = [1, 1]} : vector<2x512xf32> to vector<2x128xf32>
    %cst_68 = arith.constant 5.000000e-01 : f32
    %228 = vector.broadcast %cst_68 : f32 to vector<2x128xf32>
    %229 = arith.mulf %228, %227 : vector<2x128xf32>
    %cst_69 = arith.constant 5.000000e-01 : f32
    %230 = vector.broadcast %cst_69 : f32 to vector<2x128xf32>
    %231 = arith.addf %229, %230 : vector<2x128xf32>
    %232 = vector.extract_strided_slice %226 {offsets = [0, 128], sizes = [2, 128], strides = [1, 1]} : vector<2x512xf32> to vector<2x128xf32>
    %cst_70 = arith.constant 5.000000e-01 : f32
    %233 = vector.broadcast %cst_70 : f32 to vector<2x128xf32>
    %234 = arith.mulf %233, %232 : vector<2x128xf32>
    %cst_71 = arith.constant 5.000000e-01 : f32
    %235 = vector.broadcast %cst_71 : f32 to vector<2x128xf32>
    %236 = arith.addf %234, %235 : vector<2x128xf32>
    %237 = vector.extract_strided_slice %226 {offsets = [0, 256], sizes = [2, 128], strides = [1, 1]} : vector<2x512xf32> to vector<2x128xf32>
    %238 = vector.extract_strided_slice %226 {offsets = [0, 384], sizes = [2, 128], strides = [1, 1]} : vector<2x512xf32> to vector<2x128xf32>
    %cst_72 = arith.constant 5.000000e-01 : f32
    %239 = vector.broadcast %cst_72 : f32 to vector<2x128xf32>
    %240 = arith.mulf %239, %238 : vector<2x128xf32>
    %cst_73 = arith.constant 5.000000e-01 : f32
    %241 = vector.broadcast %cst_73 : f32 to vector<2x128xf32>
    %242 = arith.addf %240, %241 : vector<2x128xf32>
    %243 = arith.mulf %236, %193 : vector<2x128xf32>
    %244 = arith.mulf %231, %237 : vector<2x128xf32>
    %245 = arith.addf %243, %244 : vector<2x128xf32>
    %246 = math.tanh %245 : vector<2x128xf32>
    %247 = arith.mulf %242, %246 : vector<2x128xf32>
    %c6 = arith.constant 6 : index
    %c0_74 = arith.constant 0 : index
    %248 = vector.load %arg5[%c6, %c0_74] : memref<16x128xf32, #tpu.memory_space<vmem>>, vector<2x128xf32>
    tpu.vector_store %arg5[%c6, %c0_74], %247 {strides = array<i32>} : memref<16x128xf32, #tpu.memory_space<vmem>>, vector<2x128xf32>,
    %249 = tpu.concatenate %222, %247 in 1 : vector<2x128xf32>, vector<2x128xf32> -> vector<2x256xf32>
    %cst_75 = arith.constant dense<0.000000e+00> : vector<2x1024xf32>
    %250 = tpu.matmul %249, %14, %cst_75 {dimension_numbers = #tpu.dot_dimension_numbers<[1], [0], [0], [1], [0, 0, 1, 1], [], []>} : vector<2x256xf32>, vector<256x1024xf32>, vector<2x1024xf32> -> vector<2x1024xf32>
    %251 = vector.extract_strided_slice %250 {offsets = [0, 0], sizes = [2, 512], strides = [1, 1]} : vector<2x1024xf32> to vector<2x512xf32>
    %252 = arith.addf %11, %251 : vector<2x512xf32>
    %253 = math.tanh %252 : vector<2x512xf32>
    %254 = vector.extract_strided_slice %253 {offsets = [0, 0], sizes = [2, 128], strides = [1, 1]} : vector<2x512xf32> to vector<2x128xf32>
    %cst_76 = arith.constant 5.000000e-01 : f32
    %255 = vector.broadcast %cst_76 : f32 to vector<2x128xf32>
    %256 = arith.mulf %255, %254 : vector<2x128xf32>
    %cst_77 = arith.constant 5.000000e-01 : f32
    %257 = vector.broadcast %cst_77 : f32 to vector<2x128xf32>
    %258 = arith.addf %256, %257 : vector<2x128xf32>
    %259 = vector.extract_strided_slice %253 {offsets = [0, 128], sizes = [2, 128], strides = [1, 1]} : vector<2x512xf32> to vector<2x128xf32>
    %cst_78 = arith.constant 5.000000e-01 : f32
    %260 = vector.broadcast %cst_78 : f32 to vector<2x128xf32>
    %261 = arith.mulf %260, %259 : vector<2x128xf32>
    %cst_79 = arith.constant 5.000000e-01 : f32
    %262 = vector.broadcast %cst_79 : f32 to vector<2x128xf32>
    %263 = arith.addf %261, %262 : vector<2x128xf32>
    %264 = vector.extract_strided_slice %253 {offsets = [0, 256], sizes = [2, 128], strides = [1, 1]} : vector<2x512xf32> to vector<2x128xf32>
    %265 = vector.extract_strided_slice %253 {offsets = [0, 384], sizes = [2, 128], strides = [1, 1]} : vector<2x512xf32> to vector<2x128xf32>
    %cst_80 = arith.constant 5.000000e-01 : f32
    %266 = vector.broadcast %cst_80 : f32 to vector<2x128xf32>
    %267 = arith.mulf %266, %265 : vector<2x128xf32>
    %cst_81 = arith.constant 5.000000e-01 : f32
    %268 = vector.broadcast %cst_81 : f32 to vector<2x128xf32>
    %269 = arith.addf %267, %268 : vector<2x128xf32>
    %270 = arith.mulf %263, %220 : vector<2x128xf32>
    %271 = arith.mulf %258, %264 : vector<2x128xf32>
    %272 = arith.addf %270, %271 : vector<2x128xf32>
    %273 = math.tanh %272 : vector<2x128xf32>
    %274 = arith.mulf %269, %273 : vector<2x128xf32>
    %275 = vector.extract_strided_slice %250 {offsets = [0, 512], sizes = [2, 512], strides = [1, 1]} : vector<2x1024xf32> to vector<2x512xf32>
    %276 = vector.broadcast %15 : vector<1x512xf32> to vector<2x512xf32>
    %277 = arith.addf %276, %275 : vector<2x512xf32>
    %278 = math.tanh %277 : vector<2x512xf32>
    %279 = vector.extract_strided_slice %278 {offsets = [0, 0], sizes = [2, 128], strides = [1, 1]} : vector<2x512xf32> to vector<2x128xf32>
    %cst_82 = arith.constant 5.000000e-01 : f32
    %280 = vector.broadcast %cst_82 : f32 to vector<2x128xf32>
    %281 = arith.mulf %280, %279 : vector<2x128xf32>
    %cst_83 = arith.constant 5.000000e-01 : f32
    %282 = vector.broadcast %cst_83 : f32 to vector<2x128xf32>
    %283 = arith.addf %281, %282 : vector<2x128xf32>
    %284 = vector.extract_strided_slice %278 {offsets = [0, 128], sizes = [2, 128], strides = [1, 1]} : vector<2x512xf32> to vector<2x128xf32>
    %cst_84 = arith.constant 5.000000e-01 : f32
    %285 = vector.broadcast %cst_84 : f32 to vector<2x128xf32>
    %286 = arith.mulf %285, %284 : vector<2x128xf32>
    %cst_85 = arith.constant 5.000000e-01 : f32
    %287 = vector.broadcast %cst_85 : f32 to vector<2x128xf32>
    %288 = arith.addf %286, %287 : vector<2x128xf32>
    %289 = vector.extract_strided_slice %278 {offsets = [0, 256], sizes = [2, 128], strides = [1, 1]} : vector<2x512xf32> to vector<2x128xf32>
    %290 = vector.extract_strided_slice %278 {offsets = [0, 384], sizes = [2, 128], strides = [1, 1]} : vector<2x512xf32> to vector<2x128xf32>
    %cst_86 = arith.constant 5.000000e-01 : f32
    %291 = vector.broadcast %cst_86 : f32 to vector<2x128xf32>
    %292 = arith.mulf %291, %290 : vector<2x128xf32>
    %cst_87 = arith.constant 5.000000e-01 : f32
    %293 = vector.broadcast %cst_87 : f32 to vector<2x128xf32>
    %294 = arith.addf %292, %293 : vector<2x128xf32>
    %295 = arith.mulf %288, %245 : vector<2x128xf32>
    %296 = arith.mulf %283, %289 : vector<2x128xf32>
    %297 = arith.addf %295, %296 : vector<2x128xf32>
    %298 = math.tanh %297 : vector<2x128xf32>
    %299 = arith.mulf %294, %298 : vector<2x128xf32>
    %c8 = arith.constant 8 : index
    %c0_88 = arith.constant 0 : index
    %300 = vector.load %arg5[%c8, %c0_88] : memref<16x128xf32, #tpu.memory_space<vmem>>, vector<2x128xf32>
    tpu.vector_store %arg5[%c8, %c0_88], %299 {strides = array<i32>} : memref<16x128xf32, #tpu.memory_space<vmem>>, vector<2x128xf32>,
    %301 = tpu.concatenate %274, %299 in 1 : vector<2x128xf32>, vector<2x128xf32> -> vector<2x256xf32>
    %cst_89 = arith.constant dense<0.000000e+00> : vector<2x1024xf32>
    %302 = tpu.matmul %301, %14, %cst_89 {dimension_numbers = #tpu.dot_dimension_numbers<[1], [0], [0], [1], [0, 0, 1, 1], [], []>} : vector<2x256xf32>, vector<256x1024xf32>, vector<2x1024xf32> -> vector<2x1024xf32>
    %303 = vector.extract_strided_slice %302 {offsets = [0, 0], sizes = [2, 512], strides = [1, 1]} : vector<2x1024xf32> to vector<2x512xf32>
    %304 = arith.addf %12, %303 : vector<2x512xf32>
    %305 = math.tanh %304 : vector<2x512xf32>
    %306 = vector.extract_strided_slice %305 {offsets = [0, 0], sizes = [2, 128], strides = [1, 1]} : vector<2x512xf32> to vector<2x128xf32>
    %cst_90 = arith.constant 5.000000e-01 : f32
    %307 = vector.broadcast %cst_90 : f32 to vector<2x128xf32>
    %308 = arith.mulf %307, %306 : vector<2x128xf32>
    %cst_91 = arith.constant 5.000000e-01 : f32
    %309 = vector.broadcast %cst_91 : f32 to vector<2x128xf32>
    %310 = arith.addf %308, %309 : vector<2x128xf32>
    %311 = vector.extract_strided_slice %305 {offsets = [0, 128], sizes = [2, 128], strides = [1, 1]} : vector<2x512xf32> to vector<2x128xf32>
    %cst_92 = arith.constant 5.000000e-01 : f32
    %312 = vector.broadcast %cst_92 : f32 to vector<2x128xf32>
    %313 = arith.mulf %312, %311 : vector<2x128xf32>
    %cst_93 = arith.constant 5.000000e-01 : f32
    %314 = vector.broadcast %cst_93 : f32 to vector<2x128xf32>
    %315 = arith.addf %313, %314 : vector<2x128xf32>
    %316 = vector.extract_strided_slice %305 {offsets = [0, 256], sizes = [2, 128], strides = [1, 1]} : vector<2x512xf32> to vector<2x128xf32>
    %317 = vector.extract_strided_slice %305 {offsets = [0, 384], sizes = [2, 128], strides = [1, 1]} : vector<2x512xf32> to vector<2x128xf32>
    %cst_94 = arith.constant 5.000000e-01 : f32
    %318 = vector.broadcast %cst_94 : f32 to vector<2x128xf32>
    %319 = arith.mulf %318, %317 : vector<2x128xf32>
    %cst_95 = arith.constant 5.000000e-01 : f32
    %320 = vector.broadcast %cst_95 : f32 to vector<2x128xf32>
    %321 = arith.addf %319, %320 : vector<2x128xf32>
    %322 = arith.mulf %315, %272 : vector<2x128xf32>
    %323 = arith.mulf %310, %316 : vector<2x128xf32>
    %324 = arith.addf %322, %323 : vector<2x128xf32>
    %325 = math.tanh %324 : vector<2x128xf32>
    %326 = arith.mulf %321, %325 : vector<2x128xf32>
    %327 = vector.extract_strided_slice %302 {offsets = [0, 512], sizes = [2, 512], strides = [1, 1]} : vector<2x1024xf32> to vector<2x512xf32>
    %328 = vector.broadcast %15 : vector<1x512xf32> to vector<2x512xf32>
    %329 = arith.addf %328, %327 : vector<2x512xf32>
    %330 = math.tanh %329 : vector<2x512xf32>
    %331 = vector.extract_strided_slice %330 {offsets = [0, 0], sizes = [2, 128], strides = [1, 1]} : vector<2x512xf32> to vector<2x128xf32>
    %cst_96 = arith.constant 5.000000e-01 : f32
    %332 = vector.broadcast %cst_96 : f32 to vector<2x128xf32>
    %333 = arith.mulf %332, %331 : vector<2x128xf32>
    %cst_97 = arith.constant 5.000000e-01 : f32
    %334 = vector.broadcast %cst_97 : f32 to vector<2x128xf32>
    %335 = arith.addf %333, %334 : vector<2x128xf32>
    %336 = vector.extract_strided_slice %330 {offsets = [0, 128], sizes = [2, 128], strides = [1, 1]} : vector<2x512xf32> to vector<2x128xf32>
    %cst_98 = arith.constant 5.000000e-01 : f32
    %337 = vector.broadcast %cst_98 : f32 to vector<2x128xf32>
    %338 = arith.mulf %337, %336 : vector<2x128xf32>
    %cst_99 = arith.constant 5.000000e-01 : f32
    %339 = vector.broadcast %cst_99 : f32 to vector<2x128xf32>
    %340 = arith.addf %338, %339 : vector<2x128xf32>
    %341 = vector.extract_strided_slice %330 {offsets = [0, 256], sizes = [2, 128], strides = [1, 1]} : vector<2x512xf32> to vector<2x128xf32>
    %342 = vector.extract_strided_slice %330 {offsets = [0, 384], sizes = [2, 128], strides = [1, 1]} : vector<2x512xf32> to vector<2x128xf32>
    %cst_100 = arith.constant 5.000000e-01 : f32
    %343 = vector.broadcast %cst_100 : f32 to vector<2x128xf32>
    %344 = arith.mulf %343, %342 : vector<2x128xf32>
    %cst_101 = arith.constant 5.000000e-01 : f32
    %345 = vector.broadcast %cst_101 : f32 to vector<2x128xf32>
    %346 = arith.addf %344, %345 : vector<2x128xf32>
    %347 = arith.mulf %340, %297 : vector<2x128xf32>
    %348 = arith.mulf %335, %341 : vector<2x128xf32>
    %349 = arith.addf %347, %348 : vector<2x128xf32>
    %350 = math.tanh %349 : vector<2x128xf32>
    %351 = arith.mulf %346, %350 : vector<2x128xf32>
    %c10 = arith.constant 10 : index
    %c0_102 = arith.constant 0 : index
    %352 = vector.load %arg5[%c10, %c0_102] : memref<16x128xf32, #tpu.memory_space<vmem>>, vector<2x128xf32>
    tpu.vector_store %arg5[%c10, %c0_102], %351 {strides = array<i32>} : memref<16x128xf32, #tpu.memory_space<vmem>>, vector<2x128xf32>,
    %353 = tpu.concatenate %326, %351 in 1 : vector<2x128xf32>, vector<2x128xf32> -> vector<2x256xf32>
    %cst_103 = arith.constant dense<0.000000e+00> : vector<2x1024xf32>
    %354 = tpu.matmul %353, %14, %cst_103 {dimension_numbers = #tpu.dot_dimension_numbers<[1], [0], [0], [1], [0, 0, 1, 1], [], []>} : vector<2x256xf32>, vector<256x1024xf32>, vector<2x1024xf32> -> vector<2x1024xf32>
    %355 = vector.extract_strided_slice %354 {offsets = [0, 0], sizes = [2, 512], strides = [1, 1]} : vector<2x1024xf32> to vector<2x512xf32>
    %356 = arith.addf %13, %355 : vector<2x512xf32>
    %357 = math.tanh %356 : vector<2x512xf32>
    %358 = vector.extract_strided_slice %357 {offsets = [0, 0], sizes = [2, 128], strides = [1, 1]} : vector<2x512xf32> to vector<2x128xf32>
    %cst_104 = arith.constant 5.000000e-01 : f32
    %359 = vector.broadcast %cst_104 : f32 to vector<2x128xf32>
    %360 = arith.mulf %359, %358 : vector<2x128xf32>
    %cst_105 = arith.constant 5.000000e-01 : f32
    %361 = vector.broadcast %cst_105 : f32 to vector<2x128xf32>
    %362 = arith.addf %360, %361 : vector<2x128xf32>
    %363 = vector.extract_strided_slice %357 {offsets = [0, 128], sizes = [2, 128], strides = [1, 1]} : vector<2x512xf32> to vector<2x128xf32>
    %cst_106 = arith.constant 5.000000e-01 : f32
    %364 = vector.broadcast %cst_106 : f32 to vector<2x128xf32>
    %365 = arith.mulf %364, %363 : vector<2x128xf32>
    %cst_107 = arith.constant 5.000000e-01 : f32
    %366 = vector.broadcast %cst_107 : f32 to vector<2x128xf32>
    %367 = arith.addf %365, %366 : vector<2x128xf32>
    %368 = vector.extract_strided_slice %357 {offsets = [0, 256], sizes = [2, 128], strides = [1, 1]} : vector<2x512xf32> to vector<2x128xf32>
    %369 = vector.extract_strided_slice %357 {offsets = [0, 384], sizes = [2, 128], strides = [1, 1]} : vector<2x512xf32> to vector<2x128xf32>
    %cst_108 = arith.constant 5.000000e-01 : f32
    %370 = vector.broadcast %cst_108 : f32 to vector<2x128xf32>
    %371 = arith.mulf %370, %369 : vector<2x128xf32>
    %cst_109 = arith.constant 5.000000e-01 : f32
    %372 = vector.broadcast %cst_109 : f32 to vector<2x128xf32>
    %373 = arith.addf %371, %372 : vector<2x128xf32>
    %374 = arith.mulf %367, %324 : vector<2x128xf32>
    %375 = arith.mulf %362, %368 : vector<2x128xf32>
    %376 = arith.addf %374, %375 : vector<2x128xf32>
    %377 = math.tanh %376 : vector<2x128xf32>
    %378 = arith.mulf %373, %377 : vector<2x128xf32>
    %379 = vector.extract_strided_slice %354 {offsets = [0, 512], sizes = [2, 512], strides = [1, 1]} : vector<2x1024xf32> to vector<2x512xf32>
    %380 = vector.broadcast %15 : vector<1x512xf32> to vector<2x512xf32>
    %381 = arith.addf %380, %379 : vector<2x512xf32>
    %382 = math.tanh %381 : vector<2x512xf32>
    %383 = vector.extract_strided_slice %382 {offsets = [0, 0], sizes = [2, 128], strides = [1, 1]} : vector<2x512xf32> to vector<2x128xf32>
    %cst_110 = arith.constant 5.000000e-01 : f32
    %384 = vector.broadcast %cst_110 : f32 to vector<2x128xf32>
    %385 = arith.mulf %384, %383 : vector<2x128xf32>
    %cst_111 = arith.constant 5.000000e-01 : f32
    %386 = vector.broadcast %cst_111 : f32 to vector<2x128xf32>
    %387 = arith.addf %385, %386 : vector<2x128xf32>
    %388 = vector.extract_strided_slice %382 {offsets = [0, 128], sizes = [2, 128], strides = [1, 1]} : vector<2x512xf32> to vector<2x128xf32>
    %cst_112 = arith.constant 5.000000e-01 : f32
    %389 = vector.broadcast %cst_112 : f32 to vector<2x128xf32>
    %390 = arith.mulf %389, %388 : vector<2x128xf32>
    %cst_113 = arith.constant 5.000000e-01 : f32
    %391 = vector.broadcast %cst_113 : f32 to vector<2x128xf32>
    %392 = arith.addf %390, %391 : vector<2x128xf32>
    %393 = vector.extract_strided_slice %382 {offsets = [0, 256], sizes = [2, 128], strides = [1, 1]} : vector<2x512xf32> to vector<2x128xf32>
    %394 = vector.extract_strided_slice %382 {offsets = [0, 384], sizes = [2, 128], strides = [1, 1]} : vector<2x512xf32> to vector<2x128xf32>
    %cst_114 = arith.constant 5.000000e-01 : f32
    %395 = vector.broadcast %cst_114 : f32 to vector<2x128xf32>
    %396 = arith.mulf %395, %394 : vector<2x128xf32>
    %cst_115 = arith.constant 5.000000e-01 : f32
    %397 = vector.broadcast %cst_115 : f32 to vector<2x128xf32>
    %398 = arith.addf %396, %397 : vector<2x128xf32>
    %399 = arith.mulf %392, %349 : vector<2x128xf32>
    %400 = arith.mulf %387, %393 : vector<2x128xf32>
    %401 = arith.addf %399, %400 : vector<2x128xf32>
    %402 = math.tanh %401 : vector<2x128xf32>
    %403 = arith.mulf %398, %402 : vector<2x128xf32>
    %c12 = arith.constant 12 : index
    %c0_116 = arith.constant 0 : index
    %404 = vector.load %arg5[%c12, %c0_116] : memref<16x128xf32, #tpu.memory_space<vmem>>, vector<2x128xf32>
    tpu.vector_store %arg5[%c12, %c0_116], %403 {strides = array<i32>} : memref<16x128xf32, #tpu.memory_space<vmem>>, vector<2x128xf32>,
    %405 = tpu.concatenate %378, %403 in 1 : vector<2x128xf32>, vector<2x128xf32> -> vector<2x256xf32>
    %cst_117 = arith.constant dense<0.000000e+00> : vector<2x1024xf32>
    %406 = tpu.matmul %405, %14, %cst_117 {dimension_numbers = #tpu.dot_dimension_numbers<[1], [0], [0], [1], [0, 0, 1, 1], [], []>} : vector<2x256xf32>, vector<256x1024xf32>, vector<2x1024xf32> -> vector<2x1024xf32>
    %407 = vector.extract_strided_slice %406 {offsets = [0, 512], sizes = [2, 512], strides = [1, 1]} : vector<2x1024xf32> to vector<2x512xf32>
    %408 = vector.broadcast %15 : vector<1x512xf32> to vector<2x512xf32>
    %409 = arith.addf %408, %407 : vector<2x512xf32>
    %410 = math.tanh %409 : vector<2x512xf32>
    %411 = vector.extract_strided_slice %410 {offsets = [0, 0], sizes = [2, 128], strides = [1, 1]} : vector<2x512xf32> to vector<2x128xf32>
    %cst_118 = arith.constant 5.000000e-01 : f32
    %412 = vector.broadcast %cst_118 : f32 to vector<2x128xf32>
    %413 = arith.mulf %412, %411 : vector<2x128xf32>
    %cst_119 = arith.constant 5.000000e-01 : f32
    %414 = vector.broadcast %cst_119 : f32 to vector<2x128xf32>
    %415 = arith.addf %413, %414 : vector<2x128xf32>
    %416 = vector.extract_strided_slice %410 {offsets = [0, 128], sizes = [2, 128], strides = [1, 1]} : vector<2x512xf32> to vector<2x128xf32>
    %cst_120 = arith.constant 5.000000e-01 : f32
    %417 = vector.broadcast %cst_120 : f32 to vector<2x128xf32>
    %418 = arith.mulf %417, %416 : vector<2x128xf32>
    %cst_121 = arith.constant 5.000000e-01 : f32
    %419 = vector.broadcast %cst_121 : f32 to vector<2x128xf32>
    %420 = arith.addf %418, %419 : vector<2x128xf32>
    %421 = vector.extract_strided_slice %410 {offsets = [0, 256], sizes = [2, 128], strides = [1, 1]} : vector<2x512xf32> to vector<2x128xf32>
    %422 = vector.extract_strided_slice %410 {offsets = [0, 384], sizes = [2, 128], strides = [1, 1]} : vector<2x512xf32> to vector<2x128xf32>
    %cst_122 = arith.constant 5.000000e-01 : f32
    %423 = vector.broadcast %cst_122 : f32 to vector<2x128xf32>
    %424 = arith.mulf %423, %422 : vector<2x128xf32>
    %cst_123 = arith.constant 5.000000e-01 : f32
    %425 = vector.broadcast %cst_123 : f32 to vector<2x128xf32>
    %426 = arith.addf %424, %425 : vector<2x128xf32>
    %427 = arith.mulf %420, %401 : vector<2x128xf32>
    %428 = arith.mulf %415, %421 : vector<2x128xf32>
    %429 = arith.addf %427, %428 : vector<2x128xf32>
    %430 = math.tanh %429 : vector<2x128xf32>
    %431 = arith.mulf %426, %430 : vector<2x128xf32>
    %c14 = arith.constant 14 : index
    %c0_124 = arith.constant 0 : index
    %432 = vector.load %arg5[%c14, %c0_124] : memref<16x128xf32, #tpu.memory_space<vmem>>, vector<2x128xf32>
    tpu.vector_store %arg5[%c14, %c0_124], %431 {strides = array<i32>} : memref<16x128xf32, #tpu.memory_space<vmem>>, vector<2x128xf32>,
    return
  }
}

</mosaic_0001>

<bundles_post_ra>
// kernel: forward.1
= control target key start
LH: loop header
LB: loop body
LE: loop exit
PB: predicated region body
PF: predicated region fallthrough
CT: control target
= control target key end

     0   :  { %10 = vsyncpa [#allocation3], 0  ;;  %s6939_s0 = inlined_call_operand.hbm [shape: f32[16,50], index: 0, kind: input, shape index: {}]   ;;  %s6940_s1 = inlined_call_operand.hbm [shape: f32[50,512], index: 1, kind: input, shape index: {}]   ;;  %s6941_s2 = inlined_call_operand.vmem [shape: f32[1,512], index: 2, kind: input, shape index: {}]   ;;  %s6942_s3 = inlined_call_operand.hbm [shape: f32[256,1024], index: 3, kind: input, shape index: {}]   ;;  %s6943_s4 = inlined_call_operand.vmem [shape: f32[1,512], index: 4, kind: input, shape index: {}]   ;;  %s6944_s5 = inlined_call_operand.hbm [shape: f32[16,128], index: 5, kind: output, shape index: {}]  }
   0x1   :  { %11 = vsyncpa [#allocation6], 0 }
   0x2   :  { %12 = vsyncpa [#allocation4], 0  ;;  %s5374_s18 = smov [#allocation5]   ;;  %s5280_s22 = scalar_lea.hbm %s6940_s1, 3584 }
   0x3   :  { %s30_s19 = sshll.u32 %s5374_s18, 4  ;;  %p5281_p0 = scmp.ne.s32.totalorder %s6940_s1, %s5280_s22  ;;  %s31_s19 = int_to_ptr.vmem [resolvable:$true] %s30_s19 }
   0x4   :  { %p5284_p1 = scmp.lt.u32.totalorder %s5280_s22, %s6940_s1 }
   0x6   :  { %p5286_p2 = pnand %p5284_p1, %p5281_p0 }
   0x8   :  { %5289 = shalt.err (!%p5286_p2)
}
   0x9   :  { %s5290_s27 = scalar_lea.vmem %s31_s19, 3584  ;;  %p5295_p4 = scmp.lt.s32.totalorder %s31_s19, %s31_s19 }
   0xa   :  { %p5291_p3 = scmp.ne.s32.totalorder %s31_s19, %s5290_s27  ;;  %p5296_p5 = scmp.lt.s32.totalorder %s5290_s27, %s5290_s27 }
   0xc   :  { %p5297_p6 = por %p5296_p5, %p5295_p4 }
   0xe   :  { %p5298_p7 = pnand %p5297_p6, %p5291_p3 }
  0x10   :  { %5301 = shalt.err (!%p5298_p7)
}
  0x11   :  { %s5375_s28 = smov 512   ;;  %s5376_s29 = smov 32  }
  0x12   :  { %36 = dma.hbm_to_vmem [thread:$0]  %s6940_s1, 3584, %s31_s19, [#allocation6], %s5375_s28, %s5375_s28, %s5376_s29  }
  0x13   :  { %s5377_s7 = smov [#allocation2]   ;;  %s5302_s11 = scalar_lea.hbm %s6939_s0, 256 }
  0x14   :  { %s18_s8 = sshll.u32 %s5377_s7, 4  ;;  %p5303_p8 = scmp.ne.s32.totalorder %s6939_s0, %s5302_s11  ;;  %s19_s8 = int_to_ptr.vmem [resolvable:$true] %s18_s8 }
  0x15   :  { %p5306_p9 = scmp.lt.u32.totalorder %s5302_s11, %s6939_s0 }
  0x17   :  { %p5308_p10 = pnand %p5306_p9, %p5303_p8 }
  0x19   :  { %5311 = shalt.err (!%p5308_p10)
}
  0x1a   :  { %s5312_s16 = scalar_lea.vmem %s19_s8, 256  ;;  %p5317_p12 = scmp.lt.s32.totalorder %s19_s8, %s19_s8 }
  0x1b   :  { %p5313_p11 = scmp.ne.s32.totalorder %s19_s8, %s5312_s16  ;;  %p5318_p13 = scmp.lt.s32.totalorder %s5312_s16, %s5312_s16 }
  0x1d   :  { %p5319_p0 = por %p5318_p13, %p5317_p12 }
  0x1f   :  { %p5320_p1 = pnand %p5319_p0, %p5313_p11 }
  0x21   :  { %5323 = shalt.err (!%p5320_p1)
}
  0x22   :  { %s5378_s1 = smov 128   ;;  %s5379_s17 = smov 8  }
  0x23   :  { %24 = dma.hbm_to_vmem [thread:$0]  %s6939_s0, 256, %s19_s8, [#allocation3], %s5378_s1, %s5378_s1, %s5379_s17  }
  0x24   :  { %s5380_s20 = smov [#allocation7]   ;;  %s5324_s24 = scalar_lea.hbm %s6942_s3, 32768 }
  0x25   :  { %s44_s21 = sshll.u32 %s5380_s20, 4  ;;  %p5325_p2 = scmp.ne.s32.totalorder %s6942_s3, %s5324_s24  ;;  %s45_s21 = int_to_ptr.vmem [resolvable:$true] %s44_s21 }
  0x26   :  { %p5328_p3 = scmp.lt.u32.totalorder %s5324_s24, %s6942_s3 }
  0x28   :  { %p5330_p4 = pnand %p5328_p3, %p5325_p2 }
  0x2a   :  { %5333 = shalt.err (!%p5330_p4)
}
  0x2b   :  { %s5334_s29 = scalar_lea.vmem %s45_s21, 32768  ;;  %p5339_p6 = scmp.lt.s32.totalorder %s45_s21, %s45_s21 }
  0x2c   :  { %p5335_p5 = scmp.ne.s32.totalorder %s45_s21, %s5334_s29  ;;  %p5340_p7 = scmp.lt.s32.totalorder %s5334_s29, %s5334_s29 }
  0x2e   :  { %p5341_p8 = por %p5340_p7, %p5339_p6 }
  0x30   :  { %p5342_p9 = pnand %p5341_p8, %p5335_p5 }
  0x32   :  { %5345 = shalt.err (!%p5342_p9)
}
  0x33   :  { %s5381_s0 = smov 1024   ;;  %s5382_s30 = smov 64  }
  0x34   :  { %50 = dma.hbm_to_vmem [thread:$0]  %s6942_s3, 32768, %s45_s21, [#allocation6], %s5381_s0, %s5381_s0, %s5382_s30  }
  0x35   :  { %5368 = dma.done.wait [#allocation3], 256  }
  0x36   :  { %5369 = vsyncadd [#allocation3], 4294967040 }
  0x37   :  { %5370 = dma.done.wait [#allocation6], 36352  }
  0x38   :  { %5371 = vsyncadd [#allocation6], 4294930944  ;;  %v6945_v0 = vmov 0.0   ;;  %v65_v1 = vld [vmem:[#allocation5 + $0x8] sm:$0xff]  ;;  %v64_v3 = vld [vmem:[#allocation5] sm:$0xff]  ;;  %vm121_vm0 = vcmask 1041408  }
  0x39   :  { %198 = vmatprep.mubr.f32.mxu0 %v6945_v0  ;;  %275 = vmatprep.mubr.f32.mxu1 %v6945_v0  ;;  %v69_v2 = vld [vmem:[#allocation5 + $0x28] sm:$0xff]  ;;  %v68_v5 = vld [vmem:[#allocation5 + $0x20] sm:$0xff]  ;;  %v67_v10 = vld [vmem:[#allocation5 + $0x18] sm:$0xff]  ;;  %vm114_vm1 = vcmask 408576  }
  0x3a   :  { %v3165_v4 = vpack.c.bf16 %v69_v2, %v65_v1  ;;  %v73_v6 = vld [vmem:[#allocation5 + $0x48] sm:$0xff]  ;;  %v3167_v8 = vpack.c.bf16 %v68_v5, %v64_v3  ;;  %v71_v11 = vld [vmem:[#allocation5 + $0x38] sm:$0xff]  ;;  %v72_v12 = vld [vmem:[#allocation5 + $0x40] sm:$0xff] }
  0x3b   :  { %v77_v7 = vld [vmem:[#allocation5 + $0x68] sm:$0xff]  ;;  %v3177_v13 = vpack.c.bf16 %v71_v11, %v67_v10  ;;  %v76_v14 = vld [vmem:[#allocation5 + $0x60] sm:$0xff]  ;;  %v66_v15 = vld [vmem:[#allocation5 + $0x10] sm:$0xff] }
  0x3c   :  { %v3169_v9 = vpack.c.bf16 %v77_v7, %v73_v6  ;;  %3166 = vmatprep.subr.bf16.mxu0 %v3165_v4  ;;  %v70_v16 = vld [vmem:[#allocation5 + $0x30] sm:$0xff]  ;;  %v3171_v17 = vpack.c.bf16 %v76_v14, %v72_v12  ;;  %v81_v19 = vld [vmem:[#allocation5 + $0x88] sm:$0xff]  ;;  %v75_v21 = vld [vmem:[#allocation5 + $0x58] sm:$0xff] }
  0x3d   :  { %3168 = vmatpush1.bf16.msra.mxu0 %v3167_v8  ;;  %v3179_v18 = vpack.c.bf16 %v70_v16, %v66_v15  ;;  %v85_v20 = vld [vmem:[#allocation5 + $0xa8] sm:$0xff]  ;;  %3178 = vmatprep.subr.bf16.mxu1 %v3177_v13  ;;  %v79_v23 = vld [vmem:[#allocation5 + $0x78] sm:$0xff]  ;;  %v80_v24 = vld [vmem:[#allocation5 + $0x80] sm:$0xff] }
  0x3e   :  { %3170 = vmatprep.subr.bf16.mxu0 %v3169_v9  ;;  %v3173_v22 = vpack.c.bf16 %v85_v20, %v81_v19  ;;  %v84_v25 = vld [vmem:[#allocation5 + $0xa0] sm:$0xff]  ;;  %v3181_v26 = vpack.c.bf16 %v79_v23, %v75_v21  ;;  %v74_v27 = vld [vmem:[#allocation5 + $0x50] sm:$0xff]  ;;  %v83_v30 = vld [vmem:[#allocation5 + $0x98] sm:$0xff] }
  0x3f   :  { %3180 = vmatpush1.bf16.msra.mxu1 %v3179_v18  ;;  %v78_v28 = vld [vmem:[#allocation5 + $0x70] sm:$0xff]  ;;  %v87_v31 = vld [vmem:[#allocation5 + $0xb8] sm:$0xff]  ;;  %v3175_v32 = vpack.c.bf16 %v84_v25, %v80_v24  ;;  %v89_v36 = vld [vmem:[#allocation5 + $0xc8] sm:$0x3] }
  0x40   :  { %v3183_v29 = vpack.c.bf16 %v78_v28, %v74_v27  ;;  %3182 = vmatprep.subr.bf16.mxu1 %v3181_v26  ;;  %v3185_v33 = vpack.c.bf16 %v87_v31, %v83_v30  ;;  %v82_v34 = vld [vmem:[#allocation5 + $0x90] sm:$0xff]  ;;  %v289_v38 = vld [vmem:[#allocation7 + $0x8] sm:$0xff]  ;;  %v88_v40 = vld [vmem:[#allocation5 + $0xc0] sm:$0x3] }
  0x41   :  { %3172 = vmatpush1.bf16.msra.mxu0 %v3171_v17  ;;  %v86_v35 = vld [vmem:[#allocation5 + $0xb0] sm:$0xff]  ;;  %v297_v39 = vld [vmem:[#allocation7 + $0x48] sm:$0xff]  ;;  %v91_v41 = vld [vmem:[#allocation5 + $0xd8] sm:$0x3] }
  0x42   :  { %3174 = vmatprep.subr.bf16.mxu0 %v3173_v22  ;;  %v3187_v37 = vpack.c.bf16 %v86_v35, %v82_v34  ;;  %v288_v42 = vld [vmem:[#allocation7] sm:$0xff]  ;;  %v291_v44 = vld [vmem:[#allocation7 + $0x18] sm:$0xff]  ;;  %v290_v46 = vld [vmem:[#allocation7 + $0x10] sm:$0xff]  ;;  %v5457_v47 = vpack.c.bf16 %v297_v39, %v289_v38 }
  0x43   :  { %3184 = vmatpush1.bf16.msra.mxu1 %v3183_v29  ;;  %v296_v43 = vld [vmem:[#allocation7 + $0x40] sm:$0xff]  ;;  %v299_v45 = vld [vmem:[#allocation7 + $0x58] sm:$0xff]  ;;  %v298_v48 = vld [vmem:[#allocation7 + $0x50] sm:$0xff] }
  0x44   :  { %3186 = vmatprep.subr.bf16.mxu1 %v3185_v33  ;;  %7251 = vst [vmem:[#allocation12_spill] sm:$0xff] %v5457_v47  ;;  %v305_v49 = vld [vmem:[#allocation7 + $0x88] sm:$0xff]  ;;  %v62_v51 = vld [vmem:[#allocation2] sm:$0xff]  ;;  %v5459_v52 = vpack.c.bf16 %v296_v43, %v288_v42  ;;  %v307_v53 = vld [vmem:[#allocation7 + $0x98] sm:$0xff]  ;;  %v5462_v56 = vpack.c.bf16 %v299_v45, %v291_v44  ;;  %v5465_v59 = vpack.c.bf16 %v298_v48, %v290_v46 }
  0x45   :  { %3176 = vmatpush1.bf16.msra.mxu0 %v3175_v32  ;;  %v313_v50 = vld [vmem:[#allocation7 + $0xc8] sm:$0xff]  ;;  %v315_v54 = vld [vmem:[#allocation7 + $0xd8] sm:$0xff]  ;;  %v90_v55 = vld [vmem:[#allocation5 + $0xd0] sm:$0x3] }
  0x46   :  { %3157 = vmatprep.subr.msk.mxu0 %vm121_vm0, %v89_v36  ;;  %7252 = vst [vmem:[#allocation13_spill] sm:$0xff] %v5459_v52  ;;  %7253 = vst [vmem:[#allocation14_spill] sm:$0xff] %v5462_v56  ;;  %v304_v57 = vld [vmem:[#allocation7 + $0x80] sm:$0xff]  ;;  %v5467_v60 = vpack.c.bf16 %v313_v50, %v305_v49  ;;  %v321_v61 = vld [vmem:[#allocation7 + $0x108] sm:$0xff]  ;;  %v5471_v63 = vpack.c.bf16 %v315_v54, %v307_v53 }
  0x47   :  { %3188 = vmatpush1.bf16.msra.mxu1 %v3187_v37  ;;  %v312_v58 = vld [vmem:[#allocation7 + $0xc0] sm:$0xff]  ;;  %7254 = vst [vmem:[#allocation15_spill] sm:$0xff] %v5465_v59  ;;  %v329_v62 = vld [vmem:[#allocation7 + $0x148] sm:$0xff]  ;;  %v306_v1 = vld [vmem:[#allocation7 + $0x90] sm:$0xff] }
  0x48   :  { %3161 = vmatprep.subr.msk.mxu1 %vm121_vm0, %v91_v41  ;;  %7255 = vst [vmem:[#allocation16_spill] sm:$0xff] %v5467_v60  ;;  %7256 = vst [vmem:[#allocation17_spill] sm:$0xff] %v5471_v63  ;;  %v314_v2 = vld [vmem:[#allocation7 + $0xd0] sm:$0xff]  ;;  %v5475_v3 = vpack.c.bf16 %v312_v58, %v304_v57  ;;  %v323_v4 = vld [vmem:[#allocation7 + $0x118] sm:$0xff]  ;;  %v5479_v6 = vpack.c.bf16 %v329_v62, %v321_v61 }
  0x49   :  { %3158 = vmatpush1.msk.msra.mxu0 %vm121_vm0, %v88_v40  ;;  %v331_v5 = vld [vmem:[#allocation7 + $0x158] sm:$0xff]  ;;  %v320_v7 = vld [vmem:[#allocation7 + $0x100] sm:$0xff]  ;;  %v5483_v9 = vpack.c.bf16 %v314_v2, %v306_v1  ;;  %v337_v10 = vld [vmem:[#allocation7 + $0x188] sm:$0xff] }
  0x4a   :  { %3159 = vmatmul.mubr.msk.f32.vlgmr.msra.gmra.mrb[0].mxu0 %vm114_vm1, %v62_v51  ;;  %3190 = vmatprep.subr.bf16.mxu0 %v5457_v47  ;;  %7257 = vst [vmem:[#allocation18_spill] sm:$0xff] %v5475_v3  ;;  %7258 = vst [vmem:[#allocation19_spill] sm:$0xff] %v5479_v6  ;;  %v328_v8 = vld [vmem:[#allocation7 + $0x140] sm:$0xff]  ;;  %v345_v11 = vld [vmem:[#allocation7 + $0x1c8] sm:$0xff]  ;;  %v5486_v12 = vpack.c.bf16 %v331_v5, %v323_v4 }
  0x4b   :  { %3162 = vmatpush1.msk.msra.mxu1 %vm121_vm0, %v90_v55  ;;  %3192 = vmatpush1.bf16.msra.mxu0 %v5459_v52  ;;  %7259 = vst [vmem:[#allocation20_spill] sm:$0xff] %v5483_v9  ;;  %v322_v13 = vld [vmem:[#allocation7 + $0x110] sm:$0xff]  ;;  %v5490_v15 = vpack.c.bf16 %v328_v8, %v320_v7  ;;  %v339_v16 = vld [vmem:[#allocation7 + $0x198] sm:$0xff]  ;;  %v5494_v18 = vpack.c.bf16 %v345_v11, %v337_v10  ;;  %v336_v19 = vld [vmem:[#allocation7 + $0x180] sm:$0xff] }
  0x4c   :  { %3163 = vmatmul.mubr.msk.f32.vlgmr.msra.gmra.mrb[0].mxu1 %vm114_vm1, %v62_v51  ;;  %3254 = vmatprep.subr.bf16.mxu1 %v5462_v56  ;;  %7260 = vst [vmem:[#allocation21_spill] sm:$0xff] %v5486_v12  ;;  %v330_v14 = vld [vmem:[#allocation7 + $0x150] sm:$0xff]  ;;  %v347_v17 = vld [vmem:[#allocation7 + $0x1d8] sm:$0xff]  ;;  %v344_v20 = vld [vmem:[#allocation7 + $0x1c0] sm:$0xff] }
  0x4d   :  { %3256 = vmatpush1.bf16.msra.mxu1 %v5465_v59  ;;  %3194 = vmatprep.subr.bf16.mxu0 %v5467_v60  ;;  %7261 = vst [vmem:[#allocation22_spill] sm:$0xff] %v5490_v15  ;;  %7262 = vst [vmem:[#allocation23_spill] sm:$0xff] %v5494_v18  ;;  %v5497_v21 = vpack.c.bf16 %v330_v14, %v322_v13  ;;  %v353_v22 = vld [vmem:[#allocation7 + $0x208] sm:$0xff]  ;;  %v5500_v24 = vpack.c.bf16 %v347_v17, %v339_v16  ;;  %v338_v25 = vld [vmem:[#allocation7 + $0x190] sm:$0xff] }
  0x4e   :  { %3258 = vmatprep.subr.bf16.mxu1 %v5471_v63  ;;  %204 = vmatprep.mubr.f32.mxu0 %v6945_v0  ;;  %v361_v23 = vld [vmem:[#allocation7 + $0x248] sm:$0xff]  ;;  %v346_v26 = vld [vmem:[#allocation7 + $0x1d0] sm:$0xff]  ;;  %v5503_v27 = vpack.c.bf16 %v344_v20, %v336_v19  ;;  %v355_v28 = vld [vmem:[#allocation7 + $0x218] sm:$0xff] }
  0x4f   :  { %3196 = vmatpush1.bf16.msra.mxu0 %v5475_v3  ;;  %281 = vmatprep.mubr.f32.mxu1 %v6945_v0  ;;  %7263 = vst [vmem:[#allocation24_spill] sm:$0xff] %v5497_v21  ;;  %7264 = vst [vmem:[#allocation25_spill] sm:$0xff] %v5500_v24  ;;  %v363_v29 = vld [vmem:[#allocation7 + $0x258] sm:$0xff]  ;;  %v5506_v30 = vpack.c.bf16 %v361_v23, %v353_v22  ;;  %v352_v31 = vld [vmem:[#allocation7 + $0x200] sm:$0xff]  ;;  %v5509_v33 = vpack.c.bf16 %v346_v26, %v338_v25 }
  0x50   :  { %3198 = vmatprep.subr.bf16.mxu0 %v5479_v6  ;;  %7265 = vst [vmem:[#allocation26_spill] sm:$0xff] %v5503_v27  ;;  %v360_v32 = vld [vmem:[#allocation7 + $0x240] sm:$0xff]  ;;  %v369_v34 = vld [vmem:[#allocation7 + $0x288] sm:$0xff]  ;;  %v5512_v36 = vpack.c.bf16 %v363_v29, %v355_v28  ;;  %v354_v37 = vld [vmem:[#allocation7 + $0x210] sm:$0xff] }
  0x51   :  { %3260 = vmatpush1.bf16.msra.mxu1 %v5483_v9  ;;  %7266 = vst [vmem:[#allocation27_spill] sm:$0xff] %v5506_v30  ;;  %7267 = vst [vmem:[#allocation28_spill] sm:$0xff] %v5509_v33  ;;  %v377_v35 = vld [vmem:[#allocation7 + $0x2c8] sm:$0xff]  ;;  %v362_v38 = vld [vmem:[#allocation7 + $0x250] sm:$0xff]  ;;  %v5515_v39 = vpack.c.bf16 %v360_v32, %v352_v31 }
  0x52   :  { %3262 = vmatprep.subr.bf16.mxu1 %v5486_v12  ;;  %7268 = vst [vmem:[#allocation29_spill] sm:$0xff] %v5512_v36  ;;  %v371_v40 = vld [vmem:[#allocation7 + $0x298] sm:$0xff]  ;;  %v5518_v42 = vpack.c.bf16 %v377_v35, %v369_v34  ;;  %v368_v43 = vld [vmem:[#allocation7 + $0x280] sm:$0xff]  ;;  %v5521_v45 = vpack.c.bf16 %v362_v38, %v354_v37  ;;  %v385_v46 = vld [vmem:[#allocation7 + $0x308] sm:$0xff] }
  0x53   :  { %3200 = vmatpush1.bf16.msra.mxu0 %v5490_v15  ;;  %7269 = vst [vmem:[#allocation30_spill] sm:$0xff] %v5515_v39  ;;  %v379_v41 = vld [vmem:[#allocation7 + $0x2d8] sm:$0xff]  ;;  %v376_v44 = vld [vmem:[#allocation7 + $0x2c0] sm:$0xff]  ;;  %v393_v48 = vld [vmem:[#allocation7 + $0x348] sm:$0xff] }
  0x54   :  { %3202 = vmatprep.subr.bf16.mxu0 %v5494_v18  ;;  %7270 = vst [vmem:[#allocation31_spill] sm:$0xff] %v5518_v42  ;;  %7271 = vst [vmem:[#allocation32_spill] sm:$0xff] %v5521_v45  ;;  %v5524_v49 = vpack.c.bf16 %v379_v41, %v371_v40  ;;  %v370_v50 = vld [vmem:[#allocation7 + $0x290] sm:$0xff]  ;;  %v5527_v53 = vpack.c.bf16 %v376_v44, %v368_v43  ;;  %v387_v54 = vld [vmem:[#allocation7 + $0x318] sm:$0xff]  ;;  %v5530_v57 = vpack.c.bf16 %v393_v48, %v385_v46 }
  0x55   :  { %3264 = vmatpush1.bf16.msra.mxu1 %v5497_v21  ;;  %v378_v51 = vld [vmem:[#allocation7 + $0x2d0] sm:$0xff]  ;;  %v395_v55 = vld [vmem:[#allocation7 + $0x358] sm:$0xff]  ;;  %v384_v58 = vld [vmem:[#allocation7 + $0x300] sm:$0xff] }
  0x56   :  { %3266 = vmatprep.subr.bf16.mxu1 %v5500_v24  ;;  %7272 = vst [vmem:[#allocation33_spill] sm:$0xff] %v5524_v49  ;;  %7273 = vst [vmem:[#allocation34_spill] sm:$0xff] %v5527_v53  ;;  %v392_v61 = vld [vmem:[#allocation7 + $0x340] sm:$0xff]  ;;  %v5533_v62 = vpack.c.bf16 %v378_v51, %v370_v50  ;;  %v401_v1 = vld [vmem:[#allocation7 + $0x388] sm:$0xff]  ;;  %v5536_v4 = vpack.c.bf16 %v395_v55, %v387_v54 }
  0x57   :  { %3204 = vmatpush1.bf16.msra.mxu0 %v5503_v27  ;;  %7274 = vst [vmem:[#allocation35_spill] sm:$0xff] %v5530_v57  ;;  %v409_v2 = vld [vmem:[#allocation7 + $0x3c8] sm:$0xff]  ;;  %v386_v5 = vld [vmem:[#allocation7 + $0x310] sm:$0xff]  ;;  %v5539_v8 = vpack.c.bf16 %v392_v61, %v384_v58  ;;  %v403_v10 = vld [vmem:[#allocation7 + $0x398] sm:$0xff] }
  0x58   :  { %3206 = vmatprep.subr.bf16.mxu0 %v5506_v30  ;;  %7275 = vst [vmem:[#allocation36_spill] sm:$0xff] %v5533_v62  ;;  %7276 = vst [vmem:[#allocation37_spill] sm:$0xff] %v5536_v4  ;;  %v394_v7 = vld [vmem:[#allocation7 + $0x350] sm:$0xff]  ;;  %v411_v11 = vld [vmem:[#allocation7 + $0x3d8] sm:$0xff]  ;;  %v5542_v13 = vpack.c.bf16 %v409_v2, %v401_v1 }
  0x59   :  { %3268 = vmatpush1.bf16.msra.mxu1 %v5509_v33  ;;  %7277 = vst [vmem:[#allocation38_spill] sm:$0xff] %v5539_v8  ;;  %v5545_v14 = vpack.c.bf16 %v394_v7, %v386_v5  ;;  %v5548_v16 = vpack.c.bf16 %v411_v11, %v403_v10  ;;  %v400_v17 = vld [vmem:[#allocation7 + $0x380] sm:$0xff]  ;;  %v402_v20 = vld [vmem:[#allocation7 + $0x390] sm:$0xff]  ;;  %v417_v26 = vld [vmem:[#allocation7 + $0x408] sm:$0xff] }
  0x5a   :  { %3270 = vmatprep.subr.bf16.mxu1 %v5512_v36  ;;  %7278 = vst [vmem:[#allocation39_spill] sm:$0xff] %v5542_v13  ;;  %v408_v19 = vld [vmem:[#allocation7 + $0x3c0] sm:$0xff]  ;;  %v410_v23 = vld [vmem:[#allocation7 + $0x3d0] sm:$0xff]  ;;  %v425_v28 = vld [vmem:[#allocation7 + $0x448] sm:$0xff] }
  0x5b   :  { %3208 = vmatpush1.bf16.msra.mxu0 %v5515_v39  ;;  %7279 = vst [vmem:[#allocation40_spill] sm:$0xff] %v5545_v14  ;;  %7280 = vst [vmem:[#allocation41_spill] sm:$0xff] %v5548_v16  ;;  %v5554_v22 = vpack.c.bf16 %v408_v19, %v400_v17  ;;  %v5556_v25 = vpack.c.bf16 %v410_v23, %v402_v20  ;;  %v419_v29 = vld [vmem:[#allocation7 + $0x418] sm:$0xff]  ;;  %v5560_v31 = vpack.c.bf16 %v425_v28, %v417_v26  ;;  %v416_v34 = vld [vmem:[#allocation7 + $0x400] sm:$0xff] }
  0x5c   :  { %3210 = vmatprep.subr.bf16.mxu0 %v5518_v42  ;;  %v427_v32 = vld [vmem:[#allocation7 + $0x458] sm:$0xff]  ;;  %v424_v37 = vld [vmem:[#allocation7 + $0x440] sm:$0xff]  ;;  %v418_v38 = vld [vmem:[#allocation7 + $0x410] sm:$0xff] }
  0x5d   :  { %3272 = vmatpush1.bf16.msra.mxu1 %v5521_v45  ;;  %7281 = vst [vmem:[#allocation42_spill] sm:$0xff] %v5554_v22  ;;  %7282 = vst [vmem:[#allocation43_spill] sm:$0xff] %v5556_v25  ;;  %v5562_v35 = vpack.c.bf16 %v427_v32, %v419_v29  ;;  %v426_v40 = vld [vmem:[#allocation7 + $0x450] sm:$0xff]  ;;  %v5565_v41 = vpack.c.bf16 %v424_v37, %v416_v34  ;;  %v433_v44 = vld [vmem:[#allocation7 + $0x488] sm:$0xff] }
  0x5e   :  { %3274 = vmatprep.subr.bf16.mxu1 %v5524_v49  ;;  %7283 = vst [vmem:[#allocation44_spill] sm:$0xff] %v5560_v31  ;;  %v5567_v43 = vpack.c.bf16 %v426_v40, %v418_v38  ;;  %v441_v46 = vld [vmem:[#allocation7 + $0x4c8] sm:$0xff]  ;;  %v435_v48 = vld [vmem:[#allocation7 + $0x498] sm:$0xff]  ;;  %v432_v54 = vld [vmem:[#allocation7 + $0x480] sm:$0xff] }
  0x5f   :  { %3212 = vmatpush1.bf16.msra.mxu0 %v5527_v53  ;;  %7284 = vst [vmem:[#allocation45_spill] sm:$0xff] %v5562_v35  ;;  %7285 = vst [vmem:[#allocation46_spill] sm:$0xff] %v5565_v41  ;;  %v5572_v50 = vpack.c.bf16 %v441_v46, %v433_v44  ;;  %v443_v51 = vld [vmem:[#allocation7 + $0x4d8] sm:$0xff]  ;;  %v440_v55 = vld [vmem:[#allocation7 + $0x4c0] sm:$0xff] }
  0x60   :  { %3214 = vmatprep.subr.bf16.mxu0 %v5530_v57  ;;  %7286 = vst [vmem:[#allocation47_spill] sm:$0xff] %v5567_v43  ;;  %v5574_v58 = vpack.c.bf16 %v443_v51, %v435_v48  ;;  %v5576_v61 = vpack.c.bf16 %v440_v55, %v432_v54  ;;  %v434_v1 = vld [vmem:[#allocation7 + $0x490] sm:$0xff]  ;;  %v449_v7 = vld [vmem:[#allocation7 + $0x508] sm:$0xff]  ;;  %v451_v11 = vld [vmem:[#allocation7 + $0x518] sm:$0xff] }
  0x61   :  { %3276 = vmatpush1.bf16.msra.mxu1 %v5533_v62  ;;  %7287 = vst [vmem:[#allocation48_spill] sm:$0xff] %v5572_v50  ;;  %v442_v2 = vld [vmem:[#allocation7 + $0x4d0] sm:$0xff]  ;;  %v457_v10 = vld [vmem:[#allocation7 + $0x548] sm:$0xff]  ;;  %v459_v19 = vld [vmem:[#allocation7 + $0x558] sm:$0xff] }
  0x62   :  { %3278 = vmatprep.subr.bf16.mxu1 %v5536_v4  ;;  %7288 = vst [vmem:[#allocation49_spill] sm:$0xff] %v5574_v58  ;;  %7289 = vst [vmem:[#allocation50_spill] sm:$0xff] %v5576_v61  ;;  %v5579_v5 = vpack.c.bf16 %v442_v2, %v434_v1  ;;  %v5584_v17 = vpack.c.bf16 %v457_v10, %v449_v7  ;;  %v448_v20 = vld [vmem:[#allocation7 + $0x500] sm:$0xff]  ;;  %v5586_v26 = vpack.c.bf16 %v459_v19, %v451_v11  ;;  %v450_v29 = vld [vmem:[#allocation7 + $0x510] sm:$0xff] }
  0x63   :  { %3216 = vmatpush1.bf16.msra.mxu0 %v5539_v8  ;;  %v456_v23 = vld [vmem:[#allocation7 + $0x540] sm:$0xff]  ;;  %v458_v32 = vld [vmem:[#allocation7 + $0x550] sm:$0xff]  ;;  %v465_v37 = vld [vmem:[#allocation7 + $0x588] sm:$0xff] }
  0x64   :  { %3218 = vmatprep.subr.bf16.mxu0 %v5542_v13  ;;  %7290 = vst [vmem:[#allocation51_spill] sm:$0xff] %v5579_v5  ;;  %7291 = vst [vmem:[#allocation52_spill] sm:$0xff] %v5584_v17  ;;  %v5588_v28 = vpack.c.bf16 %v456_v23, %v448_v20  ;;  %v5591_v34 = vpack.c.bf16 %v458_v32, %v450_v29  ;;  %v473_v38 = vld [vmem:[#allocation7 + $0x5c8] sm:$0xff]  ;;  %v467_v40 = vld [vmem:[#allocation7 + $0x598] sm:$0xff] }
  0x65   :  { %3280 = vmatpush1.bf16.msra.mxu1 %v5545_v14  ;;  %7292 = vst [vmem:[#allocation53_spill] sm:$0xff] %v5586_v26  ;;  %v5596_v44 = vpack.c.bf16 %v473_v38, %v465_v37  ;;  %v475_v46 = vld [vmem:[#allocation7 + $0x5d8] sm:$0xff]  ;;  %v464_v48 = vld [vmem:[#allocation7 + $0x580] sm:$0xff]  ;;  %v466_v1 = vld [vmem:[#allocation7 + $0x590] sm:$0xff] }
  0x66   :  { %3282 = vmatprep.subr.bf16.mxu1 %v5548_v16  ;;  %7293 = vst [vmem:[#allocation54_spill] sm:$0xff] %v5588_v28  ;;  %7294 = vst [vmem:[#allocation55_spill] sm:$0xff] %v5591_v34  ;;  %v472_v51 = vld [vmem:[#allocation7 + $0x5c0] sm:$0xff]  ;;  %v5598_v54 = vpack.c.bf16 %v475_v46, %v467_v40  ;;  %v474_v2 = vld [vmem:[#allocation7 + $0x5d0] sm:$0xff] }
  0x67   :  { %3220 = vmatpush1.bf16.msra.mxu0 %v5554_v22  ;;  %7295 = vst [vmem:[#allocation56_spill] sm:$0xff] %v5596_v44  ;;  %v5600_v55 = vpack.c.bf16 %v472_v51, %v464_v48  ;;  %v5603_v7 = vpack.c.bf16 %v474_v2, %v466_v1  ;;  %v481_v10 = vld [vmem:[#allocation7 + $0x608] sm:$0xff]  ;;  %v483_v19 = vld [vmem:[#allocation7 + $0x618] sm:$0xff]  ;;  %v480_v29 = vld [vmem:[#allocation7 + $0x600] sm:$0xff] }
  0x68   :  { %3222 = vmatprep.subr.bf16.mxu0 %v5560_v31  ;;  %7296 = vst [vmem:[#allocation57_spill] sm:$0xff] %v5598_v54  ;;  %v489_v11 = vld [vmem:[#allocation7 + $0x648] sm:$0xff]  ;;  %v491_v23 = vld [vmem:[#allocation7 + $0x658] sm:$0xff]  ;;  %v488_v32 = vld [vmem:[#allocation7 + $0x640] sm:$0xff] }
  0x69   :  { %3284 = vmatpush1.bf16.msra.mxu1 %v5556_v25  ;;  %7297 = vst [vmem:[#allocation58_spill] sm:$0xff] %v5600_v55  ;;  %7298 = vst [vmem:[#allocation59_spill] sm:$0xff] %v5603_v7  ;;  %v5608_v20 = vpack.c.bf16 %v489_v11, %v481_v10  ;;  %v5610_v37 = vpack.c.bf16 %v491_v23, %v483_v19  ;;  %v5612_v38 = vpack.c.bf16 %v488_v32, %v480_v29  ;;  %v482_v40 = vld [vmem:[#allocation7 + $0x610] sm:$0xff]  ;;  %v497_v51 = vld [vmem:[#allocation7 + $0x688] sm:$0xff] }
  0x6a   :  { %3286 = vmatprep.subr.bf16.mxu1 %v5562_v35  ;;  %v490_v46 = vld [vmem:[#allocation7 + $0x650] sm:$0xff]  ;;  %v505_v1 = vld [vmem:[#allocation7 + $0x6c8] sm:$0xff]  ;;  %v499_v2 = vld [vmem:[#allocation7 + $0x698] sm:$0xff] }
  0x6b   :  { %3224 = vmatpush1.bf16.msra.mxu0 %v5565_v41  ;;  %7299 = vst [vmem:[#allocation60_spill] sm:$0xff] %v5608_v20  ;;  %7300 = vst [vmem:[#allocation61_spill] sm:$0xff] %v5610_v37  ;;  %v5615_v48 = vpack.c.bf16 %v490_v46, %v482_v40  ;;  %v5620_v10 = vpack.c.bf16 %v505_v1, %v497_v51  ;;  %v507_v11 = vld [vmem:[#allocation7 + $0x6d8] sm:$0xff]  ;;  %v496_v19 = vld [vmem:[#allocation7 + $0x680] sm:$0xff] }
  0x6c   :  { %3226 = vmatprep.subr.bf16.mxu0 %v5572_v50  ;;  %7301 = vst [vmem:[#allocation62_spill] sm:$0xff] %v5612_v38  ;;  %v504_v23 = vld [vmem:[#allocation7 + $0x6c0] sm:$0xff]  ;;  %v5622_v29 = vpack.c.bf16 %v507_v11, %v499_v2  ;;  %v498_v40 = vld [vmem:[#allocation7 + $0x690] sm:$0xff]  ;;  %v513_v0 = vld [vmem:[#allocation7 + $0x708] sm:$0xff] }
  0x6d   :  { %3288 = vmatpush1.bf16.msra.mxu1 %v5567_v43  ;;  %7302 = vst [vmem:[#allocation63_spill] sm:$0xff] %v5615_v48  ;;  %7303 = vst [vmem:[#allocation64_spill] sm:$0xff] %v5620_v10  ;;  %v5624_v32 = vpack.c.bf16 %v504_v23, %v496_v19  ;;  %v506_v46 = vld [vmem:[#allocation7 + $0x6d0] sm:$0xff]  ;;  %v512_v2 = vld [vmem:[#allocation7 + $0x700] sm:$0xff] }
  0x6e   :  { %3290 = vmatprep.subr.bf16.mxu1 %v5574_v58  ;;  %7304 = vst [vmem:[#allocation65_spill] sm:$0xff] %v5622_v29  ;;  %v520_v11 = vld [vmem:[#allocation7 + $0x740] sm:$0xff]  ;;  %v514_v19 = vld [vmem:[#allocation7 + $0x710] sm:$0xff] }
  0x6f   :  { %3228 = vmatpush1.bf16.msra.mxu0 %v5576_v61  ;;  %7305 = vst [vmem:[#allocation66_spill] sm:$0xff] %v5624_v32  ;;  %v5636_v23 = vpack.c.bf16 %v520_v11, %v512_v2  ;;  %v528_v2 = vld [vmem:[#allocation7 + $0x780] sm:$0xff] }
  0x70   :  { %3230 = vmatprep.subr.bf16.mxu0 %v5584_v17  ;;  %v536_v11 = vld [vmem:[#allocation7 + $0x7c0] sm:$0xff]  ;;  %v327_v17 = vld [vmem:[#allocation7 + $0x138] sm:$0xff] }
  0x71   :  { %3292 = vmatpush1.bf16.msra.mxu1 %v5579_v5  ;;  %7309 = vst [vmem:[#allocation70_spill] sm:$0xff] %v5636_v23  ;;  %v335_v5 = vld [vmem:[#allocation7 + $0x178] sm:$0xff] }
  0x72   :  { %3294 = vmatprep.subr.bf16.mxu1 %v5586_v26  ;;  %v333_v26 = vld [vmem:[#allocation7 + $0x168] sm:$0xff] }
  0x73   :  { %3232 = vmatpush1.bf16.msra.mxu0 %v5588_v28  ;;  %v325_v28 = vld [vmem:[#allocation7 + $0x128] sm:$0xff] }
  0x74   :  { %3234 = vmatprep.subr.bf16.mxu0 %v5596_v44  ;;  %v311_v44 = vld [vmem:[#allocation7 + $0xb8] sm:$0xff] }
  0x75   :  { %3296 = vmatpush1.bf16.msra.mxu1 %v5591_v34 }
  0x76   :  { %3298 = vmatprep.subr.bf16.mxu1 %v5598_v54  ;;  %v309_v54 = vld [vmem:[#allocation7 + $0xa8] sm:$0xff] }
  0x77   :  { %3236 = vmatpush1.bf16.msra.mxu0 %v5600_v55 }
  0x78   :  { %3238 = vmatprep.subr.bf16.mxu0 %v5608_v20  ;;  %v521_v20 = vld [vmem:[#allocation7 + $0x748] sm:$0xff] }
  0x79   :  { %3300 = vmatpush1.bf16.msra.mxu1 %v5603_v7  ;;  %v523_v7 = vld [vmem:[#allocation7 + $0x758] sm:$0xff]  ;;  %v5630_v51 = vpack.c.bf16 %v521_v20, %v513_v0 }
  0x7a   :  { %3302 = vmatprep.subr.bf16.mxu1 %v5610_v37  ;;  %v5627_v37 = vpack.c.bf16 %v506_v46, %v498_v40  ;;  %v522_v40 = vld [vmem:[#allocation7 + $0x750] sm:$0xff]  ;;  %v63_v46 = vld [vmem:[#allocation2 + $0x8] sm:$0xff] }
  0x7b   :  { %3240 = vmatpush1.bf16.msra.mxu0 %v5612_v38  ;;  %v515_v38 = vld [vmem:[#allocation7 + $0x718] sm:$0xff]  ;;  %7307 = vst [vmem:[#allocation68_spill] sm:$0xff] %v5630_v51  ;;  %v5640_v0 = vpack.c.bf16 %v522_v40, %v514_v19  ;;  %3164 = vmatmul.mubr.msk.f32.gmra.mrb[2].mxu1 %vm114_vm1, %v63_v46  ;;  %v293_v19 = vld [vmem:[#allocation7 + $0x28] sm:$0xff] }
  0x7c   :  { %3242 = vmatprep.subr.bf16.mxu0 %v5620_v10  ;;  %7306 = vst [vmem:[#allocation67_spill] sm:$0xff] %v5627_v37  ;;  %v5632_v1 = vpack.c.bf16 %v523_v7, %v515_v38  ;;  %v529_v10 = vld [vmem:[#allocation7 + $0x788] sm:$0xff]  ;;  %v531_v20 = vld [vmem:[#allocation7 + $0x798] sm:$0xff]  ;;  %3160 = vmatmul.mubr.msk.f32.gmra.mrb[2].mxu0 %vm114_vm1, %v63_v46 }
  0x7d   :  { %3304 = vmatpush1.bf16.msra.mxu1 %v5615_v48  ;;  %7310 = vst [vmem:[#allocation71_spill] sm:$0xff] %v5640_v0  ;;  %v537_v7 = vld [vmem:[#allocation7 + $0x7c8] sm:$0xff]  ;;  %v539_v38 = vld [vmem:[#allocation7 + $0x7d8] sm:$0xff]  ;;  %v538_v48 = vld [vmem:[#allocation7 + $0x7d0] sm:$0xff] }
  0x7e   :  { %3306 = vmatprep.subr.bf16.mxu1 %v5622_v29  ;;  %7308 = vst [vmem:[#allocation69_spill] sm:$0xff] %v5632_v1  ;;  %v5643_v29 = vpack.c.bf16 %v537_v7, %v529_v10  ;;  %v301_v40 = vld [vmem:[#allocation7 + $0x68] sm:$0xff]  ;;  %v5652_v10 = vpack.c.bf16 %v536_v11, %v528_v2  ;;  %v303_v46 = vld [vmem:[#allocation7 + $0x78] sm:$0xff]  ;;  %v92_v11 = vld [vmem:[%s6941_s2] sm:$0xf] }
  0x7f   :  { %3244 = vmatpush1.bf16.msra.mxu0 %v5624_v32  ;;  %v5645_v32 = vpack.c.bf16 %v539_v38, %v531_v20  ;;  %v295_v20 = vld [vmem:[#allocation7 + $0x38] sm:$0xff]  ;;  %v5658_v38 = vpack.c.bf16 %v301_v40, %v293_v19 }
  0x80   :  { %3246 = vmatprep.subr.bf16.mxu0 %v5630_v51  ;;  %7311 = vst [vmem:[#allocation72_spill] sm:$0xff] %v5643_v29  ;;  %v7313_v51 = vmov 0.0   ;;  %7314 = vst [vmem:[#allocation74_spill] sm:$0xff] %v5652_v10 }
  0x81   :  { %3308 = vmatpush1.bf16.msra.mxu1 %v5627_v37  ;;  %7312 = vst [vmem:[#allocation73_spill] sm:$0xff] %v5645_v32  ;;  %v530_v37 = vld [vmem:[#allocation7 + $0x790] sm:$0xff]  ;;  %624 = vmatprep.mubr.f32.mxu0 %v7313_v51  ;;  %7316 = vst [vmem:[#allocation76_spill] sm:$0xff] %v5658_v38 }
  0x82   :  { %3310 = vmatprep.subr.bf16.mxu1 %v5632_v1  ;;  %695 = vmatprep.mubr.f32.mxu1 %v7313_v51  ;;  %v5654_v7 = vpack.c.bf16 %v538_v48, %v530_v37  ;;  %v5660_v1 = vpack.c.bf16 %v303_v46, %v295_v20  ;;  %v94_v37 = vlaneseq }
  0x83   :  { %3248 = vmatpush1.bf16.msra.mxu0 %v5636_v23 }
  0x84   :  { %7315 = vst [vmem:[#allocation75_spill] sm:$0xff] %v5654_v7  ;;  %3250 = vmatprep.subr.bf16.mxu0 %v5643_v29  ;;  %7317 = vst [vmem:[#allocation77_spill] sm:$0xff] %v5660_v1  ;;  %v5666_v48 = vshrl.u32 %v94_v37, 7 }
  0x85   :  { %3312 = vmatpush1.bf16.msra.mxu1 %v5640_v0 }
  0x86   :  { %3314 = vmatprep.subr.bf16.mxu1 %v5645_v32  ;;  %7318 = vst [vmem:[#allocation78_spill] sm:$0xff] %v5666_v48  ;;  %v6979_v2 = vsub.s32 0, %v5666_v48  ;;  %v6980_v19 = vsub.s32 1, %v5666_v48  ;;  %v6983_v40 = vsub.s32 2, %v5666_v48 }
  0x87   :  { %3252 = vmatpush1.bf16.msra.mxu0 %v5652_v10 }
  0x88   :  { %3318 = vmatprep.subr.bf16.mxu0 %v5658_v38  ;;  %v5676_v20 = vrot.slane %v92_v11, %v6979_v2  ;;  %v5680_v46 = vrot.slane %v92_v11, %v6980_v19  ;;  %v5684_v37 = vrot.slane %v92_v11, %v6983_v40  ;;  %v6997_v19 = vsub.s32 3, %v5666_v48  ;;  %v292_v48 = vld [vmem:[#allocation7 + $0x20] sm:$0xff] }
  0x89   :  { %3316 = vmatpush1.bf16.msra.mxu1 %v5654_v7 }
  0x8a   :  { %3382 = vmatprep.subr.bf16.mxu1 %v5660_v1  ;;  %7319 = vst [vmem:[#allocation79_spill] sm:$0xff] %v5676_v20  ;;  %7320 = vst [vmem:[#allocation80_spill] sm:$0xff] %v5680_v46 }
  0x8b   :  { %7321 = vst [vmem:[#allocation81_spill] sm:$0xff] %v5684_v37 }
 0x11d   :  { %v200_v1 = vpop.f32.mrb[0].mxu0 }
 0x11e   :  { %v5687_v38 = vadd.f32 %v200_v1, %v5676_v20  ;;  %v202_v7 = vpop.f32.mrb[1].mxu0  ;;  %v5701_v1 = vrot.slane %v92_v11, %v6997_v19 }
 0x11f   :  { %v5690_v10 = vadd.f32 %v202_v7, %v5680_v46  ;;  %v277_v32 = vpop.f32.mrb[0].mxu1 }
 0x120   :  { %7322 = vst [vmem:[#allocation82_spill] sm:$0xff] %v5687_v38  ;;  %5120 = vtanh.f32 %v5687_v38  ;;  %v5694_v2 = vadd.f32 %v277_v32, %v5684_v37  ;;  %v279_v29 = vpop.f32.mrb[1].mxu1  ;;  %7325 = vst [vmem:[#allocation85_spill] sm:$0xff] %v5701_v1 }
 0x121   :  { %7323 = vst [vmem:[#allocation83_spill] sm:$0xff] %v5690_v10  ;;  %5122 = vtanh.f32 %v5690_v10  ;;  %v5704_v7 = vadd.f32 %v279_v29, %v5701_v1  ;;  %v300_v29 = vld [vmem:[#allocation7 + $0x60] sm:$0xff]  ;;  %v294_v1 = vld [vmem:[#allocation7 + $0x30] sm:$0xff] }
 0x122   :  { %7324 = vst [vmem:[#allocation84_spill] sm:$0xff] %v5694_v2  ;;  %5124 = vtanh.f32 %v5694_v2  ;;  %v302_v2 = vld [vmem:[#allocation7 + $0x70] sm:$0xff] }
 0x123   :  { %7326 = vst [vmem:[#allocation86_spill] sm:$0xff] %v5704_v7  ;;  %5126 = vtanh.f32 %v5704_v7 }
 0x12a   :  { %v5121_v40 = vpop.eup %5120 }
 0x12b   :  { %v5123_v46 = vpop.eup %5122  ;;  %v549_v20 = vmul.f32 0.5, %v5121_v40  ;;  %v317_v40 = vld [vmem:[#allocation7 + $0xe8] sm:$0xff] }
 0x12c   :  { %v5125_v38 = vpop.eup %5124  ;;  %v551_v32 = vmul.f32 0.5, %v5123_v46  ;;  %v319_v46 = vld [vmem:[#allocation7 + $0xf8] sm:$0xff] }
 0x12d   :  { %v550_v37 = vadd.f32 0.5, %v549_v20  ;;  %v5127_v11 = vpop.eup %5126  ;;  %v5710_v20 = vpack.c.bf16 %v300_v29, %v292_v48  ;;  %v332_v48 = vld [vmem:[#allocation7 + $0x160] sm:$0xff]  ;;  %v341_v29 = vld [vmem:[#allocation7 + $0x1a8] sm:$0xff] }
 0x12e   :  { %v552_v0 = vadd.f32 0.5, %v551_v32  ;;  %v553_v19 = vmul.f32 0.5, %v5127_v11  ;;  %v5718_v32 = vpack.c.bf16 %v319_v46, %v311_v44  ;;  %v310_v11 = vld [vmem:[#allocation7 + $0xb0] sm:$0xff]  ;;  %v324_v44 = vld [vmem:[#allocation7 + $0x120] sm:$0xff]  ;;  %v343_v46 = vld [vmem:[#allocation7 + $0x1b8] sm:$0xff] }
 0x12f   :  { %v556_v23 = vmul.f32 %v5125_v38, %v550_v37  ;;  %v5712_v38 = vpack.c.bf16 %v302_v2, %v294_v1  ;;  %v5716_v37 = vpack.c.bf16 %v317_v40, %v309_v54  ;;  %v5730_v2 = vpack.c.bf16 %v333_v26, %v325_v28  ;;  %v326_v1 = vld [vmem:[#allocation7 + $0x130] sm:$0xff]  ;;  %v349_v40 = vld [vmem:[#allocation7 + $0x1e8] sm:$0xff] }
 0x130   :  { %v555_v10 = vmul.f32 0.0, %v552_v0  ;;  %v554_v34 = vadd.f32 0.5, %v553_v19  ;;  %v316_v0 = vld [vmem:[#allocation7 + $0xe0] sm:$0xff]  ;;  %7329 = vst [vmem:[#allocation89_spill] sm:$0xff] %v5718_v32  ;;  %v5732_v19 = vpack.c.bf16 %v335_v5, %v327_v17  ;;  %v5744_v28 = vpack.c.bf16 %v349_v40, %v341_v29  ;;  %v358_v40 = vld [vmem:[#allocation7 + $0x230] sm:$0xff] }
 0x131   :  { %7328 = vst [vmem:[#allocation88_spill] sm:$0xff] %v5712_v38  ;;  %7332 = vst [vmem:[#allocation92_spill] sm:$0xff] %v5730_v2  ;;  %v340_v5 = vld [vmem:[#allocation7 + $0x1a0] sm:$0xff] }
 0x132   :  { %v5707_v55 = vadd.f32 %v556_v23, %v555_v10  ;;  %v308_v23 = vld [vmem:[#allocation7 + $0xa0] sm:$0xff]  ;;  %7333 = vst [vmem:[#allocation93_spill] sm:$0xff] %v5732_v19  ;;  %7336 = vst [vmem:[#allocation96_spill] sm:$0xff] %v5744_v28 }
 0x133   :  { %v348_v17 = vld [vmem:[#allocation7 + $0x1e0] sm:$0xff] }
 0x134   :  { %7327 = vst [vmem:[#allocation87_spill] sm:$0xff] %v5707_v55  ;;  %5128 = vtanh.f32 %v5707_v55  ;;  %v318_v55 = vld [vmem:[#allocation7 + $0xf0] sm:$0xff] }
 0x135   :  { %v5726_v54 = vpack.c.bf16 %v318_v55, %v310_v11  ;;  %v5738_v55 = vpack.c.bf16 %v332_v48, %v324_v44  ;;  %v357_v11 = vld [vmem:[#allocation7 + $0x228] sm:$0xff]  ;;  %v5750_v44 = vpack.c.bf16 %v348_v17, %v340_v5 }
 0x137   :  { %7331 = vst [vmem:[#allocation91_spill] sm:$0xff] %v5726_v54  ;;  %7334 = vst [vmem:[#allocation94_spill] sm:$0xff] %v5738_v55 }
 0x138   :  { %7338 = vst [vmem:[#allocation98_spill] sm:$0xff] %v5750_v44 }
 0x13e   :  { %v5129_v7 = vpop.eup %5128 }
 0x13f   :  { %v5714_v10 = vmul.f32 %v5129_v7, %v554_v34  ;;  %v5724_v34 = vpack.c.bf16 %v316_v0, %v308_v23  ;;  %v334_v7 = vld [vmem:[#allocation7 + $0x170] sm:$0xff] }
 0x140   :  { %v5740_v26 = vpack.c.bf16 %v334_v7, %v326_v1  ;;  %v342_v0 = vld [vmem:[#allocation7 + $0x1b0] sm:$0xff]  ;;  %v356_v1 = vld [vmem:[#allocation7 + $0x220] sm:$0xff] }
 0x141   :  { %625 = vmatmul.mubr.f32.vlgmr.msra.gmra.mrb[4].mxu0 %v5714_v10  ;;  %696 = vmatmul.mubr.f32.vlgmr.msra.gmra.mrb[4].mxu1 %v5714_v10  ;;  %7330 = vst [vmem:[#allocation90_spill] sm:$0xff] %v5724_v34  ;;  %v364_v7 = vld [vmem:[#allocation7 + $0x260] sm:$0xff] }
 0x142   :  { %3320 = vmatpush1.bf16.msra.mxu0 %v5710_v20  ;;  %3384 = vmatpush1.bf16.msra.mxu1 %v5712_v38  ;;  %v351_v38 = vld [vmem:[#allocation7 + $0x1f8] sm:$0xff]  ;;  %7335 = vst [vmem:[#allocation95_spill] sm:$0xff] %v5740_v26  ;;  %v5762_v5 = vpack.c.bf16 %v364_v7, %v356_v1 }
 0x143   :  { %3322 = vmatprep.subr.bf16.mxu0 %v5716_v37  ;;  %3386 = vmatprep.subr.bf16.mxu1 %v5718_v32  ;;  %v5746_v23 = vpack.c.bf16 %v351_v38, %v343_v46  ;;  %v359_v32 = vld [vmem:[#allocation7 + $0x238] sm:$0xff]  ;;  %v366_v46 = vld [vmem:[#allocation7 + $0x270] sm:$0xff] }
 0x144   :  { %766 = vmatprep.mubr.f32.mxu0 %v7313_v51  ;;  %837 = vmatprep.mubr.f32.mxu1 %v7313_v51  ;;  %v350_v51 = vld [vmem:[#allocation7 + $0x1f0] sm:$0xff]  ;;  %7342 = vst [vmem:[#allocation102_spill] sm:$0xff] %v5762_v5  ;;  %v5764_v17 = vpack.c.bf16 %v366_v46, %v358_v40  ;;  %v388_v40 = vld [vmem:[#allocation7 + $0x320] sm:$0xff] }
 0x145   :  { %7337 = vst [vmem:[#allocation97_spill] sm:$0xff] %v5746_v23  ;;  %v5752_v48 = vpack.c.bf16 %v350_v51, %v342_v0  ;;  %v372_v0 = vld [vmem:[#allocation7 + $0x2a0] sm:$0xff] }
 0x146   :  { %3324 = vmatpush1.bf16.msra.mxu0 %v5724_v34  ;;  %3388 = vmatpush1.bf16.msra.mxu1 %v5726_v54  ;;  %v365_v34 = vld [vmem:[#allocation7 + $0x268] sm:$0xff]  ;;  %v367_v54 = vld [vmem:[#allocation7 + $0x278] sm:$0xff]  ;;  %7343 = vst [vmem:[#allocation103_spill] sm:$0xff] %v5764_v17  ;;  %v380_v51 = vld [vmem:[#allocation7 + $0x2e0] sm:$0xff] }
 0x147   :  { %3326 = vmatprep.subr.bf16.mxu0 %v5730_v2  ;;  %3390 = vmatprep.subr.bf16.mxu1 %v5732_v19  ;;  %7339 = vst [vmem:[#allocation99_spill] sm:$0xff] %v5752_v48  ;;  %v5756_v38 = vpack.c.bf16 %v365_v34, %v357_v11  ;;  %v5758_v29 = vpack.c.bf16 %v367_v54, %v359_v32  ;;  %v373_v19 = vld [vmem:[#allocation7 + $0x2a8] sm:$0xff]  ;;  %v375_v2 = vld [vmem:[#allocation7 + $0x2b8] sm:$0xff]  ;;  %v374_v54 = vld [vmem:[#allocation7 + $0x2b0] sm:$0xff] }
 0x148   :  { %v382_v11 = vld [vmem:[#allocation7 + $0x2f0] sm:$0xff]  ;;  %v5774_v1 = vpack.c.bf16 %v380_v51, %v372_v0  ;;  %v396_v46 = vld [vmem:[#allocation7 + $0x360] sm:$0xff] }
 0x149   :  { %7340 = vst [vmem:[#allocation100_spill] sm:$0xff] %v5756_v38  ;;  %7341 = vst [vmem:[#allocation101_spill] sm:$0xff] %v5758_v29  ;;  %v5776_v7 = vpack.c.bf16 %v382_v11, %v374_v54  ;;  %v5786_v0 = vpack.c.bf16 %v396_v46, %v388_v40  ;;  %v404_v54 = vld [vmem:[#allocation7 + $0x3a0] sm:$0xff] }
 0x14a   :  { %3328 = vmatpush1.bf16.msra.mxu0 %v5738_v55  ;;  %3392 = vmatpush1.bf16.msra.mxu1 %v5740_v26  ;;  %v381_v55 = vld [vmem:[#allocation7 + $0x2e8] sm:$0xff]  ;;  %v383_v26 = vld [vmem:[#allocation7 + $0x2f8] sm:$0xff]  ;;  %7346 = vst [vmem:[#allocation106_spill] sm:$0xff] %v5774_v1  ;;  %v412_v11 = vld [vmem:[#allocation7 + $0x3e0] sm:$0xff] }
 0x14b   :  { %3330 = vmatprep.subr.bf16.mxu0 %v5744_v28  ;;  %3394 = vmatprep.subr.bf16.mxu1 %v5746_v23  ;;  %v5768_v32 = vpack.c.bf16 %v381_v55, %v373_v19  ;;  %v5770_v34 = vpack.c.bf16 %v383_v26, %v375_v2  ;;  %v389_v23 = vld [vmem:[#allocation7 + $0x328] sm:$0xff]  ;;  %v391_v28 = vld [vmem:[#allocation7 + $0x338] sm:$0xff]  ;;  %7347 = vst [vmem:[#allocation107_spill] sm:$0xff] %v5776_v7  ;;  %v390_v55 = vld [vmem:[#allocation7 + $0x330] sm:$0xff] }
 0x14c   :  { %v398_v26 = vld [vmem:[#allocation7 + $0x370] sm:$0xff]  ;;  %7350 = vst [vmem:[#allocation110_spill] sm:$0xff] %v5786_v0  ;;  %v5798_v40 = vpack.c.bf16 %v412_v11, %v404_v54 }
 0x14d   :  { %7344 = vst [vmem:[#allocation104_spill] sm:$0xff] %v5768_v32  ;;  %7345 = vst [vmem:[#allocation105_spill] sm:$0xff] %v5770_v34  ;;  %v5788_v51 = vpack.c.bf16 %v398_v26, %v390_v55  ;;  %v420_v55 = vld [vmem:[#allocation7 + $0x420] sm:$0xff] }
 0x14e   :  { %3332 = vmatpush1.bf16.msra.mxu0 %v5750_v44  ;;  %3396 = vmatpush1.bf16.msra.mxu1 %v5752_v48  ;;  %v397_v44 = vld [vmem:[#allocation7 + $0x368] sm:$0xff]  ;;  %v399_v48 = vld [vmem:[#allocation7 + $0x378] sm:$0xff]  ;;  %7354 = vst [vmem:[#allocation114_spill] sm:$0xff] %v5798_v40  ;;  %v428_v26 = vld [vmem:[#allocation7 + $0x460] sm:$0xff] }
 0x14f   :  { %3334 = vmatprep.subr.bf16.mxu0 %v5756_v38  ;;  %3398 = vmatprep.subr.bf16.mxu1 %v5758_v29  ;;  %v5780_v2 = vpack.c.bf16 %v397_v44, %v389_v23  ;;  %v5782_v19 = vpack.c.bf16 %v399_v48, %v391_v28  ;;  %v405_v29 = vld [vmem:[#allocation7 + $0x3a8] sm:$0xff]  ;;  %v407_v38 = vld [vmem:[#allocation7 + $0x3b8] sm:$0xff]  ;;  %7351 = vst [vmem:[#allocation111_spill] sm:$0xff] %v5788_v51  ;;  %v406_v44 = vld [vmem:[#allocation7 + $0x3b0] sm:$0xff] }
 0x150   :  { %v414_v48 = vld [vmem:[#allocation7 + $0x3f0] sm:$0xff]  ;;  %v5810_v54 = vpack.c.bf16 %v428_v26, %v420_v55 }
 0x151   :  { %7348 = vst [vmem:[#allocation108_spill] sm:$0xff] %v5780_v2  ;;  %7349 = vst [vmem:[#allocation109_spill] sm:$0xff] %v5782_v19  ;;  %v5800_v46 = vpack.c.bf16 %v414_v48, %v406_v44  ;;  %v436_v44 = vld [vmem:[#allocation7 + $0x4a0] sm:$0xff] }
 0x152   :  { %3336 = vmatpush1.bf16.msra.mxu0 %v5762_v5  ;;  %3400 = vmatpush1.bf16.msra.mxu1 %v5764_v17  ;;  %v413_v5 = vld [vmem:[#allocation7 + $0x3e8] sm:$0xff]  ;;  %v415_v17 = vld [vmem:[#allocation7 + $0x3f8] sm:$0xff]  ;;  %7358 = vst [vmem:[#allocation118_spill] sm:$0xff] %v5810_v54  ;;  %v444_v48 = vld [vmem:[#allocation7 + $0x4e0] sm:$0xff] }
 0x153   :  { %3338 = vmatprep.subr.bf16.mxu0 %v5768_v32  ;;  %3402 = vmatprep.subr.bf16.mxu1 %v5770_v34  ;;  %v5792_v28 = vpack.c.bf16 %v413_v5, %v405_v29  ;;  %v5794_v23 = vpack.c.bf16 %v415_v17, %v407_v38  ;;  %v421_v34 = vld [vmem:[#allocation7 + $0x428] sm:$0xff]  ;;  %v423_v32 = vld [vmem:[#allocation7 + $0x438] sm:$0xff]  ;;  %7355 = vst [vmem:[#allocation115_spill] sm:$0xff] %v5800_v46  ;;  %v422_v5 = vld [vmem:[#allocation7 + $0x430] sm:$0xff] }
 0x154   :  { %v430_v17 = vld [vmem:[#allocation7 + $0x470] sm:$0xff]  ;;  %v5822_v55 = vpack.c.bf16 %v444_v48, %v436_v44 }
 0x155   :  { %7352 = vst [vmem:[#allocation112_spill] sm:$0xff] %v5792_v28  ;;  %7353 = vst [vmem:[#allocation113_spill] sm:$0xff] %v5794_v23  ;;  %v5812_v11 = vpack.c.bf16 %v430_v17, %v422_v5  ;;  %v452_v5 = vld [vmem:[#allocation7 + $0x520] sm:$0xff] }
 0x156   :  { %3340 = vmatpush1.bf16.msra.mxu0 %v5774_v1  ;;  %3404 = vmatpush1.bf16.msra.mxu1 %v5776_v7  ;;  %v429_v1 = vld [vmem:[#allocation7 + $0x468] sm:$0xff]  ;;  %v431_v7 = vld [vmem:[#allocation7 + $0x478] sm:$0xff]  ;;  %7362 = vst [vmem:[#allocation122_spill] sm:$0xff] %v5822_v55  ;;  %v460_v17 = vld [vmem:[#allocation7 + $0x560] sm:$0xff] }
 0x157   :  { %3342 = vmatprep.subr.bf16.mxu0 %v5780_v2  ;;  %3406 = vmatprep.subr.bf16.mxu1 %v5782_v19  ;;  %v5804_v38 = vpack.c.bf16 %v429_v1, %v421_v34  ;;  %v5806_v29 = vpack.c.bf16 %v431_v7, %v423_v32  ;;  %v437_v19 = vld [vmem:[#allocation7 + $0x4a8] sm:$0xff]  ;;  %v439_v2 = vld [vmem:[#allocation7 + $0x4b8] sm:$0xff]  ;;  %7359 = vst [vmem:[#allocation119_spill] sm:$0xff] %v5812_v11  ;;  %v438_v1 = vld [vmem:[#allocation7 + $0x4b0] sm:$0xff] }
 0x158   :  { %v446_v7 = vld [vmem:[#allocation7 + $0x4f0] sm:$0xff]  ;;  %v5834_v44 = vpack.c.bf16 %v460_v17, %v452_v5 }
 0x159   :  { %7356 = vst [vmem:[#allocation116_spill] sm:$0xff] %v5804_v38  ;;  %7357 = vst [vmem:[#allocation117_spill] sm:$0xff] %v5806_v29  ;;  %v5824_v26 = vpack.c.bf16 %v446_v7, %v438_v1  ;;  %v468_v1 = vld [vmem:[#allocation7 + $0x5a0] sm:$0xff] }
 0x15a   :  { %3344 = vmatpush1.bf16.msra.mxu0 %v5786_v0  ;;  %3408 = vmatpush1.bf16.msra.mxu1 %v5788_v51  ;;  %v445_v0 = vld [vmem:[#allocation7 + $0x4e8] sm:$0xff]  ;;  %v447_v51 = vld [vmem:[#allocation7 + $0x4f8] sm:$0xff]  ;;  %7366 = vst [vmem:[#allocation126_spill] sm:$0xff] %v5834_v44  ;;  %v476_v7 = vld [vmem:[#allocation7 + $0x5e0] sm:$0xff] }
 0x15b   :  { %3346 = vmatprep.subr.bf16.mxu0 %v5792_v28  ;;  %3410 = vmatprep.subr.bf16.mxu1 %v5794_v23  ;;  %v5816_v32 = vpack.c.bf16 %v445_v0, %v437_v19  ;;  %v5818_v34 = vpack.c.bf16 %v447_v51, %v439_v2  ;;  %v453_v23 = vld [vmem:[#allocation7 + $0x528] sm:$0xff]  ;;  %v455_v28 = vld [vmem:[#allocation7 + $0x538] sm:$0xff]  ;;  %7363 = vst [vmem:[#allocation123_spill] sm:$0xff] %v5824_v26  ;;  %v454_v0 = vld [vmem:[#allocation7 + $0x530] sm:$0xff] }
 0x15c   :  { %v462_v51 = vld [vmem:[#allocation7 + $0x570] sm:$0xff]  ;;  %v5846_v5 = vpack.c.bf16 %v476_v7, %v468_v1 }
 0x15d   :  { %7360 = vst [vmem:[#allocation120_spill] sm:$0xff] %v5816_v32  ;;  %7361 = vst [vmem:[#allocation121_spill] sm:$0xff] %v5818_v34  ;;  %v5836_v48 = vpack.c.bf16 %v462_v51, %v454_v0  ;;  %v484_v0 = vld [vmem:[#allocation7 + $0x620] sm:$0xff] }
 0x15e   :  { %3348 = vmatpush1.bf16.msra.mxu0 %v5798_v40  ;;  %3412 = vmatpush1.bf16.msra.mxu1 %v5800_v46  ;;  %v461_v40 = vld [vmem:[#allocation7 + $0x568] sm:$0xff]  ;;  %v463_v46 = vld [vmem:[#allocation7 + $0x578] sm:$0xff]  ;;  %7370 = vst [vmem:[#allocation130_spill] sm:$0xff] %v5846_v5  ;;  %v492_v51 = vld [vmem:[#allocation7 + $0x660] sm:$0xff] }
 0x15f   :  { %3350 = vmatprep.subr.bf16.mxu0 %v5804_v38  ;;  %3414 = vmatprep.subr.bf16.mxu1 %v5806_v29  ;;  %v5828_v2 = vpack.c.bf16 %v461_v40, %v453_v23  ;;  %v5830_v19 = vpack.c.bf16 %v463_v46, %v455_v28  ;;  %v469_v29 = vld [vmem:[#allocation7 + $0x5a8] sm:$0xff]  ;;  %v471_v38 = vld [vmem:[#allocation7 + $0x5b8] sm:$0xff]  ;;  %7367 = vst [vmem:[#allocation127_spill] sm:$0xff] %v5836_v48  ;;  %v470_v40 = vld [vmem:[#allocation7 + $0x5b0] sm:$0xff] }
 0x160   :  { %v478_v46 = vld [vmem:[#allocation7 + $0x5f0] sm:$0xff]  ;;  %v5858_v1 = vpack.c.bf16 %v492_v51, %v484_v0 }
 0x161   :  { %7364 = vst [vmem:[#allocation124_spill] sm:$0xff] %v5828_v2  ;;  %7365 = vst [vmem:[#allocation125_spill] sm:$0xff] %v5830_v19  ;;  %v5848_v17 = vpack.c.bf16 %v478_v46, %v470_v40  ;;  %v500_v40 = vld [vmem:[#allocation7 + $0x6a0] sm:$0xff] }
 0x162   :  { %3352 = vmatpush1.bf16.msra.mxu0 %v5810_v54  ;;  %3416 = vmatpush1.bf16.msra.mxu1 %v5812_v11  ;;  %v477_v54 = vld [vmem:[#allocation7 + $0x5e8] sm:$0xff]  ;;  %v479_v11 = vld [vmem:[#allocation7 + $0x5f8] sm:$0xff]  ;;  %7374 = vst [vmem:[#allocation134_spill] sm:$0xff] %v5858_v1  ;;  %v508_v46 = vld [vmem:[#allocation7 + $0x6e0] sm:$0xff] }
 0x163   :  { %3354 = vmatprep.subr.bf16.mxu0 %v5816_v32  ;;  %3418 = vmatprep.subr.bf16.mxu1 %v5818_v34  ;;  %v5840_v28 = vpack.c.bf16 %v477_v54, %v469_v29  ;;  %v5842_v23 = vpack.c.bf16 %v479_v11, %v471_v38  ;;  %v485_v34 = vld [vmem:[#allocation7 + $0x628] sm:$0xff]  ;;  %v487_v32 = vld [vmem:[#allocation7 + $0x638] sm:$0xff]  ;;  %7371 = vst [vmem:[#allocation131_spill] sm:$0xff] %v5848_v17  ;;  %v486_v54 = vld [vmem:[#allocation7 + $0x630] sm:$0xff] }
 0x164   :  { %v494_v11 = vld [vmem:[#allocation7 + $0x670] sm:$0xff]  ;;  %v5870_v0 = vpack.c.bf16 %v508_v46, %v500_v40 }
 0x165   :  { %7368 = vst [vmem:[#allocation128_spill] sm:$0xff] %v5840_v28  ;;  %7369 = vst [vmem:[#allocation129_spill] sm:$0xff] %v5842_v23  ;;  %v5860_v7 = vpack.c.bf16 %v494_v11, %v486_v54  ;;  %v516_v54 = vld [vmem:[#allocation7 + $0x720] sm:$0xff] }
 0x166   :  { %3356 = vmatpush1.bf16.msra.mxu0 %v5822_v55  ;;  %3420 = vmatpush1.bf16.msra.mxu1 %v5824_v26  ;;  %v493_v55 = vld [vmem:[#allocation7 + $0x668] sm:$0xff]  ;;  %v495_v26 = vld [vmem:[#allocation7 + $0x678] sm:$0xff]  ;;  %7378 = vst [vmem:[#allocation138_spill] sm:$0xff] %v5870_v0  ;;  %v524_v11 = vld [vmem:[#allocation7 + $0x760] sm:$0xff] }
 0x167   :  { %3358 = vmatprep.subr.bf16.mxu0 %v5828_v2  ;;  %3422 = vmatprep.subr.bf16.mxu1 %v5830_v19  ;;  %v5852_v38 = vpack.c.bf16 %v493_v55, %v485_v34  ;;  %v5854_v29 = vpack.c.bf16 %v495_v26, %v487_v32  ;;  %v501_v19 = vld [vmem:[#allocation7 + $0x6a8] sm:$0xff]  ;;  %v503_v2 = vld [vmem:[#allocation7 + $0x6b8] sm:$0xff]  ;;  %7375 = vst [vmem:[#allocation135_spill] sm:$0xff] %v5860_v7  ;;  %v502_v55 = vld [vmem:[#allocation7 + $0x6b0] sm:$0xff] }
 0x168   :  { %v510_v26 = vld [vmem:[#allocation7 + $0x6f0] sm:$0xff]  ;;  %v5882_v40 = vpack.c.bf16 %v524_v11, %v516_v54 }
 0x169   :  { %7372 = vst [vmem:[#allocation132_spill] sm:$0xff] %v5852_v38  ;;  %7373 = vst [vmem:[#allocation133_spill] sm:$0xff] %v5854_v29  ;;  %v5872_v51 = vpack.c.bf16 %v510_v26, %v502_v55  ;;  %v532_v55 = vld [vmem:[#allocation7 + $0x7a0] sm:$0xff]  ;;  %v542_v26 = vld [vmem:[#allocation7 + $0x7f0] sm:$0xff] }
 0x16a   :  { %3360 = vmatpush1.bf16.msra.mxu0 %v5834_v44  ;;  %3424 = vmatpush1.bf16.msra.mxu1 %v5836_v48  ;;  %v509_v44 = vld [vmem:[#allocation7 + $0x6e8] sm:$0xff]  ;;  %v511_v48 = vld [vmem:[#allocation7 + $0x6f8] sm:$0xff]  ;;  %7382 = vst [vmem:[#allocation142_spill] sm:$0xff] %v5882_v40 }
 0x16b   :  { %3362 = vmatprep.subr.bf16.mxu0 %v5840_v28  ;;  %3426 = vmatprep.subr.bf16.mxu1 %v5842_v23  ;;  %v5864_v32 = vpack.c.bf16 %v509_v44, %v501_v19  ;;  %v5866_v34 = vpack.c.bf16 %v511_v48, %v503_v2  ;;  %v517_v23 = vld [vmem:[#allocation7 + $0x728] sm:$0xff]  ;;  %v519_v28 = vld [vmem:[#allocation7 + $0x738] sm:$0xff]  ;;  %7379 = vst [vmem:[#allocation139_spill] sm:$0xff] %v5872_v51  ;;  %v518_v44 = vld [vmem:[#allocation7 + $0x730] sm:$0xff] }
 0x16c   :  { %v526_v48 = vld [vmem:[#allocation7 + $0x770] sm:$0xff] }
 0x16d   :  { %7376 = vst [vmem:[#allocation136_spill] sm:$0xff] %v5864_v32  ;;  %7377 = vst [vmem:[#allocation137_spill] sm:$0xff] %v5866_v34  ;;  %v5884_v46 = vpack.c.bf16 %v526_v48, %v518_v44  ;;  %v7393_v44 = vld [vmem:[#allocation52_spill] sm:$0xff]  ;;  %v7394_v48 = vld [vmem:[#allocation53_spill] sm:$0xff] }
 0x16e   :  { %3364 = vmatpush1.bf16.msra.mxu0 %v5846_v5  ;;  %3428 = vmatpush1.bf16.msra.mxu1 %v5848_v17  ;;  %v525_v5 = vld [vmem:[#allocation7 + $0x768] sm:$0xff]  ;;  %v527_v17 = vld [vmem:[#allocation7 + $0x778] sm:$0xff] }
 0x16f   :  { %3366 = vmatprep.subr.bf16.mxu0 %v5852_v38  ;;  %3430 = vmatprep.subr.bf16.mxu1 %v5854_v29  ;;  %v5876_v2 = vpack.c.bf16 %v525_v5, %v517_v23  ;;  %v5878_v19 = vpack.c.bf16 %v527_v17, %v519_v28  ;;  %v533_v29 = vld [vmem:[#allocation7 + $0x7a8] sm:$0xff]  ;;  %v535_v38 = vld [vmem:[#allocation7 + $0x7b8] sm:$0xff]  ;;  %7383 = vst [vmem:[#allocation143_spill] sm:$0xff] %v5884_v46  ;;  %v540_v5 = vld [vmem:[#allocation7 + $0x7e0] sm:$0xff] }
 0x170   :  { %v534_v17 = vld [vmem:[#allocation7 + $0x7b0] sm:$0xff]  ;;  %v5894_v54 = vpack.c.bf16 %v540_v5, %v532_v55  ;;  %v7395_v55 = vld [vmem:[#allocation54_spill] sm:$0xff]  ;;  %v7396_v5 = vld [vmem:[#allocation55_spill] sm:$0xff] }
 0x171   :  { %7380 = vst [vmem:[#allocation140_spill] sm:$0xff] %v5876_v2  ;;  %7381 = vst [vmem:[#allocation141_spill] sm:$0xff] %v5878_v19  ;;  %v5896_v11 = vpack.c.bf16 %v542_v26, %v534_v17  ;;  %v7397_v17 = vld [vmem:[#allocation56_spill] sm:$0xff]  ;;  %v7398_v26 = vld [vmem:[#allocation57_spill] sm:$0xff] }
 0x172   :  { %3368 = vmatpush1.bf16.msra.mxu0 %v5858_v1  ;;  %3432 = vmatpush1.bf16.msra.mxu1 %v5860_v7  ;;  %v541_v1 = vld [vmem:[#allocation7 + $0x7e8] sm:$0xff]  ;;  %v543_v7 = vld [vmem:[#allocation7 + $0x7f8] sm:$0xff]  ;;  %7386 = vst [vmem:[#allocation146_spill] sm:$0xff] %v5894_v54 }
 0x173   :  { %3370 = vmatprep.subr.bf16.mxu0 %v5864_v32  ;;  %3434 = vmatprep.subr.bf16.mxu1 %v5866_v34  ;;  %v5888_v28 = vpack.c.bf16 %v541_v1, %v533_v29  ;;  %v5890_v23 = vpack.c.bf16 %v543_v7, %v535_v38  ;;  %7387 = vst [vmem:[#allocation147_spill] sm:$0xff] %v5896_v11  ;;  %v5918_v38 = vpop.f32.mrb[2].mxu1  ;;  %v7392_v7 = vld [vmem:[#allocation51_spill] sm:$0xff] }
 0x174   :  { %7389 = vst [vmem:[#allocation149_spill] sm:$0xff] %v5918_v38  ;;  %v5924_v1 = vpop.f32.mrb[3].mxu1  ;;  %v7400_v38 = vld [vmem:[#allocation59_spill] sm:$0xff] }
 0x175   :  { %7384 = vst [vmem:[#allocation144_spill] sm:$0xff] %v5888_v28  ;;  %7385 = vst [vmem:[#allocation145_spill] sm:$0xff] %v5890_v23 }
 0x176   :  { %3372 = vmatpush1.bf16.msra.mxu0 %v5870_v0  ;;  %3436 = vmatpush1.bf16.msra.mxu1 %v5872_v51  ;;  %7391 = vst [vmem:[#allocation151_spill] sm:$0xff] %v5924_v1  ;;  %v7399_v1 = vld [vmem:[#allocation58_spill] sm:$0xff] }
 0x177   :  { %3374 = vmatprep.subr.bf16.mxu0 %v5876_v2  ;;  %3438 = vmatprep.subr.bf16.mxu1 %v5878_v19 }
 0x17a   :  { %3376 = vmatpush1.bf16.msra.mxu0 %v5882_v40  ;;  %3440 = vmatpush1.bf16.msra.mxu1 %v5884_v46 }
 0x17b   :  { %3378 = vmatprep.subr.bf16.mxu0 %v5888_v28  ;;  %3442 = vmatprep.subr.bf16.mxu1 %v5890_v23 }
 0x17e   :  { %3380 = vmatpush1.bf16.msra.mxu0 %v5894_v54  ;;  %3444 = vmatpush1.bf16.msra.mxu1 %v5896_v11 }
 0x17f   :  { %3446 = vmatprep.subr.bf16.mxu0 %v5457_v47  ;;  %3510 = vmatprep.subr.bf16.mxu1 %v5462_v56 }
 0x181   :  { %767 = vmatmul.mubr.f32.vlgmr.msra.gmra.mrb[6].mxu0 %v5714_v10  ;;  %838 = vmatmul.mubr.f32.vlgmr.msra.gmra.mrb[6].mxu1 %v5714_v10  ;;  %v5916_v10 = vpop.f32.mrb[2].mxu0 }
 0x182   :  { %3448 = vmatpush1.bf16.msra.mxu0 %v5459_v52  ;;  %3512 = vmatpush1.bf16.msra.mxu1 %v5465_v59  ;;  %7388 = vst [vmem:[#allocation148_spill] sm:$0xff] %v5916_v10  ;;  %v5922_v29 = vpop.f32.mrb[3].mxu0  ;;  %v7402_v10 = vld [vmem:[#allocation61_spill] sm:$0xff] }
 0x183   :  { %3450 = vmatprep.subr.bf16.mxu0 %v5467_v60  ;;  %3514 = vmatprep.subr.bf16.mxu1 %v5471_v63  ;;  %7390 = vst [vmem:[#allocation150_spill] sm:$0xff] %v5922_v29  ;;  %v7401_v29 = vld [vmem:[#allocation60_spill] sm:$0xff] }
 0x186   :  { %3452 = vmatpush1.bf16.msra.mxu0 %v5475_v3  ;;  %3516 = vmatpush1.bf16.msra.mxu1 %v5483_v9 }
 0x187   :  { %3454 = vmatprep.subr.bf16.mxu0 %v5479_v6  ;;  %3518 = vmatprep.subr.bf16.mxu1 %v5486_v12 }
 0x18a   :  { %3456 = vmatpush1.bf16.msra.mxu0 %v5490_v15  ;;  %3520 = vmatpush1.bf16.msra.mxu1 %v5497_v21 }
 0x18b   :  { %3458 = vmatprep.subr.bf16.mxu0 %v5494_v18  ;;  %3522 = vmatprep.subr.bf16.mxu1 %v5500_v24 }
 0x18e   :  { %3460 = vmatpush1.bf16.msra.mxu0 %v5503_v27  ;;  %3524 = vmatpush1.bf16.msra.mxu1 %v5509_v33 }
 0x18f   :  { %3462 = vmatprep.subr.bf16.mxu0 %v5506_v30  ;;  %3526 = vmatprep.subr.bf16.mxu1 %v5512_v36 }
 0x192   :  { %3464 = vmatpush1.bf16.msra.mxu0 %v5515_v39  ;;  %3528 = vmatpush1.bf16.msra.mxu1 %v5521_v45 }
 0x193   :  { %3466 = vmatprep.subr.bf16.mxu0 %v5518_v42  ;;  %3530 = vmatprep.subr.bf16.mxu1 %v5524_v49 }
 0x196   :  { %3468 = vmatpush1.bf16.msra.mxu0 %v5527_v53  ;;  %3532 = vmatpush1.bf16.msra.mxu1 %v5533_v62 }
 0x197   :  { %3470 = vmatprep.subr.bf16.mxu0 %v5530_v57  ;;  %3534 = vmatprep.subr.bf16.mxu1 %v5536_v4 }
 0x19a   :  { %3472 = vmatpush1.bf16.msra.mxu0 %v5539_v8  ;;  %3536 = vmatpush1.bf16.msra.mxu1 %v5545_v14 }
 0x19b   :  { %3474 = vmatprep.subr.bf16.mxu0 %v5542_v13  ;;  %3538 = vmatprep.subr.bf16.mxu1 %v5548_v16  ;;  %v7423_v16 = vld [vmem:[#allocation87_spill] sm:$0xff] }
 0x19e   :  { %3476 = vmatpush1.bf16.msra.mxu0 %v5554_v22  ;;  %3540 = vmatpush1.bf16.msra.mxu1 %v5556_v25 }
 0x19f   :  { %3478 = vmatprep.subr.bf16.mxu0 %v5560_v31  ;;  %3542 = vmatprep.subr.bf16.mxu1 %v5562_v35 }
 0x1a2   :  { %3480 = vmatpush1.bf16.msra.mxu0 %v5565_v41  ;;  %3544 = vmatpush1.bf16.msra.mxu1 %v5567_v43 }
 0x1a3   :  { %3482 = vmatprep.subr.bf16.mxu0 %v5572_v50  ;;  %3546 = vmatprep.subr.bf16.mxu1 %v5574_v58 }
 0x1a6   :  { %3484 = vmatpush1.bf16.msra.mxu0 %v5576_v61  ;;  %3548 = vmatpush1.bf16.msra.mxu1 %v7392_v7  ;;  %v7403_v7 = vld [vmem:[#allocation62_spill] sm:$0xff] }
 0x1a7   :  { %3486 = vmatprep.subr.bf16.mxu0 %v7393_v44  ;;  %3550 = vmatprep.subr.bf16.mxu1 %v7394_v48  ;;  %v7404_v44 = vld [vmem:[#allocation63_spill] sm:$0xff]  ;;  %v7405_v48 = vld [vmem:[#allocation64_spill] sm:$0xff] }
 0x1aa   :  { %3488 = vmatpush1.bf16.msra.mxu0 %v7395_v55  ;;  %3552 = vmatpush1.bf16.msra.mxu1 %v7396_v5  ;;  %v7406_v55 = vld [vmem:[#allocation65_spill] sm:$0xff]  ;;  %v7407_v5 = vld [vmem:[#allocation66_spill] sm:$0xff] }
 0x1ab   :  { %3490 = vmatprep.subr.bf16.mxu0 %v7397_v17  ;;  %3554 = vmatprep.subr.bf16.mxu1 %v7398_v26  ;;  %v7408_v17 = vld [vmem:[#allocation67_spill] sm:$0xff]  ;;  %v7409_v26 = vld [vmem:[#allocation68_spill] sm:$0xff] }
 0x1ae   :  { %3492 = vmatpush1.bf16.msra.mxu0 %v7399_v1  ;;  %3556 = vmatpush1.bf16.msra.mxu1 %v7400_v38  ;;  %v7410_v1 = vld [vmem:[#allocation69_spill] sm:$0xff]  ;;  %v7411_v38 = vld [vmem:[#allocation70_spill] sm:$0xff] }
 0x1af   :  { %3494 = vmatprep.subr.bf16.mxu0 %v7401_v29  ;;  %3558 = vmatprep.subr.bf16.mxu1 %v7402_v10  ;;  %v7412_v29 = vld [vmem:[#allocation71_spill] sm:$0xff]  ;;  %v7413_v10 = vld [vmem:[#allocation72_spill] sm:$0xff] }
 0x1b2   :  { %3496 = vmatpush1.bf16.msra.mxu0 %v7403_v7  ;;  %3560 = vmatpush1.bf16.msra.mxu1 %v7404_v44  ;;  %v7414_v7 = vld [vmem:[#allocation73_spill] sm:$0xff]  ;;  %v7415_v44 = vld [vmem:[#allocation74_spill] sm:$0xff] }
 0x1b3   :  { %3498 = vmatprep.subr.bf16.mxu0 %v7405_v48  ;;  %3562 = vmatprep.subr.bf16.mxu1 %v7406_v55  ;;  %v7416_v48 = vld [vmem:[#allocation75_spill] sm:$0xff]  ;;  %v7417_v55 = vld [vmem:[#allocation76_spill] sm:$0xff] }
 0x1b6   :  { %3500 = vmatpush1.bf16.msra.mxu0 %v7407_v5  ;;  %3564 = vmatpush1.bf16.msra.mxu1 %v7408_v17  ;;  %v7418_v5 = vld [vmem:[#allocation77_spill] sm:$0xff] }
 0x1b7   :  { %3502 = vmatprep.subr.bf16.mxu0 %v7409_v26  ;;  %3566 = vmatprep.subr.bf16.mxu1 %v7410_v1 }
 0x1ba   :  { %3504 = vmatpush1.bf16.msra.mxu0 %v7411_v38  ;;  %3568 = vmatpush1.bf16.msra.mxu1 %v7412_v29  ;;  %v7419_v29 = vld [vmem:[#allocation82_spill] sm:$0xff] }
 0x1bb   :  { %3506 = vmatprep.subr.bf16.mxu0 %v7413_v10  ;;  %3570 = vmatprep.subr.bf16.mxu1 %v7414_v7  ;;  %v7420_v10 = vld [vmem:[#allocation83_spill] sm:$0xff]  ;;  %v7421_v7 = vld [vmem:[#allocation84_spill] sm:$0xff] }
 0x1be   :  { %3508 = vmatpush1.bf16.msra.mxu0 %v7415_v44  ;;  %3572 = vmatpush1.bf16.msra.mxu1 %v7416_v48 }
 0x1bf   :  { %3574 = vmatprep.subr.bf16.mxu0 %v7417_v55  ;;  %3638 = vmatprep.subr.bf16.mxu1 %v7418_v5  ;;  %v7422_v55 = vld [vmem:[#allocation86_spill] sm:$0xff] }
 0x214   :  { %v626_v17 = vpop.f32.mrb[4].mxu0  ;;  %v697_v26 = vpop.f32.mrb[4].mxu1 }
 0x215   :  { %v848_v61 = vrot.slane %v626_v17, 6  ;;  %v850_v1 = vrot.slane %v697_v26, 6  ;;  %v628_v58 = vpop.f32.mrb[5].mxu0  ;;  %v699_v38 = vpop.f32.mrb[5].mxu1 }
 0x216   :  { %v849_v50 = vrot.slane %v628_v58, 6  ;;  %v851_v48 = vrot.slane %v699_v38, 6 }
 0x217   :  { %v856_v43 = vadd.f32 %v848_v61, %v7419_v29  ;;  %v858_v44 = vadd.f32 %v850_v1, %v7421_v7  ;;  %v871_v61 = vrot.slane %v7423_v16, 6 }
 0x218   :  { %v857_v41 = vadd.f32 %v849_v50, %v7420_v10  ;;  %v859_v35 = vadd.f32 %v851_v48, %v7422_v55 }
 0x219   :  { %5130 = vtanh.f32 %v856_v43 }
 0x21a   :  { %5132 = vtanh.f32 %v857_v41 }
 0x21b   :  { %5134 = vtanh.f32 %v858_v44 }
 0x21c   :  { %5136 = vtanh.f32 %v859_v35 }
 0x223   :  { %v5131_v5 = vpop.eup %5130 }
 0x224   :  { %v864_v31 = vmul.f32 0.5, %v5131_v5  ;;  %v5133_v25 = vpop.eup %5132 }
 0x225   :  { %v866_v26 = vmul.f32 0.5, %v5133_v25  ;;  %v5135_v22 = vpop.eup %5134  ;;  %v544_v25 = vld [vmem:[%s6943_s4] sm:$0xf]  ;;  %s5384_s4 = smov [#allocation8]  }
 0x226   :  { %v865_v17 = vadd.f32 0.5, %v864_v31  ;;  %v5137_v41 = vpop.eup %5136  ;;  %v7425_v31 = vld [vmem:[#allocation78_spill] sm:$0xff]  ;;  %s3144_s10 = sshll.u32 %s5384_s4, 4  ;;  %s3145_s10 = int_to_ptr.vmem [resolvable:$true] %s3144_s10 }
 0x227   :  { %v867_v58 = vadd.f32 0.5, %v866_v26  ;;  %v868_v38 = vmul.f32 0.5, %v5137_v41  ;;  %v7426_v35 = vsub.s32 0, %v7425_v31  ;;  %v7428_v16 = vsub.s32 1, %v7425_v31  ;;  %s5346_s11 = scalar_lea.vmem %s3145_s10, 256  ;;  %p5351_p11 = scmp.lt.s32.totalorder %s3145_s10, %s3145_s10 }
 0x228   :  { %v874_v29 = vmul.f32 %v5135_v22, %v865_v17  ;;  %p5347_p10 = scmp.ne.s32.totalorder %s3145_s10, %s5346_s11  ;;  %p5352_p12 = scmp.lt.s32.totalorder %s5346_s11, %s5346_s11 }
 0x229   :  { %v873_v50 = vmul.f32 %v871_v61, %v867_v58  ;;  %v869_v1 = vadd.f32 0.5, %v868_v38  ;;  %v5991_v5 = vrot.slane %v544_v25, %v7426_v35  ;;  %v5995_v22 = vrot.slane %v544_v25, %v7428_v16 }
 0x22a   :  { %p5353_p13 = por %p5352_p12, %p5351_p11 }
 0x22b   :  { %v5983_v43 = vadd.f32 %v874_v29, %v873_v50  ;;  %7427 = vst [vmem:[#allocation78_spill] sm:$0xff] %v5991_v5  ;;  %7429 = vst [vmem:[#allocation152_spill] sm:$0xff] %v5995_v22  ;;  %v7430_v29 = vsub.s32 2, %v7425_v31 }
 0x22c   :  { %p5354_p0 = pnand %p5353_p13, %p5347_p10 }
 0x22d   :  { %7424 = vst [vmem:[#allocation87_spill] sm:$0xff] %v5983_v43  ;;  %5138 = vtanh.f32 %v5983_v43  ;;  %v5999_v17 = vrot.slane %v544_v25, %v7430_v29 }
 0x22f   :  { %7431 = vst [vmem:[#allocation153_spill] sm:$0xff] %v5999_v17 }
 0x237   :  { %v5139_v44 = vpop.eup %5138 }
 0x238   :  { %v877_v48 = vmul.f32 %v5139_v44, %v869_v1  ;;  %v7432_v44 = vsub.s32 3, %v7425_v31 }
 0x23a   :  { %v6006_v35 = vrot.slane %v544_v25, %v7432_v44 }
 0x23c   :  { %7433 = vst [vmem:[#allocation154_spill] sm:$0xff] %v6006_v35 }
 0x254   :  { %v768_v26 = vpop.f32.mrb[6].mxu0  ;;  %v839_v58 = vpop.f32.mrb[6].mxu1 }
 0x255   :  { %v899_v61 = vadd.f32 %v5991_v5, %v768_v26  ;;  %v770_v50 = vpop.f32.mrb[7].mxu0  ;;  %v841_v41 = vpop.f32.mrb[7].mxu1  ;;  %v901_v1 = vadd.f32 %v5999_v17, %v839_v58 }
 0x256   :  { %v900_v38 = vadd.f32 %v5995_v22, %v770_v50  ;;  %v902_v16 = vadd.f32 %v6006_v35, %v841_v41 }
 0x257   :  { %5140 = vtanh.f32 %v899_v61 }
 0x258   :  { %5142 = vtanh.f32 %v900_v38 }
 0x259   :  { %5144 = vtanh.f32 %v901_v1 }
 0x25a   :  { %5146 = vtanh.f32 %v902_v16  ;;  %v7440_v16 = vld [vmem:[#allocation94_spill] sm:$0xff] }
 0x261   :  { %v5141_v29 = vpop.eup %5140 }
 0x262   :  { %v907_v43 = vmul.f32 0.5, %v5141_v29  ;;  %v5143_v55 = vpop.eup %5142  ;;  %v6012_v29 = vrot.slane %v877_v48, 2  ;;  %v7438_v48 = vld [vmem:[#allocation92_spill] sm:$0xff] }
 0x263   :  { %v909_v26 = vmul.f32 0.5, %v5143_v55  ;;  %v5145_v5 = vpop.eup %5144  ;;  %v7436_v55 = vld [vmem:[#allocation90_spill] sm:$0xff] }
 0x264   :  { %v908_v7 = vadd.f32 0.5, %v907_v43  ;;  %v5147_v58 = vpop.eup %5146  ;;  %v7437_v43 = vld [vmem:[#allocation91_spill] sm:$0xff] }
 0x265   :  { %v910_v10 = vadd.f32 0.5, %v909_v26  ;;  %v911_v31 = vmul.f32 0.5, %v5147_v58  ;;  %v7441_v26 = vld [vmem:[#allocation95_spill] sm:$0xff]  ;;  %v7444_v58 = vld [vmem:[#allocation98_spill] sm:$0xff] }
 0x266   :  { %v914_v50 = vmul.f32 %v5145_v5, %v908_v7  ;;  %v7435_v7 = vld [vmem:[#allocation89_spill] sm:$0xff] }
 0x267   :  { %v913_v61 = vmul.f32 0.0, %v910_v10  ;;  %v912_v25 = vadd.f32 0.5, %v911_v31  ;;  %v7434_v10 = vld [vmem:[#allocation88_spill] sm:$0xff]  ;;  %v7439_v5 = vld [vmem:[#allocation93_spill] sm:$0xff]  ;;  %v7445_v31 = vld [vmem:[#allocation99_spill] sm:$0xff] }
 0x269   :  { %v6009_v22 = vadd.f32 %v914_v50, %v913_v61  ;;  %v7442_v50 = vld [vmem:[#allocation96_spill] sm:$0xff]  ;;  %v7443_v61 = vld [vmem:[#allocation97_spill] sm:$0xff] }
 0x26b   :  { %5148 = vtanh.f32 %v6009_v22 }
 0x275   :  { %v5149_v38 = vpop.eup %5148 }
 0x276   :  { %v917_v1 = vmul.f32 %v5149_v38, %v912_v25  ;;  %v7446_v25 = vld [vmem:[#allocation100_spill] sm:$0xff]  ;;  %v7447_v38 = vld [vmem:[#allocation101_spill] sm:$0xff] }
 0x278   :  { %918 = vst [vmem:[#allocation8] sm:$0x3] %v917_v1  ;;  %v920_v41 = vrot.slane %v917_v1, 6  ;;  %v7448_v1 = vld [vmem:[#allocation102_spill] sm:$0xff] }
 0x27a   :  { %v923_v44 = vrot.slane %v920_v41, 2  ;;  %v7449_v41 = vld [vmem:[#allocation103_spill] sm:$0xff] }
 0x27c   :  { %990 = vmatprep.mubr.f32.mxu0 %v923_v44  ;;  %1061 = vmatprep.mubr.f32.mxu1 %v923_v44 }
 0x27d   :  { %991 = vmatmul.mubr.f32.vlgmr.msra.gmra.mrb[8].mxu0 %v6012_v29  ;;  %1062 = vmatmul.mubr.f32.vlgmr.msra.gmra.mrb[8].mxu1 %v6012_v29 }
 0x27e   :  { %3576 = vmatpush1.bf16.msra.mxu0 %v5710_v20  ;;  %3640 = vmatpush1.bf16.msra.mxu1 %v7434_v10 }
 0x27f   :  { %1132 = vmatprep.mubr.f32.mxu0 %v923_v44  ;;  %1203 = vmatprep.mubr.f32.mxu1 %v923_v44  ;;  %v7450_v44 = vld [vmem:[#allocation104_spill] sm:$0xff] }
 0x280   :  { %3578 = vmatprep.subr.bf16.mxu0 %v5716_v37  ;;  %3642 = vmatprep.subr.bf16.mxu1 %v7435_v7 }
 0x282   :  { %3580 = vmatpush1.bf16.msra.mxu0 %v7436_v55  ;;  %3644 = vmatpush1.bf16.msra.mxu1 %v7437_v43 }
 0x283   :  { %3582 = vmatprep.subr.bf16.mxu0 %v7438_v48  ;;  %3646 = vmatprep.subr.bf16.mxu1 %v7439_v5 }
 0x286   :  { %3584 = vmatpush1.bf16.msra.mxu0 %v7440_v16  ;;  %3648 = vmatpush1.bf16.msra.mxu1 %v7441_v26  ;;  %v7451_v16 = vld [vmem:[#allocation105_spill] sm:$0xff]  ;;  %v7452_v26 = vld [vmem:[#allocation106_spill] sm:$0xff] }
 0x287   :  { %3586 = vmatprep.subr.bf16.mxu0 %v7442_v50  ;;  %3650 = vmatprep.subr.bf16.mxu1 %v7443_v61  ;;  %v7453_v50 = vld [vmem:[#allocation107_spill] sm:$0xff]  ;;  %v7454_v61 = vld [vmem:[#allocation108_spill] sm:$0xff] }
 0x28a   :  { %3588 = vmatpush1.bf16.msra.mxu0 %v7444_v58  ;;  %3652 = vmatpush1.bf16.msra.mxu1 %v7445_v31  ;;  %v7455_v58 = vld [vmem:[#allocation109_spill] sm:$0xff]  ;;  %v7456_v31 = vld [vmem:[#allocation110_spill] sm:$0xff] }
 0x28b   :  { %3590 = vmatprep.subr.bf16.mxu0 %v7446_v25  ;;  %3654 = vmatprep.subr.bf16.mxu1 %v7447_v38  ;;  %v7457_v25 = vld [vmem:[#allocation111_spill] sm:$0xff]  ;;  %v7458_v38 = vld [vmem:[#allocation112_spill] sm:$0xff] }
 0x28e   :  { %3592 = vmatpush1.bf16.msra.mxu0 %v7448_v1  ;;  %3656 = vmatpush1.bf16.msra.mxu1 %v7449_v41  ;;  %v7459_v1 = vld [vmem:[#allocation113_spill] sm:$0xff]  ;;  %v7460_v41 = vld [vmem:[#allocation114_spill] sm:$0xff] }
 0x28f   :  { %3594 = vmatprep.subr.bf16.mxu0 %v7450_v44  ;;  %3658 = vmatprep.subr.bf16.mxu1 %v7451_v16  ;;  %v7461_v44 = vld [vmem:[#allocation115_spill] sm:$0xff]  ;;  %v7462_v16 = vld [vmem:[#allocation116_spill] sm:$0xff] }
 0x292   :  { %3596 = vmatpush1.bf16.msra.mxu0 %v7452_v26  ;;  %3660 = vmatpush1.bf16.msra.mxu1 %v7453_v50  ;;  %v7463_v26 = vld [vmem:[#allocation117_spill] sm:$0xff]  ;;  %v7464_v50 = vld [vmem:[#allocation118_spill] sm:$0xff] }
 0x293   :  { %3598 = vmatprep.subr.bf16.mxu0 %v7454_v61  ;;  %3662 = vmatprep.subr.bf16.mxu1 %v7455_v58  ;;  %v7465_v61 = vld [vmem:[#allocation119_spill] sm:$0xff]  ;;  %v7466_v58 = vld [vmem:[#allocation120_spill] sm:$0xff] }
 0x296   :  { %3600 = vmatpush1.bf16.msra.mxu0 %v7456_v31  ;;  %3664 = vmatpush1.bf16.msra.mxu1 %v7457_v25  ;;  %v7467_v31 = vld [vmem:[#allocation121_spill] sm:$0xff]  ;;  %v7468_v25 = vld [vmem:[#allocation122_spill] sm:$0xff] }
 0x297   :  { %3602 = vmatprep.subr.bf16.mxu0 %v7458_v38  ;;  %3666 = vmatprep.subr.bf16.mxu1 %v7459_v1  ;;  %v7469_v38 = vld [vmem:[#allocation123_spill] sm:$0xff]  ;;  %v7470_v1 = vld [vmem:[#allocation124_spill] sm:$0xff] }
 0x29a   :  { %3604 = vmatpush1.bf16.msra.mxu0 %v7460_v41  ;;  %3668 = vmatpush1.bf16.msra.mxu1 %v7461_v44  ;;  %v7471_v41 = vld [vmem:[#allocation125_spill] sm:$0xff]  ;;  %v7472_v44 = vld [vmem:[#allocation126_spill] sm:$0xff] }
 0x29b   :  { %3606 = vmatprep.subr.bf16.mxu0 %v7462_v16  ;;  %3670 = vmatprep.subr.bf16.mxu1 %v7463_v26  ;;  %v7473_v16 = vld [vmem:[#allocation127_spill] sm:$0xff]  ;;  %v7474_v26 = vld [vmem:[#allocation128_spill] sm:$0xff] }
 0x29e   :  { %3608 = vmatpush1.bf16.msra.mxu0 %v7464_v50  ;;  %3672 = vmatpush1.bf16.msra.mxu1 %v7465_v61  ;;  %v7475_v50 = vld [vmem:[#allocation129_spill] sm:$0xff]  ;;  %v7476_v61 = vld [vmem:[#allocation130_spill] sm:$0xff] }
 0x29f   :  { %3610 = vmatprep.subr.bf16.mxu0 %v7466_v58  ;;  %3674 = vmatprep.subr.bf16.mxu1 %v7467_v31  ;;  %v7477_v58 = vld [vmem:[#allocation131_spill] sm:$0xff]  ;;  %v7478_v31 = vld [vmem:[#allocation132_spill] sm:$0xff] }
 0x2a2   :  { %3612 = vmatpush1.bf16.msra.mxu0 %v7468_v25  ;;  %3676 = vmatpush1.bf16.msra.mxu1 %v7469_v38  ;;  %v7479_v25 = vld [vmem:[#allocation133_spill] sm:$0xff]  ;;  %v7480_v38 = vld [vmem:[#allocation134_spill] sm:$0xff] }
 0x2a3   :  { %3614 = vmatprep.subr.bf16.mxu0 %v7470_v1  ;;  %3678 = vmatprep.subr.bf16.mxu1 %v7471_v41  ;;  %v7481_v1 = vld [vmem:[#allocation135_spill] sm:$0xff] }
 0x2a6   :  { %3616 = vmatpush1.bf16.msra.mxu0 %v7472_v44  ;;  %3680 = vmatpush1.bf16.msra.mxu1 %v7473_v16 }
 0x2a7   :  { %3618 = vmatprep.subr.bf16.mxu0 %v7474_v26  ;;  %3682 = vmatprep.subr.bf16.mxu1 %v7475_v50 }
 0x2aa   :  { %3620 = vmatpush1.bf16.msra.mxu0 %v7476_v61  ;;  %3684 = vmatpush1.bf16.msra.mxu1 %v7477_v58 }
 0x2ab   :  { %3622 = vmatprep.subr.bf16.mxu0 %v7478_v31  ;;  %3686 = vmatprep.subr.bf16.mxu1 %v7479_v25 }
 0x2ae   :  { %3624 = vmatpush1.bf16.msra.mxu0 %v7480_v38  ;;  %3688 = vmatpush1.bf16.msra.mxu1 %v7481_v1 }
 0x2af   :  { %3626 = vmatprep.subr.bf16.mxu0 %v5864_v32  ;;  %3690 = vmatprep.subr.bf16.mxu1 %v5866_v34 }
 0x2b2   :  { %3628 = vmatpush1.bf16.msra.mxu0 %v5870_v0  ;;  %3692 = vmatpush1.bf16.msra.mxu1 %v5872_v51 }
 0x2b3   :  { %3630 = vmatprep.subr.bf16.mxu0 %v5876_v2  ;;  %3694 = vmatprep.subr.bf16.mxu1 %v5878_v19 }
 0x2b6   :  { %3632 = vmatpush1.bf16.msra.mxu0 %v5882_v40  ;;  %3696 = vmatpush1.bf16.msra.mxu1 %v5884_v46 }
 0x2b7   :  { %3634 = vmatprep.subr.bf16.mxu0 %v5888_v28  ;;  %3698 = vmatprep.subr.bf16.mxu1 %v5890_v23 }
 0x2ba   :  { %3636 = vmatpush1.bf16.msra.mxu0 %v5894_v54  ;;  %3700 = vmatpush1.bf16.msra.mxu1 %v5896_v11 }
 0x2bb   :  { %3702 = vmatprep.subr.bf16.mxu0 %v5457_v47  ;;  %3766 = vmatprep.subr.bf16.mxu1 %v5462_v56 }
 0x2bd   :  { %1133 = vmatmul.mubr.f32.vlgmr.msra.gmra.mrb[10].mxu0 %v6012_v29  ;;  %1204 = vmatmul.mubr.f32.vlgmr.msra.gmra.mrb[10].mxu1 %v6012_v29  ;;  %v7482_v29 = vld [vmem:[#allocation41_spill] sm:$0xff] }
 0x2be   :  { %3704 = vmatpush1.bf16.msra.mxu0 %v5459_v52  ;;  %3768 = vmatpush1.bf16.msra.mxu1 %v5465_v59 }
 0x2bf   :  { %3706 = vmatprep.subr.bf16.mxu0 %v5467_v60  ;;  %3770 = vmatprep.subr.bf16.mxu1 %v5471_v63 }
 0x2c2   :  { %3708 = vmatpush1.bf16.msra.mxu0 %v5475_v3  ;;  %3772 = vmatpush1.bf16.msra.mxu1 %v5483_v9 }
 0x2c3   :  { %3710 = vmatprep.subr.bf16.mxu0 %v5479_v6  ;;  %3774 = vmatprep.subr.bf16.mxu1 %v5486_v12  ;;  %v7523_v12 = vld [vmem:[#allocation87_spill] sm:$0xff] }
 0x2c6   :  { %3712 = vmatpush1.bf16.msra.mxu0 %v5490_v15  ;;  %3776 = vmatpush1.bf16.msra.mxu1 %v5497_v21 }
 0x2c7   :  { %3714 = vmatprep.subr.bf16.mxu0 %v5494_v18  ;;  %3778 = vmatprep.subr.bf16.mxu1 %v5500_v24 }
 0x2ca   :  { %3716 = vmatpush1.bf16.msra.mxu0 %v5503_v27  ;;  %3780 = vmatpush1.bf16.msra.mxu1 %v5509_v33 }
 0x2cb   :  { %3718 = vmatprep.subr.bf16.mxu0 %v5506_v30  ;;  %3782 = vmatprep.subr.bf16.mxu1 %v5512_v36 }
 0x2ce   :  { %3720 = vmatpush1.bf16.msra.mxu0 %v5515_v39  ;;  %3784 = vmatpush1.bf16.msra.mxu1 %v5521_v45  ;;  %v7483_v45 = vld [vmem:[#allocation42_spill] sm:$0xff] }
 0x2cf   :  { %3722 = vmatprep.subr.bf16.mxu0 %v5518_v42  ;;  %3786 = vmatprep.subr.bf16.mxu1 %v5524_v49  ;;  %v7484_v42 = vld [vmem:[#allocation43_spill] sm:$0xff]  ;;  %v7485_v49 = vld [vmem:[#allocation44_spill] sm:$0xff] }
 0x2d2   :  { %3724 = vmatpush1.bf16.msra.mxu0 %v5527_v53  ;;  %3788 = vmatpush1.bf16.msra.mxu1 %v5533_v62  ;;  %v7486_v53 = vld [vmem:[#allocation45_spill] sm:$0xff]  ;;  %v7487_v62 = vld [vmem:[#allocation46_spill] sm:$0xff] }
 0x2d3   :  { %3726 = vmatprep.subr.bf16.mxu0 %v5530_v57  ;;  %3790 = vmatprep.subr.bf16.mxu1 %v5536_v4  ;;  %v7488_v57 = vld [vmem:[#allocation47_spill] sm:$0xff]  ;;  %v7489_v4 = vld [vmem:[#allocation48_spill] sm:$0xff] }
 0x2d6   :  { %3728 = vmatpush1.bf16.msra.mxu0 %v5539_v8  ;;  %3792 = vmatpush1.bf16.msra.mxu1 %v5545_v14  ;;  %v7490_v8 = vld [vmem:[#allocation49_spill] sm:$0xff]  ;;  %v7491_v14 = vld [vmem:[#allocation50_spill] sm:$0xff] }
 0x2d7   :  { %3730 = vmatprep.subr.bf16.mxu0 %v5542_v13  ;;  %3794 = vmatprep.subr.bf16.mxu1 %v7482_v29  ;;  %v7492_v13 = vld [vmem:[#allocation51_spill] sm:$0xff]  ;;  %v7493_v29 = vld [vmem:[#allocation52_spill] sm:$0xff] }
 0x2da   :  { %3732 = vmatpush1.bf16.msra.mxu0 %v7483_v45  ;;  %3796 = vmatpush1.bf16.msra.mxu1 %v7484_v42  ;;  %v7494_v45 = vld [vmem:[#allocation53_spill] sm:$0xff]  ;;  %v7495_v42 = vld [vmem:[#allocation54_spill] sm:$0xff] }
 0x2db   :  { %3734 = vmatprep.subr.bf16.mxu0 %v7485_v49  ;;  %3798 = vmatprep.subr.bf16.mxu1 %v7486_v53  ;;  %v7496_v49 = vld [vmem:[#allocation55_spill] sm:$0xff]  ;;  %v7497_v53 = vld [vmem:[#allocation56_spill] sm:$0xff] }
 0x2de   :  { %3736 = vmatpush1.bf16.msra.mxu0 %v7487_v62  ;;  %3800 = vmatpush1.bf16.msra.mxu1 %v7488_v57  ;;  %v7498_v62 = vld [vmem:[#allocation57_spill] sm:$0xff]  ;;  %v7499_v57 = vld [vmem:[#allocation58_spill] sm:$0xff] }
 0x2df   :  { %3738 = vmatprep.subr.bf16.mxu0 %v7489_v4  ;;  %3802 = vmatprep.subr.bf16.mxu1 %v7490_v8  ;;  %v7500_v4 = vld [vmem:[#allocation59_spill] sm:$0xff]  ;;  %v7501_v8 = vld [vmem:[#allocation60_spill] sm:$0xff] }
 0x2e2   :  { %3740 = vmatpush1.bf16.msra.mxu0 %v7491_v14  ;;  %3804 = vmatpush1.bf16.msra.mxu1 %v7492_v13  ;;  %v7502_v14 = vld [vmem:[#allocation61_spill] sm:$0xff]  ;;  %v7503_v13 = vld [vmem:[#allocation62_spill] sm:$0xff] }
 0x2e3   :  { %3742 = vmatprep.subr.bf16.mxu0 %v7493_v29  ;;  %3806 = vmatprep.subr.bf16.mxu1 %v7494_v45  ;;  %v7504_v29 = vld [vmem:[#allocation63_spill] sm:$0xff]  ;;  %v7505_v45 = vld [vmem:[#allocation64_spill] sm:$0xff] }
 0x2e6   :  { %3744 = vmatpush1.bf16.msra.mxu0 %v7495_v42  ;;  %3808 = vmatpush1.bf16.msra.mxu1 %v7496_v49  ;;  %v7506_v42 = vld [vmem:[#allocation65_spill] sm:$0xff]  ;;  %v7507_v49 = vld [vmem:[#allocation66_spill] sm:$0xff] }
 0x2e7   :  { %3746 = vmatprep.subr.bf16.mxu0 %v7497_v53  ;;  %3810 = vmatprep.subr.bf16.mxu1 %v7498_v62  ;;  %v7508_v53 = vld [vmem:[#allocation67_spill] sm:$0xff]  ;;  %v7509_v62 = vld [vmem:[#allocation68_spill] sm:$0xff] }
 0x2ea   :  { %3748 = vmatpush1.bf16.msra.mxu0 %v7499_v57  ;;  %3812 = vmatpush1.bf16.msra.mxu1 %v7500_v4  ;;  %v7510_v57 = vld [vmem:[#allocation69_spill] sm:$0xff]  ;;  %v7511_v4 = vld [vmem:[#allocation70_spill] sm:$0xff] }
 0x2eb   :  { %3750 = vmatprep.subr.bf16.mxu0 %v7501_v8  ;;  %3814 = vmatprep.subr.bf16.mxu1 %v7502_v14  ;;  %v7512_v8 = vld [vmem:[#allocation71_spill] sm:$0xff]  ;;  %v7513_v14 = vld [vmem:[#allocation72_spill] sm:$0xff] }
 0x2ee   :  { %3752 = vmatpush1.bf16.msra.mxu0 %v7503_v13  ;;  %3816 = vmatpush1.bf16.msra.mxu1 %v7504_v29  ;;  %v7514_v13 = vld [vmem:[#allocation73_spill] sm:$0xff]  ;;  %v7515_v29 = vld [vmem:[#allocation74_spill] sm:$0xff] }
 0x2ef   :  { %3754 = vmatprep.subr.bf16.mxu0 %v7505_v45  ;;  %3818 = vmatprep.subr.bf16.mxu1 %v7506_v42  ;;  %v7516_v45 = vld [vmem:[#allocation75_spill] sm:$0xff]  ;;  %v7517_v42 = vld [vmem:[#allocation76_spill] sm:$0xff] }
 0x2f2   :  { %3756 = vmatpush1.bf16.msra.mxu0 %v7507_v49  ;;  %3820 = vmatpush1.bf16.msra.mxu1 %v7508_v53  ;;  %v7518_v49 = vld [vmem:[#allocation77_spill] sm:$0xff] }
 0x2f3   :  { %3758 = vmatprep.subr.bf16.mxu0 %v7509_v62  ;;  %3822 = vmatprep.subr.bf16.mxu1 %v7510_v57 }
 0x2f6   :  { %3760 = vmatpush1.bf16.msra.mxu0 %v7511_v4  ;;  %3824 = vmatpush1.bf16.msra.mxu1 %v7512_v8  ;;  %v7519_v8 = vld [vmem:[#allocation82_spill] sm:$0xff] }
 0x2f7   :  { %3762 = vmatprep.subr.bf16.mxu0 %v7513_v14  ;;  %3826 = vmatprep.subr.bf16.mxu1 %v7514_v13  ;;  %v7520_v14 = vld [vmem:[#allocation83_spill] sm:$0xff]  ;;  %v7521_v13 = vld [vmem:[#allocation84_spill] sm:$0xff] }
 0x2fa   :  { %3764 = vmatpush1.bf16.msra.mxu0 %v7515_v29  ;;  %3828 = vmatpush1.bf16.msra.mxu1 %v7516_v45 }
 0x2fb   :  { %3830 = vmatprep.subr.bf16.mxu0 %v7517_v42  ;;  %3894 = vmatprep.subr.bf16.mxu1 %v7518_v49  ;;  %v7522_v42 = vld [vmem:[#allocation86_spill] sm:$0xff] }
 0x350   :  { %v992_v53 = vpop.f32.mrb[8].mxu0  ;;  %v1063_v62 = vpop.f32.mrb[8].mxu1 }
 0x351   :  { %v1214_v39 = vrot.slane %v992_v53, 4  ;;  %v1216_v57 = vrot.slane %v1063_v62, 4  ;;  %v994_v36 = vpop.f32.mrb[9].mxu0  ;;  %v1065_v4 = vpop.f32.mrb[9].mxu1 }
 0x352   :  { %v1215_v30 = vrot.slane %v994_v36, 4  ;;  %v1217_v45 = vrot.slane %v1065_v4, 4 }
 0x353   :  { %v1222_v33 = vadd.f32 %v1214_v39, %v7519_v8  ;;  %v1224_v29 = vadd.f32 %v1216_v57, %v7521_v13  ;;  %v1237_v39 = vrot.slane %v7523_v12, 6 }
 0x354   :  { %v1223_v27 = vadd.f32 %v1215_v30, %v7520_v14  ;;  %v1225_v24 = vadd.f32 %v1217_v45, %v7522_v42 }
 0x355   :  { %5150 = vtanh.f32 %v1222_v33 }
 0x356   :  { %5152 = vtanh.f32 %v1223_v27 }
 0x357   :  { %5154 = vtanh.f32 %v1224_v29 }
 0x358   :  { %5156 = vtanh.f32 %v1225_v24 }
 0x35f   :  { %v5151_v49 = vpop.eup %5150 }
 0x360   :  { %v1230_v18 = vmul.f32 0.5, %v5151_v49  ;;  %v5153_v21 = vpop.eup %5152 }
 0x361   :  { %v1232_v62 = vmul.f32 0.5, %v5153_v21  ;;  %v5155_v15 = vpop.eup %5154 }
 0x362   :  { %v1231_v53 = vadd.f32 0.5, %v1230_v18  ;;  %v5157_v27 = vpop.eup %5156  ;;  %v7524_v18 = vld [vmem:[#allocation78_spill] sm:$0xff] }
 0x363   :  { %v1233_v36 = vadd.f32 0.5, %v1232_v62  ;;  %v1234_v57 = vmul.f32 0.5, %v5157_v27  ;;  %v7525_v62 = vld [vmem:[#allocation152_spill] sm:$0xff] }
 0x364   :  { %v1240_v8 = vmul.f32 %v5155_v15, %v1231_v53 }
 0x365   :  { %v1239_v30 = vmul.f32 %v1237_v39, %v1233_v36  ;;  %v1235_v4 = vadd.f32 0.5, %v1234_v57 }
 0x367   :  { %v6151_v33 = vadd.f32 %v1240_v8, %v1239_v30 }
 0x369   :  { %5158 = vtanh.f32 %v6151_v33 }
 0x373   :  { %v5159_v45 = vpop.eup %5158 }
 0x374   :  { %v1243_v29 = vmul.f32 %v5159_v45, %v1235_v4 }
 0x390   :  { %v1134_v49 = vpop.f32.mrb[10].mxu0  ;;  %v1205_v42 = vpop.f32.mrb[10].mxu1 }
 0x391   :  { %v1244_v21 = vadd.f32 %v1134_v49, %v7524_v18  ;;  %v1136_v24 = vpop.f32.mrb[11].mxu0  ;;  %v1207_v13 = vpop.f32.mrb[11].mxu1  ;;  %v1246_v12 = vadd.f32 %v1205_v42, %v5999_v17 }
 0x392   :  { %v1245_v14 = vadd.f32 %v1136_v24, %v7525_v62  ;;  %v1247_v15 = vadd.f32 %v1207_v13, %v6006_v35 }
 0x393   :  { %5160 = vtanh.f32 %v1244_v21 }
 0x394   :  { %5162 = vtanh.f32 %v1245_v14 }
 0x395   :  { %5164 = vtanh.f32 %v1246_v12 }
 0x396   :  { %5166 = vtanh.f32 %v1247_v15  ;;  %v7528_v15 = vld [vmem:[#allocation96_spill] sm:$0xff] }
 0x39d   :  { %v5161_v8 = vpop.eup %5160 }
 0x39e   :  { %v1252_v53 = vmul.f32 0.5, %v5161_v8  ;;  %v5163_v36 = vpop.eup %5162 }
 0x39f   :  { %v1254_v30 = vmul.f32 0.5, %v5163_v36  ;;  %v5165_v27 = vpop.eup %5164  ;;  %v7529_v36 = vld [vmem:[#allocation97_spill] sm:$0xff] }
 0x3a0   :  { %v1253_v39 = vadd.f32 0.5, %v1252_v53  ;;  %v5167_v42 = vpop.eup %5166  ;;  %v6162_v53 = vrot.slane %v1243_v29, 4  ;;  %v7527_v29 = vld [vmem:[#allocation95_spill] sm:$0xff] }
 0x3a1   :  { %v1255_v57 = vadd.f32 0.5, %v1254_v30  ;;  %v1256_v14 = vmul.f32 0.5, %v5167_v42  ;;  %v7531_v30 = vld [vmem:[#allocation99_spill] sm:$0xff]  ;;  %v7536_v42 = vld [vmem:[#allocation104_spill] sm:$0xff] }
 0x3a2   :  { %v1259_v4 = vmul.f32 %v5165_v27, %v1253_v39  ;;  %v7530_v39 = vld [vmem:[#allocation98_spill] sm:$0xff]  ;;  %v7532_v27 = vld [vmem:[#allocation100_spill] sm:$0xff] }
 0x3a3   :  { %v1258_v45 = vmul.f32 %v1255_v57, %v6009_v22  ;;  %v1257_v21 = vadd.f32 0.5, %v1256_v14  ;;  %v7526_v22 = vld [vmem:[#allocation94_spill] sm:$0xff]  ;;  %v7533_v57 = vld [vmem:[#allocation101_spill] sm:$0xff] }
 0x3a4   :  { %v7537_v14 = vld [vmem:[#allocation105_spill] sm:$0xff] }
 0x3a5   :  { %v6159_v49 = vadd.f32 %v1259_v4, %v1258_v45  ;;  %v7534_v4 = vld [vmem:[#allocation102_spill] sm:$0xff]  ;;  %v7535_v45 = vld [vmem:[#allocation103_spill] sm:$0xff] }
 0x3a7   :  { %5168 = vtanh.f32 %v6159_v49 }
 0x3b1   :  { %v5169_v24 = vpop.eup %5168 }
 0x3b2   :  { %v1262_v13 = vmul.f32 %v5169_v24, %v1257_v21  ;;  %v7538_v21 = vld [vmem:[#allocation106_spill] sm:$0xff]  ;;  %v7539_v24 = vld [vmem:[#allocation107_spill] sm:$0xff] }
 0x3b4   :  { %1263 = vst [vmem:[#allocation8 + $0x2] sm:$0x3] %v1262_v13  ;;  %v1265_v12 = vrot.slane %v1262_v13, 4  ;;  %v7540_v13 = vld [vmem:[#allocation108_spill] sm:$0xff] }
 0x3b6   :  { %v1268_v8 = vrot.slane %v1265_v12, 4  ;;  %v7541_v12 = vld [vmem:[#allocation109_spill] sm:$0xff] }
 0x3b8   :  { %1335 = vmatprep.mubr.f32.mxu0 %v1268_v8  ;;  %1406 = vmatprep.mubr.f32.mxu1 %v1268_v8 }
 0x3b9   :  { %1336 = vmatmul.mubr.f32.vlgmr.msra.gmra.mrb[12].mxu0 %v6162_v53  ;;  %1407 = vmatmul.mubr.f32.vlgmr.msra.gmra.mrb[12].mxu1 %v6162_v53 }
 0x3ba   :  { %3832 = vmatpush1.bf16.msra.mxu0 %v5710_v20  ;;  %3896 = vmatpush1.bf16.msra.mxu1 %v7434_v10 }
 0x3bb   :  { %1477 = vmatprep.mubr.f32.mxu0 %v1268_v8  ;;  %1548 = vmatprep.mubr.f32.mxu1 %v1268_v8  ;;  %v7542_v8 = vld [vmem:[#allocation110_spill] sm:$0xff] }
 0x3bc   :  { %3834 = vmatprep.subr.bf16.mxu0 %v5716_v37  ;;  %3898 = vmatprep.subr.bf16.mxu1 %v7435_v7 }
 0x3be   :  { %3836 = vmatpush1.bf16.msra.mxu0 %v7436_v55  ;;  %3900 = vmatpush1.bf16.msra.mxu1 %v7437_v43 }
 0x3bf   :  { %3838 = vmatprep.subr.bf16.mxu0 %v7438_v48  ;;  %3902 = vmatprep.subr.bf16.mxu1 %v7439_v5 }
 0x3c2   :  { %3840 = vmatpush1.bf16.msra.mxu0 %v7526_v22  ;;  %3904 = vmatpush1.bf16.msra.mxu1 %v7527_v29 }
 0x3c3   :  { %3842 = vmatprep.subr.bf16.mxu0 %v7528_v15  ;;  %3906 = vmatprep.subr.bf16.mxu1 %v7529_v36 }
 0x3c6   :  { %3844 = vmatpush1.bf16.msra.mxu0 %v7530_v39  ;;  %3908 = vmatpush1.bf16.msra.mxu1 %v7531_v30 }
 0x3c7   :  { %3846 = vmatprep.subr.bf16.mxu0 %v7532_v27  ;;  %3910 = vmatprep.subr.bf16.mxu1 %v7533_v57  ;;  %v7543_v27 = vld [vmem:[#allocation111_spill] sm:$0xff]  ;;  %v7544_v57 = vld [vmem:[#allocation112_spill] sm:$0xff] }
 0x3ca   :  { %3848 = vmatpush1.bf16.msra.mxu0 %v7534_v4  ;;  %3912 = vmatpush1.bf16.msra.mxu1 %v7535_v45  ;;  %v7545_v4 = vld [vmem:[#allocation113_spill] sm:$0xff]  ;;  %v7546_v45 = vld [vmem:[#allocation114_spill] sm:$0xff] }
 0x3cb   :  { %3850 = vmatprep.subr.bf16.mxu0 %v7536_v42  ;;  %3914 = vmatprep.subr.bf16.mxu1 %v7537_v14  ;;  %v7547_v42 = vld [vmem:[#allocation115_spill] sm:$0xff]  ;;  %v7548_v14 = vld [vmem:[#allocation116_spill] sm:$0xff] }
 0x3ce   :  { %3852 = vmatpush1.bf16.msra.mxu0 %v7538_v21  ;;  %3916 = vmatpush1.bf16.msra.mxu1 %v7539_v24  ;;  %v7549_v21 = vld [vmem:[#allocation117_spill] sm:$0xff]  ;;  %v7550_v24 = vld [vmem:[#allocation118_spill] sm:$0xff] }
 0x3cf   :  { %3854 = vmatprep.subr.bf16.mxu0 %v7540_v13  ;;  %3918 = vmatprep.subr.bf16.mxu1 %v7541_v12  ;;  %v7551_v13 = vld [vmem:[#allocation119_spill] sm:$0xff]  ;;  %v7552_v12 = vld [vmem:[#allocation120_spill] sm:$0xff] }
 0x3d2   :  { %3856 = vmatpush1.bf16.msra.mxu0 %v7542_v8  ;;  %3920 = vmatpush1.bf16.msra.mxu1 %v7543_v27  ;;  %v7553_v8 = vld [vmem:[#allocation121_spill] sm:$0xff]  ;;  %v7554_v27 = vld [vmem:[#allocation122_spill] sm:$0xff] }
 0x3d3   :  { %3858 = vmatprep.subr.bf16.mxu0 %v7544_v57  ;;  %3922 = vmatprep.subr.bf16.mxu1 %v7545_v4  ;;  %v7555_v57 = vld [vmem:[#allocation123_spill] sm:$0xff]  ;;  %v7556_v4 = vld [vmem:[#allocation124_spill] sm:$0xff] }
 0x3d6   :  { %3860 = vmatpush1.bf16.msra.mxu0 %v7546_v45  ;;  %3924 = vmatpush1.bf16.msra.mxu1 %v7547_v42 }
 0x3d7   :  { %3862 = vmatprep.subr.bf16.mxu0 %v7548_v14  ;;  %3926 = vmatprep.subr.bf16.mxu1 %v7549_v21 }
 0x3da   :  { %3864 = vmatpush1.bf16.msra.mxu0 %v7550_v24  ;;  %3928 = vmatpush1.bf16.msra.mxu1 %v7551_v13 }
 0x3db   :  { %3866 = vmatprep.subr.bf16.mxu0 %v7552_v12  ;;  %3930 = vmatprep.subr.bf16.mxu1 %v7553_v8 }
 0x3de   :  { %3868 = vmatpush1.bf16.msra.mxu0 %v7554_v27  ;;  %3932 = vmatpush1.bf16.msra.mxu1 %v7555_v57 }
 0x3df   :  { %3870 = vmatprep.subr.bf16.mxu0 %v7556_v4  ;;  %3934 = vmatprep.subr.bf16.mxu1 %v7471_v41 }
 0x3e2   :  { %3872 = vmatpush1.bf16.msra.mxu0 %v7472_v44  ;;  %3936 = vmatpush1.bf16.msra.mxu1 %v7473_v16 }
 0x3e3   :  { %3874 = vmatprep.subr.bf16.mxu0 %v7474_v26  ;;  %3938 = vmatprep.subr.bf16.mxu1 %v7475_v50 }
 0x3e6   :  { %3876 = vmatpush1.bf16.msra.mxu0 %v7476_v61  ;;  %3940 = vmatpush1.bf16.msra.mxu1 %v7477_v58 }
 0x3e7   :  { %3878 = vmatprep.subr.bf16.mxu0 %v7478_v31  ;;  %3942 = vmatprep.subr.bf16.mxu1 %v7479_v25 }
 0x3ea   :  { %3880 = vmatpush1.bf16.msra.mxu0 %v7480_v38  ;;  %3944 = vmatpush1.bf16.msra.mxu1 %v7481_v1 }
 0x3eb   :  { %3882 = vmatprep.subr.bf16.mxu0 %v5864_v32  ;;  %3946 = vmatprep.subr.bf16.mxu1 %v5866_v34 }
 0x3ee   :  { %3884 = vmatpush1.bf16.msra.mxu0 %v5870_v0  ;;  %3948 = vmatpush1.bf16.msra.mxu1 %v5872_v51 }
 0x3ef   :  { %3886 = vmatprep.subr.bf16.mxu0 %v5876_v2  ;;  %3950 = vmatprep.subr.bf16.mxu1 %v5878_v19 }
 0x3f2   :  { %3888 = vmatpush1.bf16.msra.mxu0 %v5882_v40  ;;  %3952 = vmatpush1.bf16.msra.mxu1 %v5884_v46 }
 0x3f3   :  { %3890 = vmatprep.subr.bf16.mxu0 %v5888_v28  ;;  %3954 = vmatprep.subr.bf16.mxu1 %v5890_v23 }
 0x3f6   :  { %3892 = vmatpush1.bf16.msra.mxu0 %v5894_v54  ;;  %3956 = vmatpush1.bf16.msra.mxu1 %v5896_v11  ;;  %v7559_v11 = vld [vmem:[#allocation24_spill] sm:$0xff] }
 0x3f7   :  { %3958 = vmatprep.subr.bf16.mxu0 %v5457_v47  ;;  %4022 = vmatprep.subr.bf16.mxu1 %v5462_v56  ;;  %v7557_v47 = vld [vmem:[#allocation21_spill] sm:$0xff]  ;;  %v7558_v56 = vld [vmem:[#allocation22_spill] sm:$0xff] }
 0x3f9   :  { %1478 = vmatmul.mubr.f32.vlgmr.msra.gmra.mrb[14].mxu0 %v6162_v53  ;;  %1549 = vmatmul.mubr.f32.vlgmr.msra.gmra.mrb[14].mxu1 %v6162_v53  ;;  %v7560_v53 = vld [vmem:[#allocation23_spill] sm:$0xff] }
 0x3fa   :  { %3960 = vmatpush1.bf16.msra.mxu0 %v5459_v52  ;;  %4024 = vmatpush1.bf16.msra.mxu1 %v5465_v59  ;;  %v7561_v52 = vld [vmem:[#allocation25_spill] sm:$0xff]  ;;  %v7562_v59 = vld [vmem:[#allocation26_spill] sm:$0xff] }
 0x3fb   :  { %3962 = vmatprep.subr.bf16.mxu0 %v5467_v60  ;;  %4026 = vmatprep.subr.bf16.mxu1 %v5471_v63  ;;  %v7563_v60 = vld [vmem:[#allocation28_spill] sm:$0xff]  ;;  %v7564_v63 = vld [vmem:[#allocation27_spill] sm:$0xff] }
 0x3fe   :  { %3964 = vmatpush1.bf16.msra.mxu0 %v5475_v3  ;;  %4028 = vmatpush1.bf16.msra.mxu1 %v5483_v9  ;;  %v7565_v3 = vld [vmem:[#allocation29_spill] sm:$0xff]  ;;  %v7566_v9 = vld [vmem:[#allocation30_spill] sm:$0xff] }
 0x3ff   :  { %3966 = vmatprep.subr.bf16.mxu0 %v5479_v6  ;;  %4030 = vmatprep.subr.bf16.mxu1 %v7557_v47  ;;  %v7567_v6 = vld [vmem:[#allocation32_spill] sm:$0xff]  ;;  %v7568_v47 = vld [vmem:[#allocation31_spill] sm:$0xff] }
 0x402   :  { %3968 = vmatpush1.bf16.msra.mxu0 %v7558_v56  ;;  %4032 = vmatpush1.bf16.msra.mxu1 %v7559_v11  ;;  %v7569_v56 = vld [vmem:[#allocation33_spill] sm:$0xff]  ;;  %v7570_v11 = vld [vmem:[#allocation34_spill] sm:$0xff] }
 0x403   :  { %3970 = vmatprep.subr.bf16.mxu0 %v7560_v53  ;;  %4034 = vmatprep.subr.bf16.mxu1 %v7561_v52  ;;  %v7571_v53 = vld [vmem:[#allocation36_spill] sm:$0xff]  ;;  %v7572_v52 = vld [vmem:[#allocation35_spill] sm:$0xff] }
 0x406   :  { %3972 = vmatpush1.bf16.msra.mxu0 %v7562_v59  ;;  %4036 = vmatpush1.bf16.msra.mxu1 %v7563_v60  ;;  %v7573_v59 = vld [vmem:[#allocation37_spill] sm:$0xff]  ;;  %v7574_v60 = vld [vmem:[#allocation38_spill] sm:$0xff] }
 0x407   :  { %3974 = vmatprep.subr.bf16.mxu0 %v7564_v63  ;;  %4038 = vmatprep.subr.bf16.mxu1 %v7565_v3  ;;  %v7575_v63 = vld [vmem:[#allocation40_spill] sm:$0xff]  ;;  %v7576_v3 = vld [vmem:[#allocation39_spill] sm:$0xff] }
 0x40a   :  { %3976 = vmatpush1.bf16.msra.mxu0 %v7566_v9  ;;  %4040 = vmatpush1.bf16.msra.mxu1 %v7567_v6  ;;  %v7577_v9 = vld [vmem:[#allocation41_spill] sm:$0xff]  ;;  %v7578_v6 = vld [vmem:[#allocation42_spill] sm:$0xff] }
 0x40b   :  { %3978 = vmatprep.subr.bf16.mxu0 %v7568_v47  ;;  %4042 = vmatprep.subr.bf16.mxu1 %v7569_v56  ;;  %v7579_v47 = vld [vmem:[#allocation43_spill] sm:$0xff]  ;;  %v7580_v56 = vld [vmem:[#allocation44_spill] sm:$0xff] }
 0x40e   :  { %3980 = vmatpush1.bf16.msra.mxu0 %v7570_v11  ;;  %4044 = vmatpush1.bf16.msra.mxu1 %v7571_v53  ;;  %v7581_v11 = vld [vmem:[#allocation45_spill] sm:$0xff]  ;;  %v7582_v53 = vld [vmem:[#allocation46_spill] sm:$0xff] }
 0x40f   :  { %3982 = vmatprep.subr.bf16.mxu0 %v7572_v52  ;;  %4046 = vmatprep.subr.bf16.mxu1 %v7573_v59  ;;  %v7583_v52 = vld [vmem:[#allocation47_spill] sm:$0xff]  ;;  %v7584_v59 = vld [vmem:[#allocation48_spill] sm:$0xff] }
 0x412   :  { %3984 = vmatpush1.bf16.msra.mxu0 %v7574_v60  ;;  %4048 = vmatpush1.bf16.msra.mxu1 %v7575_v63  ;;  %v7585_v60 = vld [vmem:[#allocation49_spill] sm:$0xff]  ;;  %v7586_v63 = vld [vmem:[#allocation50_spill] sm:$0xff] }
 0x413   :  { %3986 = vmatprep.subr.bf16.mxu0 %v7576_v3  ;;  %4050 = vmatprep.subr.bf16.mxu1 %v7577_v9  ;;  %v7587_v3 = vld [vmem:[#allocation51_spill] sm:$0xff]  ;;  %v7588_v9 = vld [vmem:[#allocation52_spill] sm:$0xff] }
 0x416   :  { %3988 = vmatpush1.bf16.msra.mxu0 %v7578_v6  ;;  %4052 = vmatpush1.bf16.msra.mxu1 %v7579_v47  ;;  %v7589_v6 = vld [vmem:[#allocation53_spill] sm:$0xff]  ;;  %v7590_v47 = vld [vmem:[#allocation54_spill] sm:$0xff] }
 0x417   :  { %3990 = vmatprep.subr.bf16.mxu0 %v7580_v56  ;;  %4054 = vmatprep.subr.bf16.mxu1 %v7581_v11  ;;  %v7591_v56 = vld [vmem:[#allocation55_spill] sm:$0xff]  ;;  %v7592_v11 = vld [vmem:[#allocation56_spill] sm:$0xff] }
 0x41a   :  { %3992 = vmatpush1.bf16.msra.mxu0 %v7582_v53  ;;  %4056 = vmatpush1.bf16.msra.mxu1 %v7583_v52  ;;  %v7593_v53 = vld [vmem:[#allocation57_spill] sm:$0xff]  ;;  %v7594_v52 = vld [vmem:[#allocation58_spill] sm:$0xff] }
 0x41b   :  { %3994 = vmatprep.subr.bf16.mxu0 %v7584_v59  ;;  %4058 = vmatprep.subr.bf16.mxu1 %v7585_v60  ;;  %v7595_v59 = vld [vmem:[#allocation59_spill] sm:$0xff]  ;;  %v7596_v60 = vld [vmem:[#allocation60_spill] sm:$0xff] }
 0x41e   :  { %3996 = vmatpush1.bf16.msra.mxu0 %v7586_v63  ;;  %4060 = vmatpush1.bf16.msra.mxu1 %v7587_v3  ;;  %v7597_v63 = vld [vmem:[#allocation61_spill] sm:$0xff]  ;;  %v7598_v3 = vld [vmem:[#allocation62_spill] sm:$0xff] }
 0x41f   :  { %3998 = vmatprep.subr.bf16.mxu0 %v7588_v9  ;;  %4062 = vmatprep.subr.bf16.mxu1 %v7589_v6  ;;  %v7599_v9 = vld [vmem:[#allocation63_spill] sm:$0xff]  ;;  %v7600_v6 = vld [vmem:[#allocation64_spill] sm:$0xff] }
 0x422   :  { %4000 = vmatpush1.bf16.msra.mxu0 %v7590_v47  ;;  %4064 = vmatpush1.bf16.msra.mxu1 %v7591_v56  ;;  %v7601_v47 = vld [vmem:[#allocation65_spill] sm:$0xff]  ;;  %v7602_v56 = vld [vmem:[#allocation66_spill] sm:$0xff] }
 0x423   :  { %4002 = vmatprep.subr.bf16.mxu0 %v7592_v11  ;;  %4066 = vmatprep.subr.bf16.mxu1 %v7593_v53  ;;  %v7603_v11 = vld [vmem:[#allocation67_spill] sm:$0xff]  ;;  %v7604_v53 = vld [vmem:[#allocation68_spill] sm:$0xff] }
 0x426   :  { %4004 = vmatpush1.bf16.msra.mxu0 %v7594_v52  ;;  %4068 = vmatpush1.bf16.msra.mxu1 %v7595_v59  ;;  %v7605_v52 = vld [vmem:[#allocation69_spill] sm:$0xff]  ;;  %v7606_v59 = vld [vmem:[#allocation70_spill] sm:$0xff] }
 0x427   :  { %4006 = vmatprep.subr.bf16.mxu0 %v7596_v60  ;;  %4070 = vmatprep.subr.bf16.mxu1 %v7597_v63  ;;  %v7607_v60 = vld [vmem:[#allocation71_spill] sm:$0xff]  ;;  %v7608_v63 = vld [vmem:[#allocation72_spill] sm:$0xff] }
 0x42a   :  { %4008 = vmatpush1.bf16.msra.mxu0 %v7598_v3  ;;  %4072 = vmatpush1.bf16.msra.mxu1 %v7599_v9  ;;  %v7609_v3 = vld [vmem:[#allocation73_spill] sm:$0xff]  ;;  %v7610_v9 = vld [vmem:[#allocation74_spill] sm:$0xff] }
 0x42b   :  { %4010 = vmatprep.subr.bf16.mxu0 %v7600_v6  ;;  %4074 = vmatprep.subr.bf16.mxu1 %v7601_v47  ;;  %v7611_v6 = vld [vmem:[#allocation75_spill] sm:$0xff]  ;;  %v7612_v47 = vld [vmem:[#allocation76_spill] sm:$0xff] }
 0x42e   :  { %4012 = vmatpush1.bf16.msra.mxu0 %v7602_v56  ;;  %4076 = vmatpush1.bf16.msra.mxu1 %v7603_v11  ;;  %v7613_v56 = vld [vmem:[#allocation77_spill] sm:$0xff] }
 0x42f   :  { %4014 = vmatprep.subr.bf16.mxu0 %v7604_v53  ;;  %4078 = vmatprep.subr.bf16.mxu1 %v7605_v52 }
 0x432   :  { %4016 = vmatpush1.bf16.msra.mxu0 %v7606_v59  ;;  %4080 = vmatpush1.bf16.msra.mxu1 %v7607_v60  ;;  %v7614_v60 = vld [vmem:[#allocation82_spill] sm:$0xff] }
 0x433   :  { %4018 = vmatprep.subr.bf16.mxu0 %v7608_v63  ;;  %4082 = vmatprep.subr.bf16.mxu1 %v7609_v3  ;;  %v7615_v63 = vld [vmem:[#allocation83_spill] sm:$0xff]  ;;  %v7616_v3 = vld [vmem:[#allocation84_spill] sm:$0xff] }
 0x436   :  { %4020 = vmatpush1.bf16.msra.mxu0 %v7610_v9  ;;  %4084 = vmatpush1.bf16.msra.mxu1 %v7611_v6 }
 0x437   :  { %4086 = vmatprep.subr.bf16.mxu0 %v7612_v47  ;;  %4150 = vmatprep.subr.bf16.mxu1 %v7613_v56  ;;  %v7617_v47 = vld [vmem:[#allocation86_spill] sm:$0xff] }
 0x48c   :  { %v1337_v11 = vpop.f32.mrb[12].mxu0  ;;  %v1408_v53 = vpop.f32.mrb[12].mxu1 }
 0x48d   :  { %v1559_v54 = vrot.slane %v1337_v11, 2  ;;  %v1561_v52 = vrot.slane %v1408_v53, 2  ;;  %v1339_v23 = vpop.f32.mrb[13].mxu0  ;;  %v1410_v59 = vpop.f32.mrb[13].mxu1 }
 0x48e   :  { %v1560_v28 = vrot.slane %v1339_v23, 2  ;;  %v1562_v6 = vrot.slane %v1410_v59, 2 }
 0x48f   :  { %v1567_v46 = vadd.f32 %v1559_v54, %v7614_v60  ;;  %v1569_v9 = vadd.f32 %v1561_v52, %v7616_v3  ;;  %v1582_v60 = vrot.slane %v6151_v33, 6 }
 0x490   :  { %v1568_v40 = vadd.f32 %v1560_v28, %v7615_v63  ;;  %v1570_v19 = vadd.f32 %v1562_v6, %v7617_v47 }
 0x491   :  { %5170 = vtanh.f32 %v1567_v46 }
 0x492   :  { %5172 = vtanh.f32 %v1568_v40 }
 0x493   :  { %5174 = vtanh.f32 %v1569_v9 }
 0x494   :  { %5176 = vtanh.f32 %v1570_v19 }
 0x49b   :  { %v5171_v56 = vpop.eup %5170 }
 0x49c   :  { %v1575_v2 = vmul.f32 0.5, %v5171_v56  ;;  %v5173_v51 = vpop.eup %5172 }
 0x49d   :  { %v1577_v53 = vmul.f32 0.5, %v5173_v51  ;;  %v5175_v0 = vpop.eup %5174 }
 0x49e   :  { %v1576_v11 = vadd.f32 0.5, %v1575_v2  ;;  %v5177_v52 = vpop.eup %5176 }
 0x49f   :  { %v1578_v23 = vadd.f32 0.5, %v1577_v53  ;;  %v1579_v59 = vmul.f32 0.5, %v5177_v52 }
 0x4a0   :  { %v1585_v54 = vmul.f32 %v5175_v0, %v1576_v11 }
 0x4a1   :  { %v1584_v63 = vmul.f32 %v1582_v60, %v1578_v23  ;;  %v1580_v3 = vadd.f32 0.5, %v1579_v59 }
 0x4a3   :  { %v6301_v46 = vadd.f32 %v1585_v54, %v1584_v63 }
 0x4a5   :  { %5178 = vtanh.f32 %v6301_v46 }
 0x4af   :  { %v5179_v47 = vpop.eup %5178 }
 0x4b0   :  { %v1588_v6 = vmul.f32 %v5179_v47, %v1580_v3 }
 0x4cc   :  { %v1479_v56 = vpop.f32.mrb[14].mxu0  ;;  %v1550_v9 = vpop.f32.mrb[14].mxu1 }
 0x4cd   :  { %v1589_v51 = vadd.f32 %v1479_v56, %v7524_v18  ;;  %v1481_v2 = vpop.f32.mrb[15].mxu0  ;;  %v1552_v19 = vpop.f32.mrb[15].mxu1  ;;  %v1591_v0 = vadd.f32 %v1550_v9, %v5999_v17 }
 0x4ce   :  { %v1590_v40 = vadd.f32 %v1481_v2, %v7525_v62  ;;  %v1592_v28 = vadd.f32 %v1552_v19, %v6006_v35 }
 0x4cf   :  { %5180 = vtanh.f32 %v1589_v51 }
 0x4d0   :  { %5182 = vtanh.f32 %v1590_v40 }
 0x4d1   :  { %5184 = vtanh.f32 %v1591_v0  ;;  %v6312_v0 = vrot.slane %v1588_v6, 6  ;;  %v7619_v6 = vld [vmem:[#allocation101_spill] sm:$0xff] }
 0x4d2   :  { %5186 = vtanh.f32 %v1592_v28  ;;  %v7620_v28 = vld [vmem:[#allocation102_spill] sm:$0xff] }
 0x4d9   :  { %v5181_v33 = vpop.eup %5180 }
 0x4da   :  { %v1597_v11 = vmul.f32 0.5, %v5181_v33  ;;  %v5183_v53 = vpop.eup %5182  ;;  %v7621_v33 = vld [vmem:[#allocation103_spill] sm:$0xff] }
 0x4db   :  { %v1599_v60 = vmul.f32 0.5, %v5183_v53  ;;  %v5185_v54 = vpop.eup %5184  ;;  %v7623_v53 = vld [vmem:[#allocation105_spill] sm:$0xff] }
 0x4dc   :  { %v1598_v23 = vadd.f32 0.5, %v1597_v11  ;;  %v5187_v47 = vpop.eup %5186  ;;  %v7622_v11 = vld [vmem:[#allocation104_spill] sm:$0xff] }
 0x4dd   :  { %v1600_v63 = vadd.f32 0.5, %v1599_v60  ;;  %v1601_v56 = vmul.f32 0.5, %v5187_v47  ;;  %v7625_v60 = vld [vmem:[#allocation107_spill] sm:$0xff]  ;;  %v7630_v47 = vld [vmem:[#allocation112_spill] sm:$0xff] }
 0x4de   :  { %v1604_v52 = vmul.f32 %v5185_v54, %v1598_v23  ;;  %v7624_v23 = vld [vmem:[#allocation106_spill] sm:$0xff]  ;;  %v7626_v54 = vld [vmem:[#allocation108_spill] sm:$0xff] }
 0x4df   :  { %v1603_v59 = vmul.f32 %v1600_v63, %v6159_v49  ;;  %v1602_v9 = vadd.f32 0.5, %v1601_v56  ;;  %v7618_v49 = vld [vmem:[#allocation100_spill] sm:$0xff]  ;;  %v7627_v63 = vld [vmem:[#allocation109_spill] sm:$0xff] }
 0x4e0   :  { %v7631_v56 = vld [vmem:[#allocation113_spill] sm:$0xff] }
 0x4e1   :  { %v6309_v3 = vadd.f32 %v1604_v52, %v1603_v59  ;;  %v7628_v52 = vld [vmem:[#allocation110_spill] sm:$0xff]  ;;  %v7629_v59 = vld [vmem:[#allocation111_spill] sm:$0xff] }
 0x4e3   :  { %5188 = vtanh.f32 %v6309_v3 }
 0x4ed   :  { %v5189_v51 = vpop.eup %5188 }
 0x4ee   :  { %v1607_v2 = vmul.f32 %v5189_v51, %v1602_v9  ;;  %v7632_v9 = vld [vmem:[#allocation138_spill] sm:$0xff]  ;;  %v7633_v51 = vld [vmem:[#allocation139_spill] sm:$0xff] }
 0x4f0   :  { %1608 = vst [vmem:[#allocation8 + $0x4] sm:$0x3] %v1607_v2  ;;  %v1610_v19 = vrot.slane %v1607_v2, 2  ;;  %v7634_v2 = vld [vmem:[#allocation140_spill] sm:$0xff] }
 0x4f2   :  { %v1613_v40 = vrot.slane %v1610_v19, 6  ;;  %v7635_v19 = vld [vmem:[#allocation141_spill] sm:$0xff] }
 0x4f4   :  { %1680 = vmatprep.mubr.f32.mxu0 %v1613_v40  ;;  %1751 = vmatprep.mubr.f32.mxu1 %v1613_v40 }
 0x4f5   :  { %1681 = vmatmul.mubr.f32.vlgmr.msra.gmra.mrb[16].mxu0 %v6312_v0  ;;  %1752 = vmatmul.mubr.f32.vlgmr.msra.gmra.mrb[16].mxu1 %v6312_v0 }
 0x4f6   :  { %4088 = vmatpush1.bf16.msra.mxu0 %v5710_v20  ;;  %4152 = vmatpush1.bf16.msra.mxu1 %v7434_v10 }
 0x4f7   :  { %1822 = vmatprep.mubr.f32.mxu0 %v1613_v40  ;;  %1893 = vmatprep.mubr.f32.mxu1 %v1613_v40  ;;  %v7636_v40 = vld [vmem:[#allocation142_spill] sm:$0xff] }
 0x4f8   :  { %4090 = vmatprep.subr.bf16.mxu0 %v5716_v37  ;;  %4154 = vmatprep.subr.bf16.mxu1 %v7435_v7 }
 0x4fa   :  { %4092 = vmatpush1.bf16.msra.mxu0 %v7436_v55  ;;  %4156 = vmatpush1.bf16.msra.mxu1 %v7437_v43 }
 0x4fb   :  { %4094 = vmatprep.subr.bf16.mxu0 %v7438_v48  ;;  %4158 = vmatprep.subr.bf16.mxu1 %v7439_v5 }
 0x4fe   :  { %4096 = vmatpush1.bf16.msra.mxu0 %v7526_v22  ;;  %4160 = vmatpush1.bf16.msra.mxu1 %v7527_v29 }
 0x4ff   :  { %4098 = vmatprep.subr.bf16.mxu0 %v7528_v15  ;;  %4162 = vmatprep.subr.bf16.mxu1 %v7529_v36 }
 0x502   :  { %4100 = vmatpush1.bf16.msra.mxu0 %v7530_v39  ;;  %4164 = vmatpush1.bf16.msra.mxu1 %v7531_v30 }
 0x503   :  { %4102 = vmatprep.subr.bf16.mxu0 %v7618_v49  ;;  %4166 = vmatprep.subr.bf16.mxu1 %v7619_v6 }
 0x506   :  { %4104 = vmatpush1.bf16.msra.mxu0 %v7620_v28  ;;  %4168 = vmatpush1.bf16.msra.mxu1 %v7621_v33 }
 0x507   :  { %4106 = vmatprep.subr.bf16.mxu0 %v7622_v11  ;;  %4170 = vmatprep.subr.bf16.mxu1 %v7623_v53 }
 0x50a   :  { %4108 = vmatpush1.bf16.msra.mxu0 %v7624_v23  ;;  %4172 = vmatpush1.bf16.msra.mxu1 %v7625_v60 }
 0x50b   :  { %4110 = vmatprep.subr.bf16.mxu0 %v7626_v54  ;;  %4174 = vmatprep.subr.bf16.mxu1 %v7627_v63 }
 0x50e   :  { %4112 = vmatpush1.bf16.msra.mxu0 %v7628_v52  ;;  %4176 = vmatpush1.bf16.msra.mxu1 %v7629_v59 }
 0x50f   :  { %4114 = vmatprep.subr.bf16.mxu0 %v7630_v47  ;;  %4178 = vmatprep.subr.bf16.mxu1 %v7631_v56 }
 0x512   :  { %4116 = vmatpush1.bf16.msra.mxu0 %v7546_v45  ;;  %4180 = vmatpush1.bf16.msra.mxu1 %v7547_v42 }
 0x513   :  { %4118 = vmatprep.subr.bf16.mxu0 %v7548_v14  ;;  %4182 = vmatprep.subr.bf16.mxu1 %v7549_v21 }
 0x516   :  { %4120 = vmatpush1.bf16.msra.mxu0 %v7550_v24  ;;  %4184 = vmatpush1.bf16.msra.mxu1 %v7551_v13 }
 0x517   :  { %4122 = vmatprep.subr.bf16.mxu0 %v7552_v12  ;;  %4186 = vmatprep.subr.bf16.mxu1 %v7553_v8 }
 0x51a   :  { %4124 = vmatpush1.bf16.msra.mxu0 %v7554_v27  ;;  %4188 = vmatpush1.bf16.msra.mxu1 %v7555_v57 }
 0x51b   :  { %4126 = vmatprep.subr.bf16.mxu0 %v7556_v4  ;;  %4190 = vmatprep.subr.bf16.mxu1 %v7471_v41 }
 0x51e   :  { %4128 = vmatpush1.bf16.msra.mxu0 %v7472_v44  ;;  %4192 = vmatpush1.bf16.msra.mxu1 %v7473_v16 }
 0x51f   :  { %4130 = vmatprep.subr.bf16.mxu0 %v7474_v26  ;;  %4194 = vmatprep.subr.bf16.mxu1 %v7475_v50 }
 0x522   :  { %4132 = vmatpush1.bf16.msra.mxu0 %v7476_v61  ;;  %4196 = vmatpush1.bf16.msra.mxu1 %v7477_v58  ;;  %v7714_v61 = vld [vmem:[#allocation81_spill] sm:$0xff] }
 0x523   :  { %4134 = vmatprep.subr.bf16.mxu0 %v7478_v31  ;;  %4198 = vmatprep.subr.bf16.mxu1 %v7479_v25  ;;  %v7637_v31 = vld [vmem:[#allocation143_spill] sm:$0xff]  ;;  %v7638_v25 = vld [vmem:[#allocation144_spill] sm:$0xff] }
 0x526   :  { %4136 = vmatpush1.bf16.msra.mxu0 %v7480_v38  ;;  %4200 = vmatpush1.bf16.msra.mxu1 %v7481_v1  ;;  %v7639_v38 = vld [vmem:[#allocation145_spill] sm:$0xff]  ;;  %v7640_v1 = vld [vmem:[#allocation146_spill] sm:$0xff] }
 0x527   :  { %4138 = vmatprep.subr.bf16.mxu0 %v5864_v32  ;;  %4202 = vmatprep.subr.bf16.mxu1 %v5866_v34  ;;  %v7641_v32 = vld [vmem:[#allocation147_spill] sm:$0xff]  ;;  %v7642_v34 = vld [vmem:[#allocation12_spill] sm:$0xff] }
 0x52a   :  { %4140 = vmatpush1.bf16.msra.mxu0 %v7632_v9  ;;  %4204 = vmatpush1.bf16.msra.mxu1 %v7633_v51  ;;  %v7643_v9 = vld [vmem:[#allocation14_spill] sm:$0xff] }
 0x52b   :  { %4142 = vmatprep.subr.bf16.mxu0 %v7634_v2  ;;  %4206 = vmatprep.subr.bf16.mxu1 %v7635_v19  ;;  %v7644_v19 = vld [vmem:[#allocation13_spill] sm:$0xff]  ;;  %v7653_v2 = vld [vmem:[#allocation24_spill] sm:$0xff] }
 0x52e   :  { %4144 = vmatpush1.bf16.msra.mxu0 %v7636_v40  ;;  %4208 = vmatpush1.bf16.msra.mxu1 %v7637_v31  ;;  %v7645_v40 = vld [vmem:[#allocation15_spill] sm:$0xff]  ;;  %v7646_v31 = vld [vmem:[#allocation16_spill] sm:$0xff] }
 0x52f   :  { %4146 = vmatprep.subr.bf16.mxu0 %v7638_v25  ;;  %4210 = vmatprep.subr.bf16.mxu1 %v7639_v38  ;;  %v7647_v25 = vld [vmem:[#allocation17_spill] sm:$0xff]  ;;  %v7648_v38 = vld [vmem:[#allocation18_spill] sm:$0xff] }
 0x532   :  { %4148 = vmatpush1.bf16.msra.mxu0 %v7640_v1  ;;  %4212 = vmatpush1.bf16.msra.mxu1 %v7641_v32  ;;  %v7649_v1 = vld [vmem:[#allocation20_spill] sm:$0xff]  ;;  %v7650_v32 = vld [vmem:[#allocation19_spill] sm:$0xff] }
 0x533   :  { %4214 = vmatprep.subr.bf16.mxu0 %v7642_v34  ;;  %4278 = vmatprep.subr.bf16.mxu1 %v7643_v9  ;;  %v7651_v34 = vld [vmem:[#allocation21_spill] sm:$0xff]  ;;  %v7652_v9 = vld [vmem:[#allocation22_spill] sm:$0xff] }
 0x535   :  { %1823 = vmatmul.mubr.f32.vlgmr.msra.gmra.mrb[18].mxu0 %v6312_v0  ;;  %1894 = vmatmul.mubr.f32.vlgmr.msra.gmra.mrb[18].mxu1 %v6312_v0  ;;  %v7654_v0 = vld [vmem:[#allocation23_spill] sm:$0xff] }
 0x536   :  { %4216 = vmatpush1.bf16.msra.mxu0 %v7644_v19  ;;  %4280 = vmatpush1.bf16.msra.mxu1 %v7645_v40  ;;  %v7655_v19 = vld [vmem:[#allocation25_spill] sm:$0xff]  ;;  %v7656_v40 = vld [vmem:[#allocation26_spill] sm:$0xff] }
 0x537   :  { %4218 = vmatprep.subr.bf16.mxu0 %v7646_v31  ;;  %4282 = vmatprep.subr.bf16.mxu1 %v7647_v25  ;;  %v7657_v31 = vld [vmem:[#allocation28_spill] sm:$0xff]  ;;  %v7658_v25 = vld [vmem:[#allocation27_spill] sm:$0xff] }
 0x53a   :  { %4220 = vmatpush1.bf16.msra.mxu0 %v7648_v38  ;;  %4284 = vmatpush1.bf16.msra.mxu1 %v7649_v1  ;;  %v7659_v38 = vld [vmem:[#allocation29_spill] sm:$0xff]  ;;  %v7660_v1 = vld [vmem:[#allocation30_spill] sm:$0xff] }
 0x53b   :  { %4222 = vmatprep.subr.bf16.mxu0 %v7650_v32  ;;  %4286 = vmatprep.subr.bf16.mxu1 %v7651_v34  ;;  %v7661_v32 = vld [vmem:[#allocation32_spill] sm:$0xff]  ;;  %v7662_v34 = vld [vmem:[#allocation31_spill] sm:$0xff] }
 0x53e   :  { %4224 = vmatpush1.bf16.msra.mxu0 %v7652_v9  ;;  %4288 = vmatpush1.bf16.msra.mxu1 %v7653_v2  ;;  %v7663_v9 = vld [vmem:[#allocation33_spill] sm:$0xff]  ;;  %v7664_v2 = vld [vmem:[#allocation34_spill] sm:$0xff] }
 0x53f   :  { %4226 = vmatprep.subr.bf16.mxu0 %v7654_v0  ;;  %4290 = vmatprep.subr.bf16.mxu1 %v7655_v19  ;;  %v7665_v0 = vld [vmem:[#allocation36_spill] sm:$0xff]  ;;  %v7666_v19 = vld [vmem:[#allocation35_spill] sm:$0xff] }
 0x542   :  { %4228 = vmatpush1.bf16.msra.mxu0 %v7656_v40  ;;  %4292 = vmatpush1.bf16.msra.mxu1 %v7657_v31  ;;  %v7667_v40 = vld [vmem:[#allocation37_spill] sm:$0xff]  ;;  %v7668_v31 = vld [vmem:[#allocation38_spill] sm:$0xff] }
 0x543   :  { %4230 = vmatprep.subr.bf16.mxu0 %v7658_v25  ;;  %4294 = vmatprep.subr.bf16.mxu1 %v7659_v38  ;;  %v7669_v25 = vld [vmem:[#allocation40_spill] sm:$0xff]  ;;  %v7670_v38 = vld [vmem:[#allocation39_spill] sm:$0xff] }
 0x546   :  { %4232 = vmatpush1.bf16.msra.mxu0 %v7660_v1  ;;  %4296 = vmatpush1.bf16.msra.mxu1 %v7661_v32  ;;  %v7671_v1 = vld [vmem:[#allocation41_spill] sm:$0xff]  ;;  %v7672_v32 = vld [vmem:[#allocation42_spill] sm:$0xff] }
 0x547   :  { %4234 = vmatprep.subr.bf16.mxu0 %v7662_v34  ;;  %4298 = vmatprep.subr.bf16.mxu1 %v7663_v9  ;;  %v7673_v34 = vld [vmem:[#allocation43_spill] sm:$0xff]  ;;  %v7674_v9 = vld [vmem:[#allocation44_spill] sm:$0xff] }
 0x54a   :  { %4236 = vmatpush1.bf16.msra.mxu0 %v7664_v2  ;;  %4300 = vmatpush1.bf16.msra.mxu1 %v7665_v0  ;;  %v7675_v2 = vld [vmem:[#allocation45_spill] sm:$0xff]  ;;  %v7676_v0 = vld [vmem:[#allocation46_spill] sm:$0xff] }
 0x54b   :  { %4238 = vmatprep.subr.bf16.mxu0 %v7666_v19  ;;  %4302 = vmatprep.subr.bf16.mxu1 %v7667_v40  ;;  %v7677_v19 = vld [vmem:[#allocation47_spill] sm:$0xff]  ;;  %v7678_v40 = vld [vmem:[#allocation48_spill] sm:$0xff] }
 0x54e   :  { %4240 = vmatpush1.bf16.msra.mxu0 %v7668_v31  ;;  %4304 = vmatpush1.bf16.msra.mxu1 %v7669_v25  ;;  %v7679_v31 = vld [vmem:[#allocation49_spill] sm:$0xff]  ;;  %v7680_v25 = vld [vmem:[#allocation50_spill] sm:$0xff] }
 0x54f   :  { %4242 = vmatprep.subr.bf16.mxu0 %v7670_v38  ;;  %4306 = vmatprep.subr.bf16.mxu1 %v7671_v1  ;;  %v7681_v38 = vld [vmem:[#allocation51_spill] sm:$0xff]  ;;  %v7682_v1 = vld [vmem:[#allocation52_spill] sm:$0xff] }
 0x552   :  { %4244 = vmatpush1.bf16.msra.mxu0 %v7672_v32  ;;  %4308 = vmatpush1.bf16.msra.mxu1 %v7673_v34  ;;  %v7683_v32 = vld [vmem:[#allocation53_spill] sm:$0xff]  ;;  %v7684_v34 = vld [vmem:[#allocation54_spill] sm:$0xff] }
 0x553   :  { %4246 = vmatprep.subr.bf16.mxu0 %v7674_v9  ;;  %4310 = vmatprep.subr.bf16.mxu1 %v7675_v2  ;;  %v7685_v9 = vld [vmem:[#allocation55_spill] sm:$0xff]  ;;  %v7686_v2 = vld [vmem:[#allocation56_spill] sm:$0xff] }
 0x556   :  { %4248 = vmatpush1.bf16.msra.mxu0 %v7676_v0  ;;  %4312 = vmatpush1.bf16.msra.mxu1 %v7677_v19  ;;  %v7687_v0 = vld [vmem:[#allocation57_spill] sm:$0xff]  ;;  %v7688_v19 = vld [vmem:[#allocation58_spill] sm:$0xff] }
 0x557   :  { %4250 = vmatprep.subr.bf16.mxu0 %v7678_v40  ;;  %4314 = vmatprep.subr.bf16.mxu1 %v7679_v31  ;;  %v7689_v40 = vld [vmem:[#allocation59_spill] sm:$0xff]  ;;  %v7690_v31 = vld [vmem:[#allocation60_spill] sm:$0xff] }
 0x55a   :  { %4252 = vmatpush1.bf16.msra.mxu0 %v7680_v25  ;;  %4316 = vmatpush1.bf16.msra.mxu1 %v7681_v38  ;;  %v7691_v25 = vld [vmem:[#allocation61_spill] sm:$0xff]  ;;  %v7692_v38 = vld [vmem:[#allocation62_spill] sm:$0xff] }
 0x55b   :  { %4254 = vmatprep.subr.bf16.mxu0 %v7682_v1  ;;  %4318 = vmatprep.subr.bf16.mxu1 %v7683_v32  ;;  %v7693_v1 = vld [vmem:[#allocation63_spill] sm:$0xff]  ;;  %v7694_v32 = vld [vmem:[#allocation64_spill] sm:$0xff] }
 0x55e   :  { %4256 = vmatpush1.bf16.msra.mxu0 %v7684_v34  ;;  %4320 = vmatpush1.bf16.msra.mxu1 %v7685_v9  ;;  %v7695_v34 = vld [vmem:[#allocation65_spill] sm:$0xff]  ;;  %v7696_v9 = vld [vmem:[#allocation66_spill] sm:$0xff] }
 0x55f   :  { %4258 = vmatprep.subr.bf16.mxu0 %v7686_v2  ;;  %4322 = vmatprep.subr.bf16.mxu1 %v7687_v0  ;;  %v7697_v2 = vld [vmem:[#allocation67_spill] sm:$0xff]  ;;  %v7698_v0 = vld [vmem:[#allocation68_spill] sm:$0xff] }
 0x562   :  { %4260 = vmatpush1.bf16.msra.mxu0 %v7688_v19  ;;  %4324 = vmatpush1.bf16.msra.mxu1 %v7689_v40  ;;  %v7699_v19 = vld [vmem:[#allocation69_spill] sm:$0xff]  ;;  %v7700_v40 = vld [vmem:[#allocation70_spill] sm:$0xff] }
 0x563   :  { %4262 = vmatprep.subr.bf16.mxu0 %v7690_v31  ;;  %4326 = vmatprep.subr.bf16.mxu1 %v7691_v25  ;;  %v7701_v31 = vld [vmem:[#allocation71_spill] sm:$0xff]  ;;  %v7702_v25 = vld [vmem:[#allocation72_spill] sm:$0xff] }
 0x566   :  { %4264 = vmatpush1.bf16.msra.mxu0 %v7692_v38  ;;  %4328 = vmatpush1.bf16.msra.mxu1 %v7693_v1  ;;  %v7703_v38 = vld [vmem:[#allocation73_spill] sm:$0xff]  ;;  %v7704_v1 = vld [vmem:[#allocation74_spill] sm:$0xff] }
 0x567   :  { %4266 = vmatprep.subr.bf16.mxu0 %v7694_v32  ;;  %4330 = vmatprep.subr.bf16.mxu1 %v7695_v34  ;;  %v7705_v32 = vld [vmem:[#allocation75_spill] sm:$0xff]  ;;  %v7706_v34 = vld [vmem:[#allocation76_spill] sm:$0xff] }
 0x56a   :  { %4268 = vmatpush1.bf16.msra.mxu0 %v7696_v9  ;;  %4332 = vmatpush1.bf16.msra.mxu1 %v7697_v2  ;;  %v7707_v9 = vld [vmem:[#allocation77_spill] sm:$0xff]  ;;  %v7708_v2 = vld [vmem:[#allocation79_spill] sm:$0xff] }
 0x56b   :  { %4270 = vmatprep.subr.bf16.mxu0 %v7698_v0  ;;  %4334 = vmatprep.subr.bf16.mxu1 %v7699_v19  ;;  %v7709_v0 = vld [vmem:[#allocation148_spill] sm:$0xff] }
 0x56c   :  { %v6448_v51 = vadd.f32 %v7709_v0, %v7708_v2  ;;  %v7711_v19 = vld [vmem:[#allocation80_spill] sm:$0xff]  ;;  %v7717_v0 = vld [vmem:[#allocation85_spill] sm:$0xff] }
 0x56e   :  { %4272 = vmatpush1.bf16.msra.mxu0 %v7700_v40  ;;  %4336 = vmatpush1.bf16.msra.mxu1 %v7701_v31  ;;  %7710 = vst [vmem:[#allocation88_spill] sm:$0xff] %v6448_v51  ;;  %v7712_v40 = vld [vmem:[#allocation150_spill] sm:$0xff] }
 0x56f   :  { %4274 = vmatprep.subr.bf16.mxu0 %v7702_v25  ;;  %4338 = vmatprep.subr.bf16.mxu1 %v7703_v38  ;;  %v6452_v58 = vadd.f32 %v7712_v40, %v7711_v19  ;;  %v7715_v38 = vld [vmem:[#allocation149_spill] sm:$0xff]  ;;  %v7718_v19 = vld [vmem:[#allocation151_spill] sm:$0xff] }
 0x570   :  { %v6456_v50 = vadd.f32 %v7715_v38, %v7714_v61  ;;  %v6463_v40 = vadd.f32 %v7718_v19, %v7717_v0 }
 0x571   :  { %7713 = vst [vmem:[#allocation89_spill] sm:$0xff] %v6452_v58 }
 0x572   :  { %4276 = vmatpush1.bf16.msra.mxu0 %v7704_v1  ;;  %4340 = vmatpush1.bf16.msra.mxu1 %v7705_v32  ;;  %7716 = vst [vmem:[#allocation90_spill] sm:$0xff] %v6456_v50  ;;  %7719 = vst [vmem:[#allocation91_spill] sm:$0xff] %v6463_v40 }
 0x573   :  { %4342 = vmatprep.subr.bf16.mxu0 %v7706_v34  ;;  %4406 = vmatprep.subr.bf16.mxu1 %v7707_v9 }
 0x5c8   :  { %v1682_v31 = vpop.f32.mrb[16].mxu0  ;;  %v1753_v25 = vpop.f32.mrb[16].mxu1 }
 0x5c9   :  { %v1900_v32 = vadd.f32 %v1682_v31, %v6448_v51  ;;  %v1684_v1 = vpop.f32.mrb[17].mxu0  ;;  %v1755_v34 = vpop.f32.mrb[17].mxu1  ;;  %v1902_v2 = vadd.f32 %v1753_v25, %v6456_v50 }
 0x5ca   :  { %v1901_v9 = vadd.f32 %v1684_v1, %v6452_v58  ;;  %v1903_v26 = vadd.f32 %v1755_v34, %v6463_v40 }
 0x5cb   :  { %5190 = vtanh.f32 %v1900_v32  ;;  %v1915_v32 = vrot.slane %v6301_v46, 6 }
 0x5cc   :  { %5192 = vtanh.f32 %v1901_v9 }
 0x5cd   :  { %5194 = vtanh.f32 %v1902_v2 }
 0x5ce   :  { %5196 = vtanh.f32 %v1903_v26 }
 0x5d5   :  { %v5191_v16 = vpop.eup %5190 }
 0x5d6   :  { %v1908_v61 = vmul.f32 0.5, %v5191_v16  ;;  %v5193_v38 = vpop.eup %5192 }
 0x5d7   :  { %v1910_v31 = vmul.f32 0.5, %v5193_v38  ;;  %v5195_v51 = vpop.eup %5194 }
 0x5d8   :  { %v1909_v44 = vadd.f32 0.5, %v1908_v61  ;;  %v5197_v2 = vpop.eup %5196 }
 0x5d9   :  { %v1911_v41 = vadd.f32 0.5, %v1910_v31  ;;  %v1912_v0 = vmul.f32 0.5, %v5197_v2 }
 0x5da   :  { %v1918_v1 = vmul.f32 %v5195_v51, %v1909_v44 }
 0x5db   :  { %v1917_v25 = vmul.f32 %v1915_v32, %v1911_v41  ;;  %v1913_v19 = vadd.f32 0.5, %v1912_v0 }
 0x5dd   :  { %v6467_v9 = vadd.f32 %v1918_v1, %v1917_v25 }
 0x5df   :  { %5198 = vtanh.f32 %v6467_v9 }
 0x5e9   :  { %v5199_v34 = vpop.eup %5198 }
 0x5ea   :  { %v6470_v40 = vmul.f32 %v5199_v34, %v1913_v19 }
 0x608   :  { %v1824_v16 = vpop.f32.mrb[18].mxu0  ;;  %v1895_v61 = vpop.f32.mrb[18].mxu1 }
 0x609   :  { %v1922_v26 = vadd.f32 %v1824_v16, %v7524_v18  ;;  %v1826_v38 = vpop.f32.mrb[19].mxu0  ;;  %v1897_v31 = vpop.f32.mrb[19].mxu1  ;;  %v1924_v41 = vadd.f32 %v1895_v61, %v5999_v17 }
 0x60a   :  { %v1923_v46 = vadd.f32 %v1826_v38, %v7525_v62  ;;  %v1925_v44 = vadd.f32 %v1897_v31, %v6006_v35 }
 0x60b   :  { %5200 = vtanh.f32 %v1922_v26 }
 0x60c   :  { %5202 = vtanh.f32 %v1923_v46 }
 0x60d   :  { %5204 = vtanh.f32 %v1924_v41  ;;  %v7721_v41 = vld [vmem:[#allocation126_spill] sm:$0xff] }
 0x60e   :  { %5206 = vtanh.f32 %v1925_v44  ;;  %v7722_v44 = vld [vmem:[#allocation127_spill] sm:$0xff] }
 0x615   :  { %v5201_v51 = vpop.eup %5200 }
 0x616   :  { %v1930_v32 = vmul.f32 0.5, %v5201_v51  ;;  %v5203_v1 = vpop.eup %5202  ;;  %v7723_v51 = vld [vmem:[#allocation128_spill] sm:$0xff] }
 0x617   :  { %v1932_v2 = vmul.f32 0.5, %v5203_v1  ;;  %v5205_v0 = vpop.eup %5204  ;;  %v7725_v1 = vld [vmem:[#allocation130_spill] sm:$0xff] }
 0x618   :  { %v1931_v25 = vadd.f32 0.5, %v1930_v32  ;;  %v5207_v61 = vpop.eup %5206  ;;  %v7724_v32 = vld [vmem:[#allocation129_spill] sm:$0xff] }
 0x619   :  { %v1933_v19 = vadd.f32 0.5, %v1932_v2  ;;  %v1934_v26 = vmul.f32 0.5, %v5207_v61  ;;  %v7727_v2 = vld [vmem:[#allocation132_spill] sm:$0xff]  ;;  %v7732_v61 = vld [vmem:[#allocation137_spill] sm:$0xff] }
 0x61a   :  { %v1937_v34 = vmul.f32 %v5205_v0, %v1931_v25  ;;  %v7726_v25 = vld [vmem:[#allocation131_spill] sm:$0xff]  ;;  %v7728_v0 = vld [vmem:[#allocation133_spill] sm:$0xff] }
 0x61b   :  { %v1936_v16 = vmul.f32 %v1933_v19, %v6309_v3  ;;  %v1935_v38 = vadd.f32 0.5, %v1934_v26  ;;  %v7720_v3 = vld [vmem:[#allocation125_spill] sm:$0xff]  ;;  %v7729_v19 = vld [vmem:[#allocation134_spill] sm:$0xff] }
 0x61c   :  { %v7733_v26 = vld [vmem:[#allocation138_spill] sm:$0xff] }
 0x61d   :  { %v6477_v18 = vadd.f32 %v1937_v34, %v1936_v16  ;;  %v7730_v34 = vld [vmem:[#allocation135_spill] sm:$0xff]  ;;  %v7731_v16 = vld [vmem:[#allocation136_spill] sm:$0xff] }
 0x61f   :  { %5208 = vtanh.f32 %v6477_v18 }
 0x629   :  { %v5209_v46 = vpop.eup %5208 }
 0x62a   :  { %v1940_v31 = vmul.f32 %v5209_v46, %v1935_v38  ;;  %v7734_v38 = vld [vmem:[#allocation139_spill] sm:$0xff]  ;;  %v7735_v46 = vld [vmem:[#allocation140_spill] sm:$0xff] }
 0x62c   :  { %1941 = vst [vmem:[#allocation8 + $0x6] sm:$0x3] %v1940_v31  ;;  %2006 = vmatprep.mubr.f32.mxu0 %v1940_v31  ;;  %2077 = vmatprep.mubr.f32.mxu1 %v1940_v31 }
 0x62d   :  { %2007 = vmatmul.mubr.f32.vlgmr.msra.gmra.mrb[20].mxu0 %v6470_v40  ;;  %2078 = vmatmul.mubr.f32.vlgmr.msra.gmra.mrb[20].mxu1 %v6470_v40 }
 0x62e   :  { %4344 = vmatpush1.bf16.msra.mxu0 %v5710_v20  ;;  %4408 = vmatpush1.bf16.msra.mxu1 %v7434_v10 }
 0x62f   :  { %2148 = vmatprep.mubr.f32.mxu0 %v1940_v31  ;;  %2219 = vmatprep.mubr.f32.mxu1 %v1940_v31  ;;  %v7736_v31 = vld [vmem:[#allocation141_spill] sm:$0xff] }
 0x630   :  { %4346 = vmatprep.subr.bf16.mxu0 %v5716_v37  ;;  %4410 = vmatprep.subr.bf16.mxu1 %v7435_v7 }
 0x632   :  { %4348 = vmatpush1.bf16.msra.mxu0 %v7436_v55  ;;  %4412 = vmatpush1.bf16.msra.mxu1 %v7437_v43 }
 0x633   :  { %4350 = vmatprep.subr.bf16.mxu0 %v7438_v48  ;;  %4414 = vmatprep.subr.bf16.mxu1 %v7439_v5 }
 0x636   :  { %4352 = vmatpush1.bf16.msra.mxu0 %v7526_v22  ;;  %4416 = vmatpush1.bf16.msra.mxu1 %v7527_v29 }
 0x637   :  { %4354 = vmatprep.subr.bf16.mxu0 %v7528_v15  ;;  %4418 = vmatprep.subr.bf16.mxu1 %v7529_v36 }
 0x63a   :  { %4356 = vmatpush1.bf16.msra.mxu0 %v7530_v39  ;;  %4420 = vmatpush1.bf16.msra.mxu1 %v7531_v30 }
 0x63b   :  { %4358 = vmatprep.subr.bf16.mxu0 %v7618_v49  ;;  %4422 = vmatprep.subr.bf16.mxu1 %v7619_v6 }
 0x63e   :  { %4360 = vmatpush1.bf16.msra.mxu0 %v7620_v28  ;;  %4424 = vmatpush1.bf16.msra.mxu1 %v7621_v33 }
 0x63f   :  { %4362 = vmatprep.subr.bf16.mxu0 %v7622_v11  ;;  %4426 = vmatprep.subr.bf16.mxu1 %v7623_v53 }
 0x642   :  { %4364 = vmatpush1.bf16.msra.mxu0 %v7624_v23  ;;  %4428 = vmatpush1.bf16.msra.mxu1 %v7625_v60 }
 0x643   :  { %4366 = vmatprep.subr.bf16.mxu0 %v7626_v54  ;;  %4430 = vmatprep.subr.bf16.mxu1 %v7627_v63 }
 0x646   :  { %4368 = vmatpush1.bf16.msra.mxu0 %v7628_v52  ;;  %4432 = vmatpush1.bf16.msra.mxu1 %v7629_v59 }
 0x647   :  { %4370 = vmatprep.subr.bf16.mxu0 %v7630_v47  ;;  %4434 = vmatprep.subr.bf16.mxu1 %v7631_v56 }
 0x64a   :  { %4372 = vmatpush1.bf16.msra.mxu0 %v7546_v45  ;;  %4436 = vmatpush1.bf16.msra.mxu1 %v7547_v42 }
 0x64b   :  { %4374 = vmatprep.subr.bf16.mxu0 %v7548_v14  ;;  %4438 = vmatprep.subr.bf16.mxu1 %v7549_v21 }
 0x64e   :  { %4376 = vmatpush1.bf16.msra.mxu0 %v7550_v24  ;;  %4440 = vmatpush1.bf16.msra.mxu1 %v7551_v13 }
 0x64f   :  { %4378 = vmatprep.subr.bf16.mxu0 %v7552_v12  ;;  %4442 = vmatprep.subr.bf16.mxu1 %v7553_v8 }
 0x652   :  { %4380 = vmatpush1.bf16.msra.mxu0 %v7554_v27  ;;  %4444 = vmatpush1.bf16.msra.mxu1 %v7555_v57 }
 0x653   :  { %4382 = vmatprep.subr.bf16.mxu0 %v7556_v4  ;;  %4446 = vmatprep.subr.bf16.mxu1 %v7720_v3 }
 0x656   :  { %4384 = vmatpush1.bf16.msra.mxu0 %v7721_v41  ;;  %4448 = vmatpush1.bf16.msra.mxu1 %v7722_v44 }
 0x657   :  { %4386 = vmatprep.subr.bf16.mxu0 %v7723_v51  ;;  %4450 = vmatprep.subr.bf16.mxu1 %v7724_v32 }
 0x65a   :  { %4388 = vmatpush1.bf16.msra.mxu0 %v7725_v1  ;;  %4452 = vmatpush1.bf16.msra.mxu1 %v7726_v25  ;;  %v7737_v25 = vld [vmem:[#allocation142_spill] sm:$0xff] }
 0x65b   :  { %4390 = vmatprep.subr.bf16.mxu0 %v7727_v2  ;;  %4454 = vmatprep.subr.bf16.mxu1 %v7728_v0  ;;  %v7738_v2 = vld [vmem:[#allocation143_spill] sm:$0xff]  ;;  %v7739_v0 = vld [vmem:[#allocation144_spill] sm:$0xff] }
 0x65e   :  { %4392 = vmatpush1.bf16.msra.mxu0 %v7729_v19  ;;  %4456 = vmatpush1.bf16.msra.mxu1 %v7730_v34  ;;  %v7740_v19 = vld [vmem:[#allocation145_spill] sm:$0xff]  ;;  %v7741_v34 = vld [vmem:[#allocation146_spill] sm:$0xff] }
 0x65f   :  { %4394 = vmatprep.subr.bf16.mxu0 %v7731_v16  ;;  %4458 = vmatprep.subr.bf16.mxu1 %v7732_v61  ;;  %v7742_v16 = vld [vmem:[#allocation147_spill] sm:$0xff]  ;;  %v7743_v61 = vld [vmem:[#allocation12_spill] sm:$0xff] }
 0x662   :  { %4396 = vmatpush1.bf16.msra.mxu0 %v7733_v26  ;;  %4460 = vmatpush1.bf16.msra.mxu1 %v7734_v38  ;;  %v7744_v26 = vld [vmem:[#allocation14_spill] sm:$0xff] }
 0x663   :  { %4398 = vmatprep.subr.bf16.mxu0 %v7735_v46  ;;  %4462 = vmatprep.subr.bf16.mxu1 %v7736_v31  ;;  %v7745_v31 = vld [vmem:[#allocation13_spill] sm:$0xff]  ;;  %v7754_v46 = vld [vmem:[#allocation24_spill] sm:$0xff] }
 0x666   :  { %4400 = vmatpush1.bf16.msra.mxu0 %v7737_v25  ;;  %4464 = vmatpush1.bf16.msra.mxu1 %v7738_v2  ;;  %v7746_v25 = vld [vmem:[#allocation15_spill] sm:$0xff]  ;;  %v7747_v2 = vld [vmem:[#allocation16_spill] sm:$0xff] }
 0x667   :  { %4402 = vmatprep.subr.bf16.mxu0 %v7739_v0  ;;  %4466 = vmatprep.subr.bf16.mxu1 %v7740_v19  ;;  %v7748_v0 = vld [vmem:[#allocation17_spill] sm:$0xff]  ;;  %v7749_v19 = vld [vmem:[#allocation18_spill] sm:$0xff] }
 0x66a   :  { %4404 = vmatpush1.bf16.msra.mxu0 %v7741_v34  ;;  %4468 = vmatpush1.bf16.msra.mxu1 %v7742_v16  ;;  %v7750_v34 = vld [vmem:[#allocation20_spill] sm:$0xff]  ;;  %v7751_v16 = vld [vmem:[#allocation19_spill] sm:$0xff] }
 0x66b   :  { %4470 = vmatprep.subr.bf16.mxu0 %v7743_v61  ;;  %4534 = vmatprep.subr.bf16.mxu1 %v7744_v26  ;;  %v7752_v61 = vld [vmem:[#allocation21_spill] sm:$0xff]  ;;  %v7753_v26 = vld [vmem:[#allocation22_spill] sm:$0xff] }
 0x66d   :  { %2149 = vmatmul.mubr.f32.vlgmr.msra.gmra.mrb[22].mxu0 %v6470_v40  ;;  %2220 = vmatmul.mubr.f32.vlgmr.msra.gmra.mrb[22].mxu1 %v6470_v40  ;;  %v7755_v40 = vld [vmem:[#allocation23_spill] sm:$0xff] }
 0x66e   :  { %4472 = vmatpush1.bf16.msra.mxu0 %v7745_v31  ;;  %4536 = vmatpush1.bf16.msra.mxu1 %v7746_v25  ;;  %v7756_v31 = vld [vmem:[#allocation25_spill] sm:$0xff]  ;;  %v7757_v25 = vld [vmem:[#allocation26_spill] sm:$0xff] }
 0x66f   :  { %4474 = vmatprep.subr.bf16.mxu0 %v7747_v2  ;;  %4538 = vmatprep.subr.bf16.mxu1 %v7748_v0  ;;  %v7758_v2 = vld [vmem:[#allocation28_spill] sm:$0xff]  ;;  %v7759_v0 = vld [vmem:[#allocation27_spill] sm:$0xff] }
 0x672   :  { %4476 = vmatpush1.bf16.msra.mxu0 %v7749_v19  ;;  %4540 = vmatpush1.bf16.msra.mxu1 %v7750_v34  ;;  %v7760_v19 = vld [vmem:[#allocation29_spill] sm:$0xff]  ;;  %v7761_v34 = vld [vmem:[#allocation30_spill] sm:$0xff] }
 0x673   :  { %4478 = vmatprep.subr.bf16.mxu0 %v7751_v16  ;;  %4542 = vmatprep.subr.bf16.mxu1 %v7752_v61  ;;  %v7762_v16 = vld [vmem:[#allocation32_spill] sm:$0xff]  ;;  %v7763_v61 = vld [vmem:[#allocation31_spill] sm:$0xff] }
 0x676   :  { %4480 = vmatpush1.bf16.msra.mxu0 %v7753_v26  ;;  %4544 = vmatpush1.bf16.msra.mxu1 %v7754_v46  ;;  %v7764_v26 = vld [vmem:[#allocation33_spill] sm:$0xff]  ;;  %v7765_v46 = vld [vmem:[#allocation34_spill] sm:$0xff] }
 0x677   :  { %4482 = vmatprep.subr.bf16.mxu0 %v7755_v40  ;;  %4546 = vmatprep.subr.bf16.mxu1 %v7756_v31  ;;  %v7766_v40 = vld [vmem:[#allocation36_spill] sm:$0xff]  ;;  %v7767_v31 = vld [vmem:[#allocation35_spill] sm:$0xff] }
 0x67a   :  { %4484 = vmatpush1.bf16.msra.mxu0 %v7757_v25  ;;  %4548 = vmatpush1.bf16.msra.mxu1 %v7758_v2  ;;  %v7768_v25 = vld [vmem:[#allocation37_spill] sm:$0xff]  ;;  %v7769_v2 = vld [vmem:[#allocation38_spill] sm:$0xff] }
 0x67b   :  { %4486 = vmatprep.subr.bf16.mxu0 %v7759_v0  ;;  %4550 = vmatprep.subr.bf16.mxu1 %v7760_v19  ;;  %v7770_v0 = vld [vmem:[#allocation40_spill] sm:$0xff]  ;;  %v7771_v19 = vld [vmem:[#allocation39_spill] sm:$0xff] }
 0x67e   :  { %4488 = vmatpush1.bf16.msra.mxu0 %v7761_v34  ;;  %4552 = vmatpush1.bf16.msra.mxu1 %v7762_v16  ;;  %v7772_v34 = vld [vmem:[#allocation41_spill] sm:$0xff]  ;;  %v7773_v16 = vld [vmem:[#allocation42_spill] sm:$0xff] }
 0x67f   :  { %4490 = vmatprep.subr.bf16.mxu0 %v7763_v61  ;;  %4554 = vmatprep.subr.bf16.mxu1 %v7764_v26  ;;  %v7774_v61 = vld [vmem:[#allocation43_spill] sm:$0xff]  ;;  %v7775_v26 = vld [vmem:[#allocation44_spill] sm:$0xff] }
 0x682   :  { %4492 = vmatpush1.bf16.msra.mxu0 %v7765_v46  ;;  %4556 = vmatpush1.bf16.msra.mxu1 %v7766_v40  ;;  %v7776_v46 = vld [vmem:[#allocation45_spill] sm:$0xff]  ;;  %v7777_v40 = vld [vmem:[#allocation46_spill] sm:$0xff] }
 0x683   :  { %4494 = vmatprep.subr.bf16.mxu0 %v7767_v31  ;;  %4558 = vmatprep.subr.bf16.mxu1 %v7768_v25  ;;  %v7778_v31 = vld [vmem:[#allocation47_spill] sm:$0xff]  ;;  %v7779_v25 = vld [vmem:[#allocation48_spill] sm:$0xff] }
 0x686   :  { %4496 = vmatpush1.bf16.msra.mxu0 %v7769_v2  ;;  %4560 = vmatpush1.bf16.msra.mxu1 %v7770_v0  ;;  %v7780_v2 = vld [vmem:[#allocation49_spill] sm:$0xff]  ;;  %v7781_v0 = vld [vmem:[#allocation50_spill] sm:$0xff] }
 0x687   :  { %4498 = vmatprep.subr.bf16.mxu0 %v7771_v19  ;;  %4562 = vmatprep.subr.bf16.mxu1 %v7772_v34  ;;  %v7782_v19 = vld [vmem:[#allocation51_spill] sm:$0xff]  ;;  %v7783_v34 = vld [vmem:[#allocation52_spill] sm:$0xff] }
 0x68a   :  { %4500 = vmatpush1.bf16.msra.mxu0 %v7773_v16  ;;  %4564 = vmatpush1.bf16.msra.mxu1 %v7774_v61  ;;  %v7784_v16 = vld [vmem:[#allocation53_spill] sm:$0xff]  ;;  %v7785_v61 = vld [vmem:[#allocation54_spill] sm:$0xff] }
 0x68b   :  { %4502 = vmatprep.subr.bf16.mxu0 %v7775_v26  ;;  %4566 = vmatprep.subr.bf16.mxu1 %v7776_v46  ;;  %v7786_v26 = vld [vmem:[#allocation55_spill] sm:$0xff]  ;;  %v7787_v46 = vld [vmem:[#allocation56_spill] sm:$0xff] }
 0x68e   :  { %4504 = vmatpush1.bf16.msra.mxu0 %v7777_v40  ;;  %4568 = vmatpush1.bf16.msra.mxu1 %v7778_v31  ;;  %v7788_v40 = vld [vmem:[#allocation57_spill] sm:$0xff]  ;;  %v7789_v31 = vld [vmem:[#allocation58_spill] sm:$0xff] }
 0x68f   :  { %4506 = vmatprep.subr.bf16.mxu0 %v7779_v25  ;;  %4570 = vmatprep.subr.bf16.mxu1 %v7780_v2  ;;  %v7790_v25 = vld [vmem:[#allocation59_spill] sm:$0xff]  ;;  %v7791_v2 = vld [vmem:[#allocation60_spill] sm:$0xff] }
 0x692   :  { %4508 = vmatpush1.bf16.msra.mxu0 %v7781_v0  ;;  %4572 = vmatpush1.bf16.msra.mxu1 %v7782_v19  ;;  %v7792_v0 = vld [vmem:[#allocation61_spill] sm:$0xff]  ;;  %v7793_v19 = vld [vmem:[#allocation62_spill] sm:$0xff] }
 0x693   :  { %4510 = vmatprep.subr.bf16.mxu0 %v7783_v34  ;;  %4574 = vmatprep.subr.bf16.mxu1 %v7784_v16  ;;  %v7794_v34 = vld [vmem:[#allocation63_spill] sm:$0xff]  ;;  %v7795_v16 = vld [vmem:[#allocation64_spill] sm:$0xff] }
 0x696   :  { %4512 = vmatpush1.bf16.msra.mxu0 %v7785_v61  ;;  %4576 = vmatpush1.bf16.msra.mxu1 %v7786_v26  ;;  %v7796_v61 = vld [vmem:[#allocation65_spill] sm:$0xff]  ;;  %v7797_v26 = vld [vmem:[#allocation66_spill] sm:$0xff] }
 0x697   :  { %4514 = vmatprep.subr.bf16.mxu0 %v7787_v46  ;;  %4578 = vmatprep.subr.bf16.mxu1 %v7788_v40  ;;  %v7798_v46 = vld [vmem:[#allocation67_spill] sm:$0xff]  ;;  %v7799_v40 = vld [vmem:[#allocation68_spill] sm:$0xff] }
 0x69a   :  { %4516 = vmatpush1.bf16.msra.mxu0 %v7789_v31  ;;  %4580 = vmatpush1.bf16.msra.mxu1 %v7790_v25  ;;  %v7800_v31 = vld [vmem:[#allocation69_spill] sm:$0xff]  ;;  %v7801_v25 = vld [vmem:[#allocation70_spill] sm:$0xff] }
 0x69b   :  { %4518 = vmatprep.subr.bf16.mxu0 %v7791_v2  ;;  %4582 = vmatprep.subr.bf16.mxu1 %v7792_v0  ;;  %v7802_v2 = vld [vmem:[#allocation71_spill] sm:$0xff]  ;;  %v7803_v0 = vld [vmem:[#allocation72_spill] sm:$0xff] }
 0x69e   :  { %4520 = vmatpush1.bf16.msra.mxu0 %v7793_v19  ;;  %4584 = vmatpush1.bf16.msra.mxu1 %v7794_v34  ;;  %v7804_v19 = vld [vmem:[#allocation73_spill] sm:$0xff]  ;;  %v7805_v34 = vld [vmem:[#allocation74_spill] sm:$0xff] }
 0x69f   :  { %4522 = vmatprep.subr.bf16.mxu0 %v7795_v16  ;;  %4586 = vmatprep.subr.bf16.mxu1 %v7796_v61  ;;  %v7806_v16 = vld [vmem:[#allocation75_spill] sm:$0xff]  ;;  %v7807_v61 = vld [vmem:[#allocation76_spill] sm:$0xff] }
 0x6a2   :  { %4524 = vmatpush1.bf16.msra.mxu0 %v7797_v26  ;;  %4588 = vmatpush1.bf16.msra.mxu1 %v7798_v46  ;;  %v7808_v26 = vld [vmem:[#allocation77_spill] sm:$0xff] }
 0x6a3   :  { %4526 = vmatprep.subr.bf16.mxu0 %v7799_v40  ;;  %4590 = vmatprep.subr.bf16.mxu1 %v7800_v31 }
 0x6a6   :  { %4528 = vmatpush1.bf16.msra.mxu0 %v7801_v25  ;;  %4592 = vmatpush1.bf16.msra.mxu1 %v7802_v2  ;;  %v7809_v2 = vld [vmem:[#allocation88_spill] sm:$0xff] }
 0x6a7   :  { %4530 = vmatprep.subr.bf16.mxu0 %v7803_v0  ;;  %4594 = vmatprep.subr.bf16.mxu1 %v7804_v19 }
 0x6aa   :  { %4532 = vmatpush1.bf16.msra.mxu0 %v7805_v34  ;;  %4596 = vmatpush1.bf16.msra.mxu1 %v7806_v16 }
 0x6ab   :  { %4598 = vmatprep.subr.bf16.mxu0 %v7807_v61  ;;  %4662 = vmatprep.subr.bf16.mxu1 %v7808_v26  ;;  %v7810_v61 = vld [vmem:[#allocation91_spill] sm:$0xff] }
 0x700   :  { %v2008_v46 = vpop.f32.mrb[20].mxu0  ;;  %v2079_v40 = vpop.f32.mrb[20].mxu1 }
 0x701   :  { %v2230_v38 = vrot.slane %v2008_v46, 6  ;;  %v2232_v31 = vrot.slane %v2079_v40, 6  ;;  %v2010_v1 = vpop.f32.mrb[21].mxu0  ;;  %v2081_v25 = vpop.f32.mrb[21].mxu1 }
 0x702   :  { %v2231_v32 = vrot.slane %v2010_v1, 6  ;;  %v2233_v16 = vrot.slane %v2081_v25, 6 }
 0x703   :  { %v2238_v51 = vadd.f32 %v2230_v38, %v7809_v2  ;;  %v2240_v34 = vadd.f32 %v2232_v31, %v6456_v50  ;;  %v2253_v38 = vrot.slane %v6467_v9, 6 }
 0x704   :  { %v2239_v0 = vadd.f32 %v2231_v32, %v6452_v58  ;;  %v2241_v19 = vadd.f32 %v2233_v16, %v7810_v61 }
 0x705   :  { %5210 = vtanh.f32 %v2238_v51 }
 0x706   :  { %5212 = vtanh.f32 %v2239_v0 }
 0x707   :  { %5214 = vtanh.f32 %v2240_v34 }
 0x708   :  { %5216 = vtanh.f32 %v2241_v19 }
 0x70f   :  { %v5211_v26 = vpop.eup %5210 }
 0x710   :  { %v2246_v44 = vmul.f32 0.5, %v5211_v26  ;;  %v5213_v41 = vpop.eup %5212 }
 0x711   :  { %v2248_v40 = vmul.f32 0.5, %v5213_v41  ;;  %v5215_v3 = vpop.eup %5214 }
 0x712   :  { %v2247_v46 = vadd.f32 0.5, %v2246_v44  ;;  %v5217_v0 = vpop.eup %5216  ;;  %v7811_v44 = vld [vmem:[#allocation78_spill] sm:$0xff] }
 0x713   :  { %v2249_v1 = vadd.f32 0.5, %v2248_v40  ;;  %v2250_v25 = vmul.f32 0.5, %v5217_v0 }
 0x714   :  { %v2256_v2 = vmul.f32 %v5215_v3, %v2247_v46 }
 0x715   :  { %v2255_v32 = vmul.f32 %v2253_v38, %v2249_v1  ;;  %v2251_v34 = vadd.f32 0.5, %v2250_v25 }
 0x717   :  { %v6617_v51 = vadd.f32 %v2256_v2, %v2255_v32 }
 0x719   :  { %5218 = vtanh.f32 %v6617_v51 }
 0x723   :  { %v5219_v16 = vpop.eup %5218 }
 0x724   :  { %v2259_v31 = vmul.f32 %v5219_v16, %v2251_v34 }
 0x740   :  { %v2150_v26 = vpop.f32.mrb[22].mxu0  ;;  %v2221_v61 = vpop.f32.mrb[22].mxu1 }
 0x741   :  { %v2260_v41 = vadd.f32 %v2150_v26, %v7811_v44  ;;  %v2152_v19 = vpop.f32.mrb[23].mxu0  ;;  %v2223_v50 = vpop.f32.mrb[23].mxu1  ;;  %v2262_v9 = vadd.f32 %v2221_v61, %v5999_v17 }
 0x742   :  { %v2261_v40 = vadd.f32 %v2152_v19, %v7525_v62  ;;  %v2263_v3 = vadd.f32 %v2223_v50, %v6006_v35 }
 0x743   :  { %5220 = vtanh.f32 %v2260_v41 }
 0x744   :  { %5222 = vtanh.f32 %v2261_v40 }
 0x745   :  { %5224 = vtanh.f32 %v2262_v9 }
 0x746   :  { %5226 = vtanh.f32 %v2263_v3  ;;  %v7814_v3 = vld [vmem:[#allocation127_spill] sm:$0xff] }
 0x74d   :  { %v5221_v2 = vpop.eup %5220 }
 0x74e   :  { %v2268_v46 = vmul.f32 0.5, %v5221_v2  ;;  %v5223_v1 = vpop.eup %5222 }
 0x74f   :  { %v2270_v32 = vmul.f32 0.5, %v5223_v1  ;;  %v5225_v0 = vpop.eup %5224  ;;  %v7815_v1 = vld [vmem:[#allocation128_spill] sm:$0xff] }
 0x750   :  { %v2269_v38 = vadd.f32 0.5, %v2268_v46  ;;  %v5227_v61 = vpop.eup %5226  ;;  %v6628_v46 = vrot.slane %v2259_v31, 2  ;;  %v7813_v31 = vld [vmem:[#allocation126_spill] sm:$0xff] }
 0x751   :  { %v2271_v25 = vadd.f32 0.5, %v2270_v32  ;;  %v2272_v41 = vmul.f32 0.5, %v5227_v61  ;;  %v7817_v32 = vld [vmem:[#allocation130_spill] sm:$0xff]  ;;  %v7822_v61 = vld [vmem:[#allocation135_spill] sm:$0xff] }
 0x752   :  { %v2275_v34 = vmul.f32 %v5225_v0, %v2269_v38  ;;  %v7816_v38 = vld [vmem:[#allocation129_spill] sm:$0xff]  ;;  %v7818_v0 = vld [vmem:[#allocation131_spill] sm:$0xff] }
 0x753   :  { %v2274_v16 = vmul.f32 %v2271_v25, %v6477_v18  ;;  %v2273_v19 = vadd.f32 0.5, %v2272_v41  ;;  %v7812_v18 = vld [vmem:[#allocation125_spill] sm:$0xff]  ;;  %v7819_v25 = vld [vmem:[#allocation132_spill] sm:$0xff] }
 0x754   :  { %v7823_v41 = vld [vmem:[#allocation136_spill] sm:$0xff] }
 0x755   :  { %v6625_v26 = vadd.f32 %v2275_v34, %v2274_v16  ;;  %v7820_v34 = vld [vmem:[#allocation133_spill] sm:$0xff]  ;;  %v7821_v16 = vld [vmem:[#allocation134_spill] sm:$0xff] }
 0x757   :  { %5228 = vtanh.f32 %v6625_v26 }
 0x761   :  { %v5229_v40 = vpop.eup %5228 }
 0x762   :  { %v2278_v50 = vmul.f32 %v5229_v40, %v2273_v19  ;;  %v7824_v19 = vld [vmem:[#allocation137_spill] sm:$0xff]  ;;  %v7825_v40 = vld [vmem:[#allocation138_spill] sm:$0xff] }
 0x764   :  { %2279 = vst [vmem:[#allocation8 + $0x8] sm:$0x3] %v2278_v50  ;;  %v2281_v9 = vrot.slane %v2278_v50, 6  ;;  %v7826_v50 = vld [vmem:[#allocation139_spill] sm:$0xff] }
 0x766   :  { %v2284_v2 = vrot.slane %v2281_v9, 2  ;;  %v7827_v9 = vld [vmem:[#allocation140_spill] sm:$0xff] }
 0x768   :  { %2351 = vmatprep.mubr.f32.mxu0 %v2284_v2  ;;  %2422 = vmatprep.mubr.f32.mxu1 %v2284_v2 }
 0x769   :  { %2352 = vmatmul.mubr.f32.vlgmr.msra.gmra.mrb[24].mxu0 %v6628_v46  ;;  %2423 = vmatmul.mubr.f32.vlgmr.msra.gmra.mrb[24].mxu1 %v6628_v46 }
 0x76a   :  { %4600 = vmatpush1.bf16.msra.mxu0 %v5710_v20  ;;  %4664 = vmatpush1.bf16.msra.mxu1 %v7434_v10 }
 0x76b   :  { %2493 = vmatprep.mubr.f32.mxu0 %v2284_v2  ;;  %2564 = vmatprep.mubr.f32.mxu1 %v2284_v2  ;;  %v7828_v2 = vld [vmem:[#allocation141_spill] sm:$0xff] }
 0x76c   :  { %4602 = vmatprep.subr.bf16.mxu0 %v5716_v37  ;;  %4666 = vmatprep.subr.bf16.mxu1 %v7435_v7 }
 0x76e   :  { %4604 = vmatpush1.bf16.msra.mxu0 %v7436_v55  ;;  %4668 = vmatpush1.bf16.msra.mxu1 %v7437_v43 }
 0x76f   :  { %4606 = vmatprep.subr.bf16.mxu0 %v7438_v48  ;;  %4670 = vmatprep.subr.bf16.mxu1 %v7439_v5 }
 0x772   :  { %4608 = vmatpush1.bf16.msra.mxu0 %v7526_v22  ;;  %4672 = vmatpush1.bf16.msra.mxu1 %v7527_v29 }
 0x773   :  { %4610 = vmatprep.subr.bf16.mxu0 %v7528_v15  ;;  %4674 = vmatprep.subr.bf16.mxu1 %v7529_v36 }
 0x776   :  { %4612 = vmatpush1.bf16.msra.mxu0 %v7530_v39  ;;  %4676 = vmatpush1.bf16.msra.mxu1 %v7531_v30 }
 0x777   :  { %4614 = vmatprep.subr.bf16.mxu0 %v7618_v49  ;;  %4678 = vmatprep.subr.bf16.mxu1 %v7619_v6 }
 0x77a   :  { %4616 = vmatpush1.bf16.msra.mxu0 %v7620_v28  ;;  %4680 = vmatpush1.bf16.msra.mxu1 %v7621_v33 }
 0x77b   :  { %4618 = vmatprep.subr.bf16.mxu0 %v7622_v11  ;;  %4682 = vmatprep.subr.bf16.mxu1 %v7623_v53 }
 0x77e   :  { %4620 = vmatpush1.bf16.msra.mxu0 %v7624_v23  ;;  %4684 = vmatpush1.bf16.msra.mxu1 %v7625_v60 }
 0x77f   :  { %4622 = vmatprep.subr.bf16.mxu0 %v7626_v54  ;;  %4686 = vmatprep.subr.bf16.mxu1 %v7627_v63 }
 0x782   :  { %4624 = vmatpush1.bf16.msra.mxu0 %v7628_v52  ;;  %4688 = vmatpush1.bf16.msra.mxu1 %v7629_v59 }
 0x783   :  { %4626 = vmatprep.subr.bf16.mxu0 %v7630_v47  ;;  %4690 = vmatprep.subr.bf16.mxu1 %v7631_v56 }
 0x786   :  { %4628 = vmatpush1.bf16.msra.mxu0 %v7546_v45  ;;  %4692 = vmatpush1.bf16.msra.mxu1 %v7547_v42 }
 0x787   :  { %4630 = vmatprep.subr.bf16.mxu0 %v7548_v14  ;;  %4694 = vmatprep.subr.bf16.mxu1 %v7549_v21 }
 0x78a   :  { %4632 = vmatpush1.bf16.msra.mxu0 %v7550_v24  ;;  %4696 = vmatpush1.bf16.msra.mxu1 %v7551_v13 }
 0x78b   :  { %4634 = vmatprep.subr.bf16.mxu0 %v7552_v12  ;;  %4698 = vmatprep.subr.bf16.mxu1 %v7553_v8 }
 0x78e   :  { %4636 = vmatpush1.bf16.msra.mxu0 %v7554_v27  ;;  %4700 = vmatpush1.bf16.msra.mxu1 %v7555_v57 }
 0x78f   :  { %4638 = vmatprep.subr.bf16.mxu0 %v7556_v4  ;;  %4702 = vmatprep.subr.bf16.mxu1 %v7812_v18 }
 0x792   :  { %4640 = vmatpush1.bf16.msra.mxu0 %v7813_v31  ;;  %4704 = vmatpush1.bf16.msra.mxu1 %v7814_v3 }
 0x793   :  { %4642 = vmatprep.subr.bf16.mxu0 %v7815_v1  ;;  %4706 = vmatprep.subr.bf16.mxu1 %v7816_v38 }
 0x796   :  { %4644 = vmatpush1.bf16.msra.mxu0 %v7817_v32  ;;  %4708 = vmatpush1.bf16.msra.mxu1 %v7818_v0  ;;  %v7829_v0 = vld [vmem:[#allocation142_spill] sm:$0xff] }
 0x797   :  { %4646 = vmatprep.subr.bf16.mxu0 %v7819_v25  ;;  %4710 = vmatprep.subr.bf16.mxu1 %v7820_v34  ;;  %v7830_v25 = vld [vmem:[#allocation143_spill] sm:$0xff]  ;;  %v7831_v34 = vld [vmem:[#allocation144_spill] sm:$0xff] }
 0x79a   :  { %4648 = vmatpush1.bf16.msra.mxu0 %v7821_v16  ;;  %4712 = vmatpush1.bf16.msra.mxu1 %v7822_v61  ;;  %v7832_v16 = vld [vmem:[#allocation145_spill] sm:$0xff]  ;;  %v7833_v61 = vld [vmem:[#allocation146_spill] sm:$0xff] }
 0x79b   :  { %4650 = vmatprep.subr.bf16.mxu0 %v7823_v41  ;;  %4714 = vmatprep.subr.bf16.mxu1 %v7824_v19  ;;  %v7834_v41 = vld [vmem:[#allocation147_spill] sm:$0xff]  ;;  %v7835_v19 = vld [vmem:[#allocation12_spill] sm:$0xff] }
 0x79e   :  { %4652 = vmatpush1.bf16.msra.mxu0 %v7825_v40  ;;  %4716 = vmatpush1.bf16.msra.mxu1 %v7826_v50  ;;  %v7836_v40 = vld [vmem:[#allocation14_spill] sm:$0xff] }
 0x79f   :  { %4654 = vmatprep.subr.bf16.mxu0 %v7827_v9  ;;  %4718 = vmatprep.subr.bf16.mxu1 %v7828_v2  ;;  %v7837_v2 = vld [vmem:[#allocation13_spill] sm:$0xff]  ;;  %v7846_v9 = vld [vmem:[#allocation24_spill] sm:$0xff] }
 0x7a2   :  { %4656 = vmatpush1.bf16.msra.mxu0 %v7829_v0  ;;  %4720 = vmatpush1.bf16.msra.mxu1 %v7830_v25  ;;  %v7838_v0 = vld [vmem:[#allocation15_spill] sm:$0xff]  ;;  %v7839_v25 = vld [vmem:[#allocation16_spill] sm:$0xff] }
 0x7a3   :  { %4658 = vmatprep.subr.bf16.mxu0 %v7831_v34  ;;  %4722 = vmatprep.subr.bf16.mxu1 %v7832_v16  ;;  %v7840_v34 = vld [vmem:[#allocation17_spill] sm:$0xff]  ;;  %v7841_v16 = vld [vmem:[#allocation18_spill] sm:$0xff] }
 0x7a6   :  { %4660 = vmatpush1.bf16.msra.mxu0 %v7833_v61  ;;  %4724 = vmatpush1.bf16.msra.mxu1 %v7834_v41  ;;  %v7842_v61 = vld [vmem:[#allocation20_spill] sm:$0xff]  ;;  %v7843_v41 = vld [vmem:[#allocation19_spill] sm:$0xff] }
 0x7a7   :  { %4726 = vmatprep.subr.bf16.mxu0 %v7835_v19  ;;  %4790 = vmatprep.subr.bf16.mxu1 %v7836_v40  ;;  %v7844_v19 = vld [vmem:[#allocation21_spill] sm:$0xff]  ;;  %v7845_v40 = vld [vmem:[#allocation22_spill] sm:$0xff] }
 0x7a9   :  { %2494 = vmatmul.mubr.f32.vlgmr.msra.gmra.mrb[26].mxu0 %v6628_v46  ;;  %2565 = vmatmul.mubr.f32.vlgmr.msra.gmra.mrb[26].mxu1 %v6628_v46  ;;  %v7847_v46 = vld [vmem:[#allocation23_spill] sm:$0xff] }
 0x7aa   :  { %4728 = vmatpush1.bf16.msra.mxu0 %v7837_v2  ;;  %4792 = vmatpush1.bf16.msra.mxu1 %v7838_v0  ;;  %v7848_v2 = vld [vmem:[#allocation25_spill] sm:$0xff]  ;;  %v7849_v0 = vld [vmem:[#allocation26_spill] sm:$0xff] }
 0x7ab   :  { %4730 = vmatprep.subr.bf16.mxu0 %v7839_v25  ;;  %4794 = vmatprep.subr.bf16.mxu1 %v7840_v34  ;;  %v7850_v25 = vld [vmem:[#allocation28_spill] sm:$0xff]  ;;  %v7851_v34 = vld [vmem:[#allocation27_spill] sm:$0xff] }
 0x7ae   :  { %4732 = vmatpush1.bf16.msra.mxu0 %v7841_v16  ;;  %4796 = vmatpush1.bf16.msra.mxu1 %v7842_v61  ;;  %v7852_v16 = vld [vmem:[#allocation29_spill] sm:$0xff]  ;;  %v7853_v61 = vld [vmem:[#allocation30_spill] sm:$0xff] }
 0x7af   :  { %4734 = vmatprep.subr.bf16.mxu0 %v7843_v41  ;;  %4798 = vmatprep.subr.bf16.mxu1 %v7844_v19  ;;  %v7854_v41 = vld [vmem:[#allocation32_spill] sm:$0xff]  ;;  %v7855_v19 = vld [vmem:[#allocation31_spill] sm:$0xff] }
 0x7b2   :  { %4736 = vmatpush1.bf16.msra.mxu0 %v7845_v40  ;;  %4800 = vmatpush1.bf16.msra.mxu1 %v7846_v9  ;;  %v7856_v40 = vld [vmem:[#allocation33_spill] sm:$0xff]  ;;  %v7857_v9 = vld [vmem:[#allocation34_spill] sm:$0xff] }
 0x7b3   :  { %4738 = vmatprep.subr.bf16.mxu0 %v7847_v46  ;;  %4802 = vmatprep.subr.bf16.mxu1 %v7848_v2  ;;  %v7858_v46 = vld [vmem:[#allocation36_spill] sm:$0xff]  ;;  %v7859_v2 = vld [vmem:[#allocation35_spill] sm:$0xff] }
 0x7b6   :  { %4740 = vmatpush1.bf16.msra.mxu0 %v7849_v0  ;;  %4804 = vmatpush1.bf16.msra.mxu1 %v7850_v25  ;;  %v7860_v0 = vld [vmem:[#allocation37_spill] sm:$0xff]  ;;  %v7861_v25 = vld [vmem:[#allocation38_spill] sm:$0xff] }
 0x7b7   :  { %4742 = vmatprep.subr.bf16.mxu0 %v7851_v34  ;;  %4806 = vmatprep.subr.bf16.mxu1 %v7852_v16  ;;  %v7862_v34 = vld [vmem:[#allocation40_spill] sm:$0xff]  ;;  %v7863_v16 = vld [vmem:[#allocation39_spill] sm:$0xff] }
 0x7ba   :  { %4744 = vmatpush1.bf16.msra.mxu0 %v7853_v61  ;;  %4808 = vmatpush1.bf16.msra.mxu1 %v7854_v41  ;;  %v7864_v61 = vld [vmem:[#allocation41_spill] sm:$0xff]  ;;  %v7865_v41 = vld [vmem:[#allocation42_spill] sm:$0xff] }
 0x7bb   :  { %4746 = vmatprep.subr.bf16.mxu0 %v7855_v19  ;;  %4810 = vmatprep.subr.bf16.mxu1 %v7856_v40  ;;  %v7866_v19 = vld [vmem:[#allocation43_spill] sm:$0xff]  ;;  %v7867_v40 = vld [vmem:[#allocation44_spill] sm:$0xff] }
 0x7be   :  { %4748 = vmatpush1.bf16.msra.mxu0 %v7857_v9  ;;  %4812 = vmatpush1.bf16.msra.mxu1 %v7858_v46  ;;  %v7868_v9 = vld [vmem:[#allocation45_spill] sm:$0xff]  ;;  %v7869_v46 = vld [vmem:[#allocation46_spill] sm:$0xff] }
 0x7bf   :  { %4750 = vmatprep.subr.bf16.mxu0 %v7859_v2  ;;  %4814 = vmatprep.subr.bf16.mxu1 %v7860_v0  ;;  %v7870_v2 = vld [vmem:[#allocation47_spill] sm:$0xff]  ;;  %v7871_v0 = vld [vmem:[#allocation48_spill] sm:$0xff] }
 0x7c2   :  { %4752 = vmatpush1.bf16.msra.mxu0 %v7861_v25  ;;  %4816 = vmatpush1.bf16.msra.mxu1 %v7862_v34  ;;  %v7872_v25 = vld [vmem:[#allocation49_spill] sm:$0xff]  ;;  %v7873_v34 = vld [vmem:[#allocation50_spill] sm:$0xff] }
 0x7c3   :  { %4754 = vmatprep.subr.bf16.mxu0 %v7863_v16  ;;  %4818 = vmatprep.subr.bf16.mxu1 %v7864_v61  ;;  %v7874_v16 = vld [vmem:[#allocation51_spill] sm:$0xff]  ;;  %v7875_v61 = vld [vmem:[#allocation52_spill] sm:$0xff] }
 0x7c6   :  { %4756 = vmatpush1.bf16.msra.mxu0 %v7865_v41  ;;  %4820 = vmatpush1.bf16.msra.mxu1 %v7866_v19  ;;  %v7876_v41 = vld [vmem:[#allocation53_spill] sm:$0xff]  ;;  %v7877_v19 = vld [vmem:[#allocation54_spill] sm:$0xff] }
 0x7c7   :  { %4758 = vmatprep.subr.bf16.mxu0 %v7867_v40  ;;  %4822 = vmatprep.subr.bf16.mxu1 %v7868_v9  ;;  %v7878_v40 = vld [vmem:[#allocation55_spill] sm:$0xff]  ;;  %v7879_v9 = vld [vmem:[#allocation56_spill] sm:$0xff] }
 0x7ca   :  { %4760 = vmatpush1.bf16.msra.mxu0 %v7869_v46  ;;  %4824 = vmatpush1.bf16.msra.mxu1 %v7870_v2  ;;  %v7880_v46 = vld [vmem:[#allocation57_spill] sm:$0xff]  ;;  %v7881_v2 = vld [vmem:[#allocation58_spill] sm:$0xff] }
 0x7cb   :  { %4762 = vmatprep.subr.bf16.mxu0 %v7871_v0  ;;  %4826 = vmatprep.subr.bf16.mxu1 %v7872_v25  ;;  %v7882_v0 = vld [vmem:[#allocation59_spill] sm:$0xff]  ;;  %v7883_v25 = vld [vmem:[#allocation60_spill] sm:$0xff] }
 0x7ce   :  { %4764 = vmatpush1.bf16.msra.mxu0 %v7873_v34  ;;  %4828 = vmatpush1.bf16.msra.mxu1 %v7874_v16  ;;  %v7884_v34 = vld [vmem:[#allocation61_spill] sm:$0xff]  ;;  %v7885_v16 = vld [vmem:[#allocation62_spill] sm:$0xff] }
 0x7cf   :  { %4766 = vmatprep.subr.bf16.mxu0 %v7875_v61  ;;  %4830 = vmatprep.subr.bf16.mxu1 %v7876_v41  ;;  %v7886_v61 = vld [vmem:[#allocation63_spill] sm:$0xff]  ;;  %v7887_v41 = vld [vmem:[#allocation64_spill] sm:$0xff] }
 0x7d2   :  { %4768 = vmatpush1.bf16.msra.mxu0 %v7877_v19  ;;  %4832 = vmatpush1.bf16.msra.mxu1 %v7878_v40  ;;  %v7888_v19 = vld [vmem:[#allocation65_spill] sm:$0xff]  ;;  %v7889_v40 = vld [vmem:[#allocation66_spill] sm:$0xff] }
 0x7d3   :  { %4770 = vmatprep.subr.bf16.mxu0 %v7879_v9  ;;  %4834 = vmatprep.subr.bf16.mxu1 %v7880_v46  ;;  %v7890_v9 = vld [vmem:[#allocation67_spill] sm:$0xff]  ;;  %v7891_v46 = vld [vmem:[#allocation68_spill] sm:$0xff] }
 0x7d6   :  { %4772 = vmatpush1.bf16.msra.mxu0 %v7881_v2  ;;  %4836 = vmatpush1.bf16.msra.mxu1 %v7882_v0  ;;  %v7892_v2 = vld [vmem:[#allocation69_spill] sm:$0xff]  ;;  %v7893_v0 = vld [vmem:[#allocation70_spill] sm:$0xff] }
 0x7d7   :  { %4774 = vmatprep.subr.bf16.mxu0 %v7883_v25  ;;  %4838 = vmatprep.subr.bf16.mxu1 %v7884_v34  ;;  %v7894_v25 = vld [vmem:[#allocation71_spill] sm:$0xff]  ;;  %v7895_v34 = vld [vmem:[#allocation72_spill] sm:$0xff] }
 0x7da   :  { %4776 = vmatpush1.bf16.msra.mxu0 %v7885_v16  ;;  %4840 = vmatpush1.bf16.msra.mxu1 %v7886_v61  ;;  %v7896_v16 = vld [vmem:[#allocation73_spill] sm:$0xff]  ;;  %v7897_v61 = vld [vmem:[#allocation74_spill] sm:$0xff] }
 0x7db   :  { %4778 = vmatprep.subr.bf16.mxu0 %v7887_v41  ;;  %4842 = vmatprep.subr.bf16.mxu1 %v7888_v19  ;;  %v7898_v41 = vld [vmem:[#allocation75_spill] sm:$0xff]  ;;  %v7899_v19 = vld [vmem:[#allocation76_spill] sm:$0xff] }
 0x7de   :  { %4780 = vmatpush1.bf16.msra.mxu0 %v7889_v40  ;;  %4844 = vmatpush1.bf16.msra.mxu1 %v7890_v9  ;;  %v7900_v40 = vld [vmem:[#allocation77_spill] sm:$0xff] }
 0x7df   :  { %4782 = vmatprep.subr.bf16.mxu0 %v7891_v46  ;;  %4846 = vmatprep.subr.bf16.mxu1 %v7892_v2 }
 0x7e2   :  { %4784 = vmatpush1.bf16.msra.mxu0 %v7893_v0  ;;  %4848 = vmatpush1.bf16.msra.mxu1 %v7894_v25  ;;  %v7901_v25 = vld [vmem:[#allocation88_spill] sm:$0xff] }
 0x7e3   :  { %4786 = vmatprep.subr.bf16.mxu0 %v7895_v34  ;;  %4850 = vmatprep.subr.bf16.mxu1 %v7896_v16  ;;  %v7902_v16 = vld [vmem:[#allocation90_spill] sm:$0xff] }
 0x7e6   :  { %4788 = vmatpush1.bf16.msra.mxu0 %v7897_v61  ;;  %4852 = vmatpush1.bf16.msra.mxu1 %v7898_v41 }
 0x7e7   :  { %4854 = vmatprep.subr.bf16.mxu0 %v7899_v19  ;;  %4918 = vmatprep.subr.bf16.mxu1 %v7900_v40  ;;  %v7903_v19 = vld [vmem:[#allocation91_spill] sm:$0xff] }
 0x83c   :  { %v2353_v9 = vpop.f32.mrb[24].mxu0  ;;  %v2424_v46 = vpop.f32.mrb[24].mxu1 }
 0x83d   :  { %v2575_v50 = vrot.slane %v2353_v9, 4  ;;  %v2577_v2 = vrot.slane %v2424_v46, 4  ;;  %v2355_v32 = vpop.f32.mrb[25].mxu0  ;;  %v2426_v0 = vpop.f32.mrb[25].mxu1 }
 0x83e   :  { %v2576_v38 = vrot.slane %v2355_v32, 4  ;;  %v2578_v41 = vrot.slane %v2426_v0, 4 }
 0x83f   :  { %v2583_v1 = vadd.f32 %v2575_v50, %v7901_v25  ;;  %v2585_v61 = vadd.f32 %v2577_v2, %v7902_v16  ;;  %v2598_v50 = vrot.slane %v6617_v51, 6  ;;  %v7929_v16 = vld [vmem:[#allocation147_spill] sm:$0xff] }
 0x840   :  { %v2584_v34 = vadd.f32 %v2576_v38, %v6452_v58  ;;  %v2586_v3 = vadd.f32 %v2578_v41, %v7903_v19  ;;  %v7930_v58 = vld [vmem:[#allocation76_spill] sm:$0xff] }
 0x841   :  { %5230 = vtanh.f32 %v2583_v1 }
 0x842   :  { %5232 = vtanh.f32 %v2584_v34 }
 0x843   :  { %5234 = vtanh.f32 %v2585_v61 }
 0x844   :  { %5236 = vtanh.f32 %v2586_v3 }
 0x84b   :  { %v5231_v40 = vpop.eup %5230 }
 0x84c   :  { %v2591_v31 = vmul.f32 0.5, %v5231_v40  ;;  %v5233_v18 = vpop.eup %5232 }
 0x84d   :  { %v2593_v46 = vmul.f32 0.5, %v5233_v18  ;;  %v5235_v4 = vpop.eup %5234 }
 0x84e   :  { %v2592_v9 = vadd.f32 0.5, %v2591_v31  ;;  %v5237_v2 = vpop.eup %5236 }
 0x84f   :  { %v2594_v32 = vadd.f32 0.5, %v2593_v46  ;;  %v2595_v0 = vmul.f32 0.5, %v5237_v2 }
 0x850   :  { %v2601_v25 = vmul.f32 %v5235_v4, %v2592_v9 }
 0x851   :  { %v2600_v38 = vmul.f32 %v2598_v50, %v2594_v32  ;;  %v2596_v34 = vadd.f32 0.5, %v2595_v0 }
 0x853   :  { %v6767_v1 = vadd.f32 %v2601_v25, %v2600_v38 }
 0x855   :  { %7904 = vst [vmem:[#allocation92_spill] sm:$0xff] %v6767_v1  ;;  %5238 = vtanh.f32 %v6767_v1  ;;  %v7928_v1 = vld [vmem:[#allocation146_spill] sm:$0xff] }
 0x85f   :  { %v5239_v61 = vpop.eup %5238 }
 0x860   :  { %v2604_v41 = vmul.f32 %v5239_v61, %v2596_v34 }
 0x87c   :  { %v2495_v40 = vpop.f32.mrb[26].mxu0  ;;  %v2566_v19 = vpop.f32.mrb[26].mxu1 }
 0x87d   :  { %v2605_v18 = vadd.f32 %v2495_v40, %v7811_v44  ;;  %v2497_v31 = vpop.f32.mrb[27].mxu0  ;;  %v2568_v3 = vpop.f32.mrb[27].mxu1  ;;  %v2607_v4 = vadd.f32 %v2566_v19, %v5999_v17  ;;  %v7925_v17 = vld [vmem:[#allocation143_spill] sm:$0xff]  ;;  %v7927_v44 = vld [vmem:[#allocation145_spill] sm:$0xff] }
 0x87e   :  { %v2606_v46 = vadd.f32 %v2497_v31, %v7525_v62  ;;  %v2608_v51 = vadd.f32 %v2568_v3, %v6006_v35  ;;  %v7924_v35 = vld [vmem:[#allocation142_spill] sm:$0xff]  ;;  %v7926_v62 = vld [vmem:[#allocation144_spill] sm:$0xff] }
 0x87f   :  { %5240 = vtanh.f32 %v2605_v18 }
 0x880   :  { %5242 = vtanh.f32 %v2606_v46 }
 0x881   :  { %5244 = vtanh.f32 %v2607_v4 }
 0x882   :  { %5246 = vtanh.f32 %v2608_v51  ;;  %v7908_v51 = vld [vmem:[#allocation126_spill] sm:$0xff] }
 0x889   :  { %v5241_v25 = vpop.eup %5240 }
 0x88a   :  { %v2613_v9 = vmul.f32 0.5, %v5241_v25  ;;  %v5243_v32 = vpop.eup %5242 }
 0x88b   :  { %v2615_v38 = vmul.f32 0.5, %v5243_v32  ;;  %v5245_v2 = vpop.eup %5244  ;;  %v7909_v32 = vld [vmem:[#allocation127_spill] sm:$0xff] }
 0x88c   :  { %v2614_v50 = vadd.f32 0.5, %v2613_v9  ;;  %v5247_v19 = vpop.eup %5246  ;;  %v6778_v9 = vrot.slane %v2604_v41, 4  ;;  %v7907_v41 = vld [vmem:[#allocation125_spill] sm:$0xff] }
 0x88d   :  { %v2616_v0 = vadd.f32 0.5, %v2615_v38  ;;  %v2617_v18 = vmul.f32 0.5, %v5247_v19  ;;  %v7911_v38 = vld [vmem:[#allocation129_spill] sm:$0xff]  ;;  %v7916_v19 = vld [vmem:[#allocation134_spill] sm:$0xff] }
 0x88e   :  { %v2620_v34 = vmul.f32 %v5245_v2, %v2614_v50  ;;  %v7910_v50 = vld [vmem:[#allocation128_spill] sm:$0xff]  ;;  %v7912_v2 = vld [vmem:[#allocation130_spill] sm:$0xff] }
 0x88f   :  { %v2619_v61 = vmul.f32 %v2616_v0, %v6625_v26  ;;  %v2618_v31 = vadd.f32 0.5, %v2617_v18  ;;  %v7906_v26 = vld [vmem:[#allocation124_spill] sm:$0xff]  ;;  %v7913_v0 = vld [vmem:[#allocation131_spill] sm:$0xff] }
 0x890   :  { %v7917_v18 = vld [vmem:[#allocation135_spill] sm:$0xff] }
 0x891   :  { %v6775_v40 = vadd.f32 %v2620_v34, %v2619_v61  ;;  %v7914_v34 = vld [vmem:[#allocation132_spill] sm:$0xff]  ;;  %v7915_v61 = vld [vmem:[#allocation133_spill] sm:$0xff] }
 0x893   :  { %7905 = vst [vmem:[#allocation93_spill] sm:$0xff] %v6775_v40  ;;  %5248 = vtanh.f32 %v6775_v40  ;;  %v7923_v40 = vld [vmem:[#allocation141_spill] sm:$0xff] }
 0x89d   :  { %v5249_v46 = vpop.eup %5248 }
 0x89e   :  { %v2623_v3 = vmul.f32 %v5249_v46, %v2618_v31  ;;  %v7918_v31 = vld [vmem:[#allocation136_spill] sm:$0xff]  ;;  %v7919_v46 = vld [vmem:[#allocation137_spill] sm:$0xff] }
 0x8a0   :  { %2624 = vst [vmem:[#allocation8 + $0xa] sm:$0x3] %v2623_v3  ;;  %v2626_v4 = vrot.slane %v2623_v3, 4  ;;  %v7920_v3 = vld [vmem:[#allocation138_spill] sm:$0xff] }
 0x8a2   :  { %v2629_v25 = vrot.slane %v2626_v4, 4  ;;  %v7921_v4 = vld [vmem:[#allocation139_spill] sm:$0xff] }
 0x8a4   :  { %2696 = vmatprep.mubr.f32.mxu0 %v2629_v25  ;;  %2767 = vmatprep.mubr.f32.mxu1 %v2629_v25 }
 0x8a5   :  { %2697 = vmatmul.mubr.f32.vlgmr.msra.gmra.mrb[28].mxu0 %v6778_v9  ;;  %2768 = vmatmul.mubr.f32.vlgmr.msra.gmra.mrb[28].mxu1 %v6778_v9 }
 0x8a6   :  { %4856 = vmatpush1.bf16.msra.mxu0 %v5710_v20  ;;  %4920 = vmatpush1.bf16.msra.mxu1 %v7434_v10 }
 0x8a7   :  { %2838 = vmatprep.mubr.f32.mxu0 %v2629_v25  ;;  %2909 = vmatprep.mubr.f32.mxu1 %v2629_v25  ;;  %v7922_v25 = vld [vmem:[#allocation140_spill] sm:$0xff] }
 0x8a8   :  { %4858 = vmatprep.subr.bf16.mxu0 %v5716_v37  ;;  %4922 = vmatprep.subr.bf16.mxu1 %v7435_v7 }
 0x8aa   :  { %4860 = vmatpush1.bf16.msra.mxu0 %v7436_v55  ;;  %4924 = vmatpush1.bf16.msra.mxu1 %v7437_v43 }
 0x8ab   :  { %4862 = vmatprep.subr.bf16.mxu0 %v7438_v48  ;;  %4926 = vmatprep.subr.bf16.mxu1 %v7439_v5 }
 0x8ae   :  { %4864 = vmatpush1.bf16.msra.mxu0 %v7526_v22  ;;  %4928 = vmatpush1.bf16.msra.mxu1 %v7527_v29 }
 0x8af   :  { %4866 = vmatprep.subr.bf16.mxu0 %v7528_v15  ;;  %4930 = vmatprep.subr.bf16.mxu1 %v7529_v36 }
 0x8b2   :  { %4868 = vmatpush1.bf16.msra.mxu0 %v7530_v39  ;;  %4932 = vmatpush1.bf16.msra.mxu1 %v7531_v30 }
 0x8b3   :  { %4870 = vmatprep.subr.bf16.mxu0 %v7618_v49  ;;  %4934 = vmatprep.subr.bf16.mxu1 %v7619_v6 }
 0x8b6   :  { %4872 = vmatpush1.bf16.msra.mxu0 %v7620_v28  ;;  %4936 = vmatpush1.bf16.msra.mxu1 %v7621_v33 }
 0x8b7   :  { %4874 = vmatprep.subr.bf16.mxu0 %v7622_v11  ;;  %4938 = vmatprep.subr.bf16.mxu1 %v7623_v53 }
 0x8ba   :  { %4876 = vmatpush1.bf16.msra.mxu0 %v7624_v23  ;;  %4940 = vmatpush1.bf16.msra.mxu1 %v7625_v60 }
 0x8bb   :  { %4878 = vmatprep.subr.bf16.mxu0 %v7626_v54  ;;  %4942 = vmatprep.subr.bf16.mxu1 %v7627_v63 }
 0x8be   :  { %4880 = vmatpush1.bf16.msra.mxu0 %v7628_v52  ;;  %4944 = vmatpush1.bf16.msra.mxu1 %v7629_v59 }
 0x8bf   :  { %4882 = vmatprep.subr.bf16.mxu0 %v7630_v47  ;;  %4946 = vmatprep.subr.bf16.mxu1 %v7631_v56 }
 0x8c2   :  { %4884 = vmatpush1.bf16.msra.mxu0 %v7546_v45  ;;  %4948 = vmatpush1.bf16.msra.mxu1 %v7547_v42 }
 0x8c3   :  { %4886 = vmatprep.subr.bf16.mxu0 %v7548_v14  ;;  %4950 = vmatprep.subr.bf16.mxu1 %v7549_v21 }
 0x8c6   :  { %4888 = vmatpush1.bf16.msra.mxu0 %v7550_v24  ;;  %4952 = vmatpush1.bf16.msra.mxu1 %v7551_v13 }
 0x8c7   :  { %4890 = vmatprep.subr.bf16.mxu0 %v7552_v12  ;;  %4954 = vmatprep.subr.bf16.mxu1 %v7553_v8 }
 0x8ca   :  { %4892 = vmatpush1.bf16.msra.mxu0 %v7554_v27  ;;  %4956 = vmatpush1.bf16.msra.mxu1 %v7555_v57 }
 0x8cb   :  { %4894 = vmatprep.subr.bf16.mxu0 %v7906_v26  ;;  %4958 = vmatprep.subr.bf16.mxu1 %v7907_v41 }
 0x8ce   :  { %4896 = vmatpush1.bf16.msra.mxu0 %v7908_v51  ;;  %4960 = vmatpush1.bf16.msra.mxu1 %v7909_v32 }
 0x8cf   :  { %4898 = vmatprep.subr.bf16.mxu0 %v7910_v50  ;;  %4962 = vmatprep.subr.bf16.mxu1 %v7911_v38 }
 0x8d2   :  { %4900 = vmatpush1.bf16.msra.mxu0 %v7912_v2  ;;  %4964 = vmatpush1.bf16.msra.mxu1 %v7913_v0 }
 0x8d3   :  { %4902 = vmatprep.subr.bf16.mxu0 %v7914_v34  ;;  %4966 = vmatprep.subr.bf16.mxu1 %v7915_v61 }
 0x8d6   :  { %4904 = vmatpush1.bf16.msra.mxu0 %v7916_v19  ;;  %4968 = vmatpush1.bf16.msra.mxu1 %v7917_v18 }
 0x8d7   :  { %4906 = vmatprep.subr.bf16.mxu0 %v7918_v31  ;;  %4970 = vmatprep.subr.bf16.mxu1 %v7919_v46 }
 0x8da   :  { %4908 = vmatpush1.bf16.msra.mxu0 %v7920_v3  ;;  %4972 = vmatpush1.bf16.msra.mxu1 %v7921_v4  ;;  %v7931_v3 = vld [vmem:[#allocation77_spill] sm:$0xff] }
 0x8db   :  { %4910 = vmatprep.subr.bf16.mxu0 %v7922_v25  ;;  %4974 = vmatprep.subr.bf16.mxu1 %v7923_v40 }
 0x8de   :  { %4912 = vmatpush1.bf16.msra.mxu0 %v7924_v35  ;;  %4976 = vmatpush1.bf16.msra.mxu1 %v7925_v17 }
 0x8df   :  { %4914 = vmatprep.subr.bf16.mxu0 %v7926_v62  ;;  %4978 = vmatprep.subr.bf16.mxu1 %v7927_v44 }
 0x8e2   :  { %4916 = vmatpush1.bf16.msra.mxu0 %v7928_v1  ;;  %4980 = vmatpush1.bf16.msra.mxu1 %v7929_v16 }
 0x8e3   :  { %4982 = vmatprep.subr.bf16.mxu0 %v7930_v58  ;;  %5046 = vmatprep.subr.bf16.mxu1 %v7931_v3  ;;  %v7933_v58 = vld [vmem:[#allocation88_spill] sm:$0xff] }
 0x8e5   :  { %2839 = vmatmul.mubr.f32.vlgmr.msra.gmra.mrb[30].mxu0 %v6778_v9  ;;  %2910 = vmatmul.mubr.f32.vlgmr.msra.gmra.mrb[30].mxu1 %v6778_v9 }
 0x8e6   :  { %4984 = vmatpush1.bf16.msra.mxu0 %v5710_v20  ;;  %5048 = vmatpush1.bf16.msra.mxu1 %v7434_v10  ;;  %v7932_v20 = vld [vmem:[#allocation138_spill] sm:$0xff] }
 0x8e7   :  { %4986 = vmatprep.subr.bf16.mxu0 %v5716_v37  ;;  %5050 = vmatprep.subr.bf16.mxu1 %v7435_v7 }
 0x8ea   :  { %4988 = vmatpush1.bf16.msra.mxu0 %v7436_v55  ;;  %5052 = vmatpush1.bf16.msra.mxu1 %v7437_v43 }
 0x8eb   :  { %4990 = vmatprep.subr.bf16.mxu0 %v7438_v48  ;;  %5054 = vmatprep.subr.bf16.mxu1 %v7439_v5 }
 0x8ee   :  { %4992 = vmatpush1.bf16.msra.mxu0 %v7526_v22  ;;  %5056 = vmatpush1.bf16.msra.mxu1 %v7527_v29 }
 0x8ef   :  { %4994 = vmatprep.subr.bf16.mxu0 %v7528_v15  ;;  %5058 = vmatprep.subr.bf16.mxu1 %v7529_v36  ;;  %v7936_v36 = vld [vmem:[#allocation91_spill] sm:$0xff] }
 0x8f2   :  { %4996 = vmatpush1.bf16.msra.mxu0 %v7530_v39  ;;  %5060 = vmatpush1.bf16.msra.mxu1 %v7531_v30 }
 0x8f3   :  { %4998 = vmatprep.subr.bf16.mxu0 %v7618_v49  ;;  %5062 = vmatprep.subr.bf16.mxu1 %v7619_v6 }
 0x8f6   :  { %5000 = vmatpush1.bf16.msra.mxu0 %v7620_v28  ;;  %5064 = vmatpush1.bf16.msra.mxu1 %v7621_v33 }
 0x8f7   :  { %5002 = vmatprep.subr.bf16.mxu0 %v7622_v11  ;;  %5066 = vmatprep.subr.bf16.mxu1 %v7623_v53 }
 0x8fa   :  { %5004 = vmatpush1.bf16.msra.mxu0 %v7624_v23  ;;  %5068 = vmatpush1.bf16.msra.mxu1 %v7625_v60 }
 0x8fb   :  { %5006 = vmatprep.subr.bf16.mxu0 %v7626_v54  ;;  %5070 = vmatprep.subr.bf16.mxu1 %v7627_v63  ;;  %v7938_v54 = vld [vmem:[#allocation78_spill] sm:$0xff] }
 0x8fe   :  { %5008 = vmatpush1.bf16.msra.mxu0 %v7628_v52  ;;  %5072 = vmatpush1.bf16.msra.mxu1 %v7629_v59 }
 0x8ff   :  { %5010 = vmatprep.subr.bf16.mxu0 %v7630_v47  ;;  %5074 = vmatprep.subr.bf16.mxu1 %v7631_v56  ;;  %v7939_v47 = vld [vmem:[#allocation152_spill] sm:$0xff] }
 0x902   :  { %5012 = vmatpush1.bf16.msra.mxu0 %v7546_v45  ;;  %5076 = vmatpush1.bf16.msra.mxu1 %v7547_v42 }
 0x903   :  { %5014 = vmatprep.subr.bf16.mxu0 %v7548_v14  ;;  %5078 = vmatprep.subr.bf16.mxu1 %v7549_v21 }
 0x906   :  { %5016 = vmatpush1.bf16.msra.mxu0 %v7550_v24  ;;  %5080 = vmatpush1.bf16.msra.mxu1 %v7551_v13  ;;  %v7937_v24 = vld [vmem:[#allocation92_spill] sm:$0xff] }
 0x907   :  { %5018 = vmatprep.subr.bf16.mxu0 %v7552_v12  ;;  %5082 = vmatprep.subr.bf16.mxu1 %v7553_v8  ;;  %v2943_v13 = vrot.slane %v7937_v24, 6 }
 0x90a   :  { %5020 = vmatpush1.bf16.msra.mxu0 %v7554_v27  ;;  %5084 = vmatpush1.bf16.msra.mxu1 %v7555_v57 }
 0x90b   :  { %5022 = vmatprep.subr.bf16.mxu0 %v7906_v26  ;;  %5086 = vmatprep.subr.bf16.mxu1 %v7907_v41 }
 0x90e   :  { %5024 = vmatpush1.bf16.msra.mxu0 %v7908_v51  ;;  %5088 = vmatpush1.bf16.msra.mxu1 %v7909_v32 }
 0x90f   :  { %5026 = vmatprep.subr.bf16.mxu0 %v7910_v50  ;;  %5090 = vmatprep.subr.bf16.mxu1 %v7911_v38 }
 0x912   :  { %5028 = vmatpush1.bf16.msra.mxu0 %v7912_v2  ;;  %5092 = vmatpush1.bf16.msra.mxu1 %v7913_v0  ;;  %v7942_v0 = vld [vmem:[#allocation93_spill] sm:$0xff] }
 0x913   :  { %5030 = vmatprep.subr.bf16.mxu0 %v7914_v34  ;;  %5094 = vmatprep.subr.bf16.mxu1 %v7915_v61 }
 0x916   :  { %5032 = vmatpush1.bf16.msra.mxu0 %v7916_v19  ;;  %5096 = vmatpush1.bf16.msra.mxu1 %v7917_v18 }
 0x917   :  { %5034 = vmatprep.subr.bf16.mxu0 %v7918_v31  ;;  %5098 = vmatprep.subr.bf16.mxu1 %v7919_v46 }
 0x91a   :  { %5036 = vmatpush1.bf16.msra.mxu0 %v7932_v20  ;;  %5100 = vmatpush1.bf16.msra.mxu1 %v7921_v4 }
 0x91b   :  { %5038 = vmatprep.subr.bf16.mxu0 %v7922_v25  ;;  %5102 = vmatprep.subr.bf16.mxu1 %v7923_v40 }
 0x91e   :  { %5040 = vmatpush1.bf16.msra.mxu0 %v7924_v35  ;;  %5104 = vmatpush1.bf16.msra.mxu1 %v7925_v17  ;;  %v7934_v35 = vld [vmem:[#allocation89_spill] sm:$0xff]  ;;  %v7935_v17 = vld [vmem:[#allocation90_spill] sm:$0xff] }
 0x91f   :  { %5042 = vmatprep.subr.bf16.mxu0 %v7926_v62  ;;  %5106 = vmatprep.subr.bf16.mxu1 %v7927_v44  ;;  %v7940_v44 = vld [vmem:[#allocation153_spill] sm:$0xff] }
 0x922   :  { %5044 = vmatpush1.bf16.msra.mxu0 %v7928_v1  ;;  %5108 = vmatpush1.bf16.msra.mxu1 %v7929_v16  ;;  %v7941_v1 = vld [vmem:[#allocation154_spill] sm:$0xff] }
 0x978   :  { %v2698_v37 = vpop.f32.mrb[28].mxu0  ;;  %v2769_v10 = vpop.f32.mrb[28].mxu1 }
 0x979   :  { %v2920_v7 = vrot.slane %v2698_v37, 2  ;;  %v2922_v55 = vrot.slane %v2769_v10, 2  ;;  %v2700_v43 = vpop.f32.mrb[29].mxu0  ;;  %v2771_v48 = vpop.f32.mrb[29].mxu1 }
 0x97a   :  { %v2921_v5 = vrot.slane %v2700_v43, 2  ;;  %v2923_v15 = vrot.slane %v2771_v48, 2 }
 0x97b   :  { %v2928_v22 = vadd.f32 %v2920_v7, %v7933_v58  ;;  %v2930_v62 = vadd.f32 %v2922_v55, %v7935_v17 }
 0x97c   :  { %v2929_v29 = vadd.f32 %v2921_v5, %v7934_v35  ;;  %v2931_v39 = vadd.f32 %v2923_v15, %v7936_v36 }
 0x97d   :  { %5250 = vtanh.f32 %v2928_v22 }
 0x97e   :  { %5252 = vtanh.f32 %v2929_v29 }
 0x97f   :  { %5254 = vtanh.f32 %v2930_v62 }
 0x980   :  { %5256 = vtanh.f32 %v2931_v39 }
 0x987   :  { %v5251_v30 = vpop.eup %5250 }
 0x988   :  { %v2936_v27 = vmul.f32 0.5, %v5251_v30  ;;  %v5253_v57 = vpop.eup %5252 }
 0x989   :  { %v2938_v42 = vmul.f32 0.5, %v5253_v57  ;;  %v5255_v14 = vpop.eup %5254 }
 0x98a   :  { %v2937_v45 = vadd.f32 0.5, %v2936_v27  ;;  %v5257_v6 = vpop.eup %5256 }
 0x98b   :  { %v2939_v21 = vadd.f32 0.5, %v2938_v42  ;;  %v2940_v28 = vmul.f32 0.5, %v5257_v6 }
 0x98c   :  { %v2946_v12 = vmul.f32 %v5255_v14, %v2937_v45 }
 0x98d   :  { %v2945_v8 = vmul.f32 %v2943_v13, %v2939_v21  ;;  %v2941_v33 = vadd.f32 0.5, %v2940_v28 }
 0x98f   :  { %v2947_v49 = vadd.f32 %v2946_v12, %v2945_v8 }
 0x991   :  { %5258 = vtanh.f32 %v2947_v49 }
 0x99b   :  { %v5259_v11 = vpop.eup %5258 }
 0x99c   :  { %v2949_v53 = vmul.f32 %v5259_v11, %v2941_v33 }
 0x99e   :  { %v2973_v20 = vrot.slane %v2949_v53, 6 }
 0x9b8   :  { %v2840_v23 = vpop.f32.mrb[30].mxu0  ;;  %v2911_v60 = vpop.f32.mrb[30].mxu1 }
 0x9b9   :  { %v2950_v63 = vadd.f32 %v2840_v23, %v7938_v54  ;;  %v2842_v52 = vpop.f32.mrb[31].mxu0  ;;  %v2913_v59 = vpop.f32.mrb[31].mxu1  ;;  %v2952_v16 = vadd.f32 %v2911_v60, %v7940_v44 }
 0x9ba   :  { %v2951_v56 = vadd.f32 %v2842_v52, %v7939_v47  ;;  %v2953_v40 = vadd.f32 %v2913_v59, %v7941_v1 }
 0x9bb   :  { %5260 = vtanh.f32 %v2950_v63 }
 0x9bc   :  { %5262 = vtanh.f32 %v2951_v56 }
 0x9bd   :  { %5264 = vtanh.f32 %v2952_v16 }
 0x9be   :  { %5266 = vtanh.f32 %v2953_v40 }
 0x9c5   :  { %v5261_v9 = vpop.eup %5260 }
 0x9c6   :  { %v2958_v26 = vmul.f32 0.5, %v5261_v9  ;;  %v5263_v41 = vpop.eup %5262 }
 0x9c7   :  { %v2960_v32 = vmul.f32 0.5, %v5263_v41  ;;  %v5265_v50 = vpop.eup %5264 }
 0x9c8   :  { %v2959_v51 = vadd.f32 0.5, %v2958_v26  ;;  %v5267_v19 = vpop.eup %5266 }
 0x9c9   :  { %v2961_v38 = vadd.f32 0.5, %v2960_v32  ;;  %v2962_v18 = vmul.f32 0.5, %v5267_v19 }
 0x9ca   :  { %v2965_v2 = vmul.f32 %v5265_v50, %v2959_v51 }
 0x9cb   :  { %v2964_v34 = vmul.f32 %v2961_v38, %v7942_v0  ;;  %v2963_v31 = vadd.f32 0.5, %v2962_v18 }
 0x9cd   :  { %v2966_v61 = vadd.f32 %v2965_v2, %v2964_v34 }
 0x9cf   :  { %5268 = vtanh.f32 %v2966_v61 }
 0x9d9   :  { %v5269_v46 = vpop.eup %5268 }
 0x9da   :  { %v2968_v3 = vmul.f32 %v5269_v46, %v2963_v31 }
 0x9dc   :  { %2969 = vst [vmem:[#allocation8 + $0xc] sm:$0x3] %v2968_v3  ;;  %v2971_v4 = vrot.slane %v2968_v3, 2 }
 0x9de   :  { %v2974_v25 = vrot.slane %v2971_v4, 6 }
 0x9e0   :  { %3041 = vmatprep.mubr.f32.mxu0 %v2974_v25  ;;  %3112 = vmatprep.mubr.f32.mxu1 %v2974_v25 }
 0x9e1   :  { %3042 = vmatmul.mubr.f32.vlgmr.msra.gmra.mrb[32].mxu0 %v2973_v20  ;;  %3113 = vmatmul.mubr.f32.vlgmr.msra.gmra.mrb[32].mxu1 %v2973_v20 }
 0xab4   :  { %v3043_v37 = vpop.f32.mrb[32].mxu0  ;;  %v3114_v10 = vpop.f32.mrb[32].mxu1 }
 0xab5   :  { %v3119_v7 = vadd.f32 %v3043_v37, %v7938_v54  ;;  %v3045_v55 = vpop.f32.mrb[33].mxu0  ;;  %v3116_v43 = vpop.f32.mrb[33].mxu1  ;;  %v3121_v5 = vadd.f32 %v3114_v10, %v7940_v44 }
 0xab6   :  { %v3120_v48 = vadd.f32 %v3045_v55, %v7939_v47  ;;  %v3122_v58 = vadd.f32 %v3116_v43, %v7941_v1 }
 0xab7   :  { %5270 = vtanh.f32 %v3119_v7 }
 0xab8   :  { %5272 = vtanh.f32 %v3120_v48 }
 0xab9   :  { %5274 = vtanh.f32 %v3121_v5 }
 0xaba   :  { %5276 = vtanh.f32 %v3122_v58 }
 0xac1   :  { %v5271_v22 = vpop.eup %5270 }
 0xac2   :  { %v3127_v35 = vmul.f32 0.5, %v5271_v22  ;;  %v5273_v29 = vpop.eup %5272 }
 0xac3   :  { %v3129_v62 = vmul.f32 0.5, %v5273_v29  ;;  %v5275_v15 = vpop.eup %5274 }
 0xac4   :  { %v3128_v17 = vadd.f32 0.5, %v3127_v35  ;;  %v5277_v57 = vpop.eup %5276 }
 0xac5   :  { %v3130_v36 = vadd.f32 0.5, %v3129_v62  ;;  %v3131_v45 = vmul.f32 0.5, %v5277_v57 }
 0xac6   :  { %v3134_v39 = vmul.f32 %v5275_v15, %v3128_v17 }
 0xac7   :  { %v3133_v30 = vmul.f32 %v3130_v36, %v2966_v61  ;;  %v3132_v42 = vadd.f32 0.5, %v3131_v45 }
 0xac9   :  { %v3135_v27 = vadd.f32 %v3134_v39, %v3133_v30 }
 0xacb   :  { %5278 = vtanh.f32 %v3135_v27 }
 0xad5   :  { %v5279_v14 = vpop.eup %5278 }
 0xad6   :  { %v3137_v21 = vmul.f32 %v5279_v14, %v3132_v42 }
 0xad8   :  { %3138 = vst [vmem:[#allocation8 + $0xe] sm:$0x3] %v3137_v21 }
 0xad9   :  { %5357 = shalt.err (!%p5354_p0)
}
 0xada   :  { %s5358_s14 = scalar_lea.hbm %s6944_s5, 256 }
 0xadb   :  { %p5359_p1 = scmp.ne.s32.totalorder %s6944_s5, %s5358_s14  ;;  %p5362_p2 = scmp.lt.u32.totalorder %s5358_s14, %s6944_s5 }
 0xadd   :  { %p5364_p3 = pnand %p5362_p2, %p5359_p1 }
 0xadf   :  { %5367 = shalt.err (!%p5364_p3)
}
 0xae0   :  { %3150 = dma.vmem_to_hbm [thread:$0]  %s3145_s10, 256, %s6944_s5, [#allocation4], %s5378_s1, %s5378_s1, %s5379_s17  }
 0xae1   :  { %5372 = dma.done.wait [#allocation4], 256  }
 0xae2   :  { %5373 = vsyncadd [#allocation4], 4294967040 }
 0xae3   :  { %3154 = vsyncpa [#allocation3], 1 }
 0xae4   :  { %3155 = vsyncpa [#allocation6], 1 }
 0xae5   :  { %3156 = vsyncpa [#allocation4], 1 }

</bundles_post_ra>
